<compile_context>
chip_gen: v6e
topology: v6e:2x2x1
jax: 0.10.0
libtpu: 0.0.40
codegen_flags: <defaults>
</compile_context>

<pallas_src>
import functools

import jax
import jax.numpy as jnp
from jax import lax
from jax.experimental import pallas as pl
from jax.experimental.pallas import tpu as pltpu

LANE = 128
_VMEM_LIMIT = 32 * 1024 * 1024  # fits the fc1 tiles w/ headroom on v5e/v6e/v7x


def _rup(x, m):
    return -(-x // m) * m


# ----------------------------- Pallas kernels ------------------------------

def conv1_pool_relu_kernel(x0_ref, x1_ref, x2_ref, x3_ref, w_ref, b_ref, o_ref):
    """Fused conv1 (4 pooling-quadrant matmuls) + 2x2 max-pool + bias + relu."""
    w = w_ref[...]
    a0 = jnp.dot(x0_ref[...], w, preferred_element_type=jnp.float32)
    a1 = jnp.dot(x1_ref[...], w, preferred_element_type=jnp.float32)
    a2 = jnp.dot(x2_ref[...], w, preferred_element_type=jnp.float32)
    a3 = jnp.dot(x3_ref[...], w, preferred_element_type=jnp.float32)
    m = jnp.maximum(jnp.maximum(a0, a1), jnp.maximum(a2, a3))
    o_ref[...] = jnp.maximum(m + b_ref[...], 0.0)


def matmul_bias_relu_kernel(x_ref, w_ref, b_ref, o_ref):
    acc = jnp.dot(x_ref[...], w_ref[...], preferred_element_type=jnp.float32)
    o_ref[...] = jnp.maximum(acc + b_ref[...], 0.0)


def matmul_bias_logsoftmax_kernel(x_ref, w_ref, b_ref, o_ref, *, valid_n):
    logits = jnp.dot(x_ref[...], w_ref[...], preferred_element_type=jnp.float32)
    logits = logits + b_ref[...]
    lane = lax.broadcasted_iota(jnp.int32, logits.shape, 1)
    mask = lane < valid_n                       # ignore lane-padding columns
    masked = jnp.where(mask, logits, -jnp.inf)
    mx = jnp.max(masked, axis=1, keepdims=True)
    e = jnp.where(mask, jnp.exp(masked - mx), 0.0)
    lse = mx + jnp.log(jnp.sum(e, axis=1, keepdims=True))
    o_ref[...] = logits - lse


# --------------------------- tiled matmul wrapper ---------------------------

def _row_tiled_call(kernel, xs, w, b, *, tm_max=512, transcendentals=0):
    """Run `kernel` over row tiles of the shared-M inputs `xs`.

    xs: list of (M, K) f32 arrays (K lane-aligned); w: (K, Np); b: (1, Np).
    Returns (M, Np) f32.  The single grid axis tiles M ("parallel" -> can be
    sharded across both TCs on v7x); weight/bias block indices are constant so
    they stay resident across the grid.
    """
    M, K = xs[0].shape
    Np = w.shape[1]
    Mp = _rup(M, 8)
    tm = min(tm_max, Mp)
    Mp = _rup(Mp, tm)
    if Mp != M:
        xs = [jnp.pad(x, ((0, Mp - M), (0, 0))) for x in xs]
    grid = (Mp // tm,)

    x_spec = pl.BlockSpec((tm, K), lambda i: (i, 0))
    w_spec = pl.BlockSpec((K, Np), lambda i: (0, 0))
    b_spec = pl.BlockSpec((1, Np), lambda i: (0, 0))
    o_spec = pl.BlockSpec((tm, Np), lambda i: (i, 0))

    cost = pl.CostEstimate(
        flops=2 * Mp * K * Np * len(xs),
        transcendentals=transcendentals,
        bytes_accessed=4 * (len(xs) * Mp * K + K * Np + Np + Mp * Np),
    )
    out = pl.pallas_call(
        kernel,
        out_shape=jax.ShapeDtypeStruct((Mp, Np), jnp.float32),
        grid=grid,
        in_specs=[x_spec] * len(xs) + [w_spec, b_spec],
        out_specs=o_spec,
        compiler_params=pltpu.CompilerParams(
            dimension_semantics=("parallel",),
            vmem_limit_bytes=_VMEM_LIMIT,
        ),
        cost_estimate=cost,
    )(*xs, w, b)
    return out[:M]


# ------------------------------ parameters ---------------------------------

def init_params(key):
    k = jax.random.split(key, 8)
    s = 0.05
    return {
        "conv1_w": s * jax.random.normal(k[0], (10, 1, 5, 5), jnp.float32),
        "conv1_b": s * jax.random.normal(k[1], (10,), jnp.float32),
        "conv2_w": s * jax.random.normal(k[2], (20, 10, 3, 3), jnp.float32),
        "conv2_b": s * jax.random.normal(k[3], (20,), jnp.float32),
        "fc1_w": s * jax.random.normal(k[4], (500, 2000), jnp.float32),
        "fc1_b": s * jax.random.normal(k[5], (500,), jnp.float32),
        "fc2_w": s * jax.random.normal(k[6], (10, 500), jnp.float32),
        "fc2_b": s * jax.random.normal(k[7], (10,), jnp.float32),
    }


def _pad2(a, rows, cols):
    return jnp.pad(a, ((0, rows - a.shape[0]), (0, cols - a.shape[1])))


def prepare_params(params):
    """One-time conversion of PyTorch-layout params into pre-transposed,
    lane-aligned matmul operands (hoisted out of the per-step forward)."""
    w1 = params["conv1_w"].reshape(10, 25).T          # (25, 10), cols=(kh,kw)
    w2 = params["conv2_w"].reshape(20, 90).T          # (90, 20), cols=(cin,kh,kw)
    w3 = params["fc1_w"].T                            # (2000, 500)
    w4 = params["fc2_w"].T                            # (500, 10)
    return {
        "w1": _pad2(w1, 128, 128),
        "b1": jnp.pad(params["conv1_b"], (0, 128 - 10)).reshape(1, 128),
        "w2": _pad2(w2, 128, 128),
        "b2": jnp.pad(params["conv2_b"], (0, 128 - 20)).reshape(1, 128),
        "w3": _pad2(w3, 2048, 512),
        "b3": jnp.pad(params["fc1_b"], (0, 512 - 500)).reshape(1, 512),
        "w4": _pad2(w4, 512, 128),
        "b4": jnp.pad(params["fc2_b"], (0, 128 - 10)).reshape(1, 128),
    }


# ------------------------------ Digit forward ------------------------------

def digit_forward(kp, x):
    """x: (N, 1, 28, 28) float32 (NCHW) -> (N, 10) log-probabilities."""
    N = x.shape[0]

    # conv1 (1 -> 10, 5x5) + relu + max_pool2d(2, 2), fused in one kernel.
    # Stride-2 patch extraction per pooling quadrant (dy, dx) in {0,1}^2:
    # rows are ordered (n, ph, pw) identically across quadrants, so the kernel's
    # 4-way max is exactly the 2x2 pool of the conv1 pre-activation.
    quads = []
    for dy in (0, 1):
        for dx in (0, 1):
            p = lax.conv_general_dilated_patches(
                x[:, :, dy:, dx:], filter_shape=(5, 5), window_strides=(2, 2),
                padding="VALID",
                dimension_numbers=("NCHW", "OIHW", "NHWC"))      # (N, 12, 12, 25)
            p = p.reshape(N * 144, 25)
            quads.append(jnp.pad(p, ((0, 0), (0, 128 - 25))))
    pooled = _row_tiled_call(conv1_pool_relu_kernel, quads, kp["w1"], kp["b1"])
    pooled = pooled.reshape(N, 12, 12, 128)[:, :, :, :10]         # NHWC, 10 ch

    # conv2 (10 -> 20, 3x3) + relu  (patch columns ordered (cin, kh, kw),
    # matching the PyTorch weight flatten).
    p2 = lax.conv_general_dilated_patches(
        pooled, filter_shape=(3, 3), window_strides=(1, 1), padding="VALID",
        dimension_numbers=("NHWC", "HWIO", "NHWC"))               # (N, 10, 10, 90)
    p2 = jnp.pad(p2.reshape(N * 100, 90), ((0, 0), (0, 128 - 90)))
    y2 = _row_tiled_call(matmul_bias_relu_kernel, [p2], kp["w2"], kp["b2"])

    # flatten exactly like torch .view(N, -1) on NCHW (N, 20, 10, 10)
    flat = (y2.reshape(N, 10, 10, 128)[:, :, :, :20]
              .transpose(0, 3, 1, 2).reshape(N, 2000))
    flat = jnp.pad(flat, ((0, 0), (0, 2048 - 2000)))

    # fc1 + relu (output stays lane-padded to 512; padded lanes are exact zeros)
    h = _row_tiled_call(matmul_bias_relu_kernel, [flat], kp["w3"], kp["b3"])

    # fc2 + log_softmax(dim=1) fused, masked to the 10 valid classes
    out = _row_tiled_call(
        functools.partial(matmul_bias_logsoftmax_kernel, valid_n=10),
        [h], kp["w4"], kp["b4"],
        transcendentals=_rup(N, 8) * 128)
    return out[:, :10]


# ------------------------- pure-JAX reference check -------------------------

def digit_reference(params, x):
    y = lax.conv_general_dilated(x, params["conv1_w"], (1, 1), "VALID",
                                 dimension_numbers=("NCHW", "OIHW", "NCHW"))
    y = jax.nn.relu(y + params["conv1_b"][None, :, None, None])
    y = lax.reduce_window(y, -jnp.inf, lax.max, (1, 1, 2, 2), (1, 1, 2, 2),
                          "VALID")
    y = lax.conv_general_dilated(y, params["conv2_w"], (1, 1), "VALID",
                                 dimension_numbers=("NCHW", "OIHW", "NCHW"))
    y = jax.nn.relu(y + params["conv2_b"][None, :, None, None])
    y = y.reshape(x.shape[0], -1)
    y = jax.nn.relu(y @ params["fc1_w"].T + params["fc1_b"])
    y = y @ params["fc2_w"].T + params["fc2_b"]
    return jax.nn.log_softmax(y, axis=1)


if __name__ == "__main__":
    key = jax.random.PRNGKey(0)
    pkey, xkey = jax.random.split(key)
    params = init_params(pkey)
    kp = prepare_params(params)           # hoisted one-time weight prep
    # 28x28 single-channel input is implied by fc1's 20*10*10 input size.
    x = jax.random.normal(xkey, (2, 1, 28, 28), jnp.float32)

    fwd = jax.jit(digit_forward)
    out = fwd(kp, x)
    jax.block_until_ready(out)
    assert out.shape == (2, 10)

    ref = digit_reference(params, x)
    assert bool(jnp.allclose(out, ref, atol=2e-3, rtol=2e-3))
    print("KERNEL_OK")
</pallas_src>

<mosaic_0001>
module attributes {stable_mosaic.version = 11 : i64} {
  func.func @conv1_pool_relu_kernel(%arg0: i32, %arg1: memref<288x128xf32, #tpu.memory_space<vmem>>, %arg2: memref<288x128xf32, #tpu.memory_space<vmem>>, %arg3: memref<288x128xf32, #tpu.memory_space<vmem>>, %arg4: memref<288x128xf32, #tpu.memory_space<vmem>>, %arg5: memref<128x128xf32, #tpu.memory_space<vmem>>, %arg6: memref<1x128xf32, #tpu.memory_space<vmem>>, %arg7: memref<288x128xf32, #tpu.memory_space<vmem>>) attributes {dimension_semantics = [#tpu.dimension_semantics<parallel>], iteration_bounds = array<i64: 1>, scalar_prefetch = 0 : i64, scratch_operands = 0 : i64, tpu.core_type = #tpu.core_type<tc>, window_params = [{transform_indices = @transform_0, window_bounds = array<i64: 288, 128>}, {transform_indices = @transform_1, window_bounds = array<i64: 288, 128>}, {transform_indices = @transform_2, window_bounds = array<i64: 288, 128>}, {transform_indices = @transform_3, window_bounds = array<i64: 288, 128>}, {pipeline_mode = #tpu.pipeline_mode<synchronous>, transform_indices = @transform_4, window_bounds = array<i64: 128, 128>}, {pipeline_mode = #tpu.pipeline_mode<synchronous>, transform_indices = @transform_5, window_bounds = array<i64: 1, 128>}, {transform_indices = @transform_6, window_bounds = array<i64: 288, 128>}]} {
    %c0 = arith.constant 0 : index
    %c0_0 = arith.constant 0 : index
    %0 = vector.load %arg5[%c0, %c0_0] : memref<128x128xf32, #tpu.memory_space<vmem>>, vector<128x128xf32>
    %c0_1 = arith.constant 0 : index
    %c0_2 = arith.constant 0 : index
    %1 = vector.load %arg1[%c0_1, %c0_2] : memref<288x128xf32, #tpu.memory_space<vmem>>, vector<288x128xf32>
    %cst = arith.constant dense<0.000000e+00> : vector<288x128xf32>
    %2 = tpu.matmul %1, %0, %cst {dimension_numbers = #tpu.dot_dimension_numbers<[1], [0], [0], [1], [0, 0, 1, 1], [], []>} : vector<288x128xf32>, vector<128x128xf32>, vector<288x128xf32> -> vector<288x128xf32>
    %c0_3 = arith.constant 0 : index
    %c0_4 = arith.constant 0 : index
    %3 = vector.load %arg2[%c0_3, %c0_4] : memref<288x128xf32, #tpu.memory_space<vmem>>, vector<288x128xf32>
    %cst_5 = arith.constant dense<0.000000e+00> : vector<288x128xf32>
    %4 = tpu.matmul %3, %0, %cst_5 {dimension_numbers = #tpu.dot_dimension_numbers<[1], [0], [0], [1], [0, 0, 1, 1], [], []>} : vector<288x128xf32>, vector<128x128xf32>, vector<288x128xf32> -> vector<288x128xf32>
    %c0_6 = arith.constant 0 : index
    %c0_7 = arith.constant 0 : index
    %5 = vector.load %arg3[%c0_6, %c0_7] : memref<288x128xf32, #tpu.memory_space<vmem>>, vector<288x128xf32>
    %cst_8 = arith.constant dense<0.000000e+00> : vector<288x128xf32>
    %6 = tpu.matmul %5, %0, %cst_8 {dimension_numbers = #tpu.dot_dimension_numbers<[1], [0], [0], [1], [0, 0, 1, 1], [], []>} : vector<288x128xf32>, vector<128x128xf32>, vector<288x128xf32> -> vector<288x128xf32>
    %c0_9 = arith.constant 0 : index
    %c0_10 = arith.constant 0 : index
    %7 = vector.load %arg4[%c0_9, %c0_10] : memref<288x128xf32, #tpu.memory_space<vmem>>, vector<288x128xf32>
    %cst_11 = arith.constant dense<0.000000e+00> : vector<288x128xf32>
    %8 = tpu.matmul %7, %0, %cst_11 {dimension_numbers = #tpu.dot_dimension_numbers<[1], [0], [0], [1], [0, 0, 1, 1], [], []>} : vector<288x128xf32>, vector<128x128xf32>, vector<288x128xf32> -> vector<288x128xf32>
    %9 = arith.maximumf %2, %4 : vector<288x128xf32>
    %10 = arith.maximumf %6, %8 : vector<288x128xf32>
    %11 = arith.maximumf %9, %10 : vector<288x128xf32>
    %c0_12 = arith.constant 0 : index
    %c0_13 = arith.constant 0 : index
    %12 = vector.load %arg6[%c0_12, %c0_13] : memref<1x128xf32, #tpu.memory_space<vmem>>, vector<1x128xf32>
    %13 = vector.broadcast %12 : vector<1x128xf32> to vector<288x128xf32>
    %14 = arith.addf %11, %13 : vector<288x128xf32>
    %cst_14 = arith.constant 0.000000e+00 : f32
    %15 = vector.broadcast %cst_14 : f32 to vector<288x128xf32>
    %16 = arith.maximumf %14, %15 : vector<288x128xf32>
    %c0_15 = arith.constant 0 : index
    %c0_16 = arith.constant 0 : index
    %17 = vector.load %arg7[%c0_15, %c0_16] : memref<288x128xf32, #tpu.memory_space<vmem>>, vector<288x128xf32>
    tpu.vector_store %arg7[%c0_15, %c0_16], %16 {strides = array<i32>} : memref<288x128xf32, #tpu.memory_space<vmem>>, vector<288x128xf32>,
    return
  }
  func.func @transform_0(%arg0: i32) -> (i32, i32) {
    %c0_i32 = arith.constant 0 : i32
    %c0_i32_0 = arith.constant 0 : i32
    return %arg0, %c0_i32 : i32, i32
  }
  func.func @transform_1(%arg0: i32) -> (i32, i32) {
    %c0_i32 = arith.constant 0 : i32
    %c0_i32_0 = arith.constant 0 : i32
    return %arg0, %c0_i32 : i32, i32
  }
  func.func @transform_2(%arg0: i32) -> (i32, i32) {
    %c0_i32 = arith.constant 0 : i32
    %c0_i32_0 = arith.constant 0 : i32
    return %arg0, %c0_i32 : i32, i32
  }
  func.func @transform_3(%arg0: i32) -> (i32, i32) {
    %c0_i32 = arith.constant 0 : i32
    %c0_i32_0 = arith.constant 0 : i32
    return %arg0, %c0_i32 : i32, i32
  }
  func.func @transform_4(%arg0: i32) -> (i32, i32) {
    %c0_i32 = arith.constant 0 : i32
    %c0_i32_0 = arith.constant 0 : i32
    %c0_i32_1 = arith.constant 0 : i32
    return %c0_i32, %c0_i32_0 : i32, i32
  }
  func.func @transform_5(%arg0: i32) -> (i32, i32) {
    %c0_i32 = arith.constant 0 : i32
    %c0_i32_0 = arith.constant 0 : i32
    %c0_i32_1 = arith.constant 0 : i32
    return %c0_i32, %c0_i32_0 : i32, i32
  }
  func.func @transform_6(%arg0: i32) -> (i32, i32) {
    %c0_i32 = arith.constant 0 : i32
    %c0_i32_0 = arith.constant 0 : i32
    return %arg0, %c0_i32 : i32, i32
  }
}

module attributes {stable_mosaic.version = 11 : i64} {
  func.func @matmul_bias_relu_kernel(%arg0: i32, %arg1: memref<200x128xf32, #tpu.memory_space<vmem>>, %arg2: memref<128x128xf32, #tpu.memory_space<vmem>>, %arg3: memref<1x128xf32, #tpu.memory_space<vmem>>, %arg4: memref<200x128xf32, #tpu.memory_space<vmem>>) attributes {dimension_semantics = [#tpu.dimension_semantics<parallel>], iteration_bounds = array<i64: 1>, scalar_prefetch = 0 : i64, scratch_operands = 0 : i64, tpu.core_type = #tpu.core_type<tc>, window_params = [{transform_indices = @transform_0, window_bounds = array<i64: 200, 128>}, {pipeline_mode = #tpu.pipeline_mode<synchronous>, transform_indices = @transform_1, window_bounds = array<i64: 128, 128>}, {pipeline_mode = #tpu.pipeline_mode<synchronous>, transform_indices = @transform_2, window_bounds = array<i64: 1, 128>}, {transform_indices = @transform_3, window_bounds = array<i64: 200, 128>}]} {
    %c0 = arith.constant 0 : index
    %c0_0 = arith.constant 0 : index
    %0 = vector.load %arg1[%c0, %c0_0] : memref<200x128xf32, #tpu.memory_space<vmem>>, vector<200x128xf32>
    %c0_1 = arith.constant 0 : index
    %c0_2 = arith.constant 0 : index
    %1 = vector.load %arg2[%c0_1, %c0_2] : memref<128x128xf32, #tpu.memory_space<vmem>>, vector<128x128xf32>
    %cst = arith.constant dense<0.000000e+00> : vector<200x128xf32>
    %2 = tpu.matmul %0, %1, %cst {dimension_numbers = #tpu.dot_dimension_numbers<[1], [0], [0], [1], [0, 0, 1, 1], [], []>} : vector<200x128xf32>, vector<128x128xf32>, vector<200x128xf32> -> vector<200x128xf32>
    %c0_3 = arith.constant 0 : index
    %c0_4 = arith.constant 0 : index
    %3 = vector.load %arg3[%c0_3, %c0_4] : memref<1x128xf32, #tpu.memory_space<vmem>>, vector<1x128xf32>
    %4 = vector.broadcast %3 : vector<1x128xf32> to vector<200x128xf32>
    %5 = arith.addf %2, %4 : vector<200x128xf32>
    %cst_5 = arith.constant 0.000000e+00 : f32
    %6 = vector.broadcast %cst_5 : f32 to vector<200x128xf32>
    %7 = arith.maximumf %5, %6 : vector<200x128xf32>
    %c0_6 = arith.constant 0 : index
    %c0_7 = arith.constant 0 : index
    %8 = vector.load %arg4[%c0_6, %c0_7] : memref<200x128xf32, #tpu.memory_space<vmem>>, vector<200x128xf32>
    tpu.vector_store %arg4[%c0_6, %c0_7], %7 {strides = array<i32>} : memref<200x128xf32, #tpu.memory_space<vmem>>, vector<200x128xf32>,
    return
  }
  func.func @transform_0(%arg0: i32) -> (i32, i32) {
    %c0_i32 = arith.constant 0 : i32
    %c0_i32_0 = arith.constant 0 : i32
    return %arg0, %c0_i32 : i32, i32
  }
  func.func @transform_1(%arg0: i32) -> (i32, i32) {
    %c0_i32 = arith.constant 0 : i32
    %c0_i32_0 = arith.constant 0 : i32
    %c0_i32_1 = arith.constant 0 : i32
    return %c0_i32, %c0_i32_0 : i32, i32
  }
  func.func @transform_2(%arg0: i32) -> (i32, i32) {
    %c0_i32 = arith.constant 0 : i32
    %c0_i32_0 = arith.constant 0 : i32
    %c0_i32_1 = arith.constant 0 : i32
    return %c0_i32, %c0_i32_0 : i32, i32
  }
  func.func @transform_3(%arg0: i32) -> (i32, i32) {
    %c0_i32 = arith.constant 0 : i32
    %c0_i32_0 = arith.constant 0 : i32
    return %arg0, %c0_i32 : i32, i32
  }
}

module attributes {stable_mosaic.version = 11 : i64} {
  func.func @matmul_bias_relu_kernel(%arg0: i32, %arg1: memref<8x2048xf32, #tpu.memory_space<vmem>>, %arg2: memref<2048x512xf32, #tpu.memory_space<vmem>>, %arg3: memref<1x512xf32, #tpu.memory_space<vmem>>, %arg4: memref<8x512xf32, #tpu.memory_space<vmem>>) attributes {dimension_semantics = [#tpu.dimension_semantics<parallel>], iteration_bounds = array<i64: 1>, scalar_prefetch = 0 : i64, scratch_operands = 0 : i64, tpu.core_type = #tpu.core_type<tc>, window_params = [{transform_indices = @transform_0, window_bounds = array<i64: 8, 2048>}, {pipeline_mode = #tpu.pipeline_mode<synchronous>, transform_indices = @transform_1, window_bounds = array<i64: 2048, 512>}, {pipeline_mode = #tpu.pipeline_mode<synchronous>, transform_indices = @transform_2, window_bounds = array<i64: 1, 512>}, {transform_indices = @transform_3, window_bounds = array<i64: 8, 512>}]} {
    %c0 = arith.constant 0 : index
    %c0_0 = arith.constant 0 : index
    %0 = vector.load %arg1[%c0, %c0_0] : memref<8x2048xf32, #tpu.memory_space<vmem>>, vector<8x2048xf32>
    %c0_1 = arith.constant 0 : index
    %c0_2 = arith.constant 0 : index
    %1 = vector.load %arg2[%c0_1, %c0_2] : memref<2048x512xf32, #tpu.memory_space<vmem>>, vector<2048x512xf32>
    %cst = arith.constant dense<0.000000e+00> : vector<8x512xf32>
    %2 = tpu.matmul %0, %1, %cst {dimension_numbers = #tpu.dot_dimension_numbers<[1], [0], [0], [1], [0, 0, 1, 1], [], []>} : vector<8x2048xf32>, vector<2048x512xf32>, vector<8x512xf32> -> vector<8x512xf32>
    %c0_3 = arith.constant 0 : index
    %c0_4 = arith.constant 0 : index
    %3 = vector.load %arg3[%c0_3, %c0_4] : memref<1x512xf32, #tpu.memory_space<vmem>>, vector<1x512xf32>
    %4 = vector.broadcast %3 : vector<1x512xf32> to vector<8x512xf32>
    %5 = arith.addf %2, %4 : vector<8x512xf32>
    %cst_5 = arith.constant 0.000000e+00 : f32
    %6 = vector.broadcast %cst_5 : f32 to vector<8x512xf32>
    %7 = arith.maximumf %5, %6 : vector<8x512xf32>
    %c0_6 = arith.constant 0 : index
    %c0_7 = arith.constant 0 : index
    %8 = vector.load %arg4[%c0_6, %c0_7] : memref<8x512xf32, #tpu.memory_space<vmem>>, vector<8x512xf32>
    tpu.vector_store %arg4[%c0_6, %c0_7], %7 {strides = array<i32>} : memref<8x512xf32, #tpu.memory_space<vmem>>, vector<8x512xf32>,
    return
  }
  func.func @transform_0(%arg0: i32) -> (i32, i32) {
    %c0_i32 = arith.constant 0 : i32
    %c0_i32_0 = arith.constant 0 : i32
    return %arg0, %c0_i32 : i32, i32
  }
  func.func @transform_1(%arg0: i32) -> (i32, i32) {
    %c0_i32 = arith.constant 0 : i32
    %c0_i32_0 = arith.constant 0 : i32
    %c0_i32_1 = arith.constant 0 : i32
    return %c0_i32, %c0_i32_0 : i32, i32
  }
  func.func @transform_2(%arg0: i32) -> (i32, i32) {
    %c0_i32 = arith.constant 0 : i32
    %c0_i32_0 = arith.constant 0 : i32
    %c0_i32_1 = arith.constant 0 : i32
    return %c0_i32, %c0_i32_0 : i32, i32
  }
  func.func @transform_3(%arg0: i32) -> (i32, i32) {
    %c0_i32 = arith.constant 0 : i32
    %c0_i32_0 = arith.constant 0 : i32
    return %arg0, %c0_i32 : i32, i32
  }
}

module attributes {stable_mosaic.version = 11 : i64} {
  func.func @matmul_bias_logsoftmax_kernel(%arg0: i32, %arg1: memref<8x512xf32, #tpu.memory_space<vmem>>, %arg2: memref<512x128xf32, #tpu.memory_space<vmem>>, %arg3: memref<1x128xf32, #tpu.memory_space<vmem>>, %arg4: memref<8x128xf32, #tpu.memory_space<vmem>>) attributes {dimension_semantics = [#tpu.dimension_semantics<parallel>], iteration_bounds = array<i64: 1>, scalar_prefetch = 0 : i64, scratch_operands = 0 : i64, tpu.core_type = #tpu.core_type<tc>, window_params = [{transform_indices = @transform_0, window_bounds = array<i64: 8, 512>}, {pipeline_mode = #tpu.pipeline_mode<synchronous>, transform_indices = @transform_1, window_bounds = array<i64: 512, 128>}, {pipeline_mode = #tpu.pipeline_mode<synchronous>, transform_indices = @transform_2, window_bounds = array<i64: 1, 128>}, {transform_indices = @transform_3, window_bounds = array<i64: 8, 128>}]} {
    %c0 = arith.constant 0 : index
    %c0_0 = arith.constant 0 : index
    %0 = vector.load %arg1[%c0, %c0_0] : memref<8x512xf32, #tpu.memory_space<vmem>>, vector<8x512xf32>
    %c0_1 = arith.constant 0 : index
    %c0_2 = arith.constant 0 : index
    %1 = vector.load %arg2[%c0_1, %c0_2] : memref<512x128xf32, #tpu.memory_space<vmem>>, vector<512x128xf32>
    %cst = arith.constant dense<0.000000e+00> : vector<8x128xf32>
    %2 = tpu.matmul %0, %1, %cst {dimension_numbers = #tpu.dot_dimension_numbers<[1], [0], [0], [1], [0, 0, 1, 1], [], []>} : vector<8x512xf32>, vector<512x128xf32>, vector<8x128xf32> -> vector<8x128xf32>
    %c0_3 = arith.constant 0 : index
    %c0_4 = arith.constant 0 : index
    %3 = vector.load %arg3[%c0_3, %c0_4] : memref<1x128xf32, #tpu.memory_space<vmem>>, vector<1x128xf32>
    %4 = vector.broadcast %3 : vector<1x128xf32> to vector<8x128xf32>
    %5 = arith.addf %2, %4 : vector<8x128xf32>
    %6 = tpu.iota {dimensions = array<i32: 1>} : vector<8x128xi32>
    %c10_i32 = arith.constant 10 : i32
    %7 = vector.broadcast %c10_i32 : i32 to vector<8x128xi32>
    %8 = arith.cmpi slt, %6, %7 : vector<8x128xi32>
    %cst_5 = arith.constant 0xFF800000 : f32
    %9 = vector.broadcast %cst_5 : f32 to vector<8x128xf32>
    %10 = arith.select %8, %5, %9 : vector<8x128xi1>, vector<8x128xf32>
    %cst_6 = arith.constant dense<0xFF800000> : vector<8xf32>
    %11 = vector.multi_reduction <maximumf>, %10, %cst_6 [1] : vector<8x128xf32> to vector<8xf32>
    %12 = vector.shape_cast %11 : vector<8xf32> to vector<8x1xf32>
    %13 = vector.broadcast %12 : vector<8x1xf32> to vector<8x128xf32>
    %14 = arith.subf %10, %13 : vector<8x128xf32>
    %15 = math.exp %14 : vector<8x128xf32>
    %cst_7 = arith.constant 0.000000e+00 : f32
    %16 = vector.broadcast %cst_7 : f32 to vector<8x128xf32>
    %17 = arith.select %8, %15, %16 : vector<8x128xi1>, vector<8x128xf32>
    %cst_8 = arith.constant dense<0.000000e+00> : vector<8xf32>
    %18 = vector.multi_reduction <add>, %17, %cst_8 [1] : vector<8x128xf32> to vector<8xf32>
    %19 = vector.shape_cast %18 : vector<8xf32> to vector<8x1xf32>
    %20 = math.log %19 : vector<8x1xf32>
    %21 = arith.addf %12, %20 : vector<8x1xf32>
    %22 = vector.broadcast %21 : vector<8x1xf32> to vector<8x128xf32>
    %23 = arith.subf %5, %22 : vector<8x128xf32>
    %c0_9 = arith.constant 0 : index
    %c0_10 = arith.constant 0 : index
    %24 = vector.load %arg4[%c0_9, %c0_10] : memref<8x128xf32, #tpu.memory_space<vmem>>, vector<8x128xf32>
    tpu.vector_store %arg4[%c0_9, %c0_10], %23 {strides = array<i32>} : memref<8x128xf32, #tpu.memory_space<vmem>>, vector<8x128xf32>,
    return
  }
  func.func @transform_0(%arg0: i32) -> (i32, i32) {
    %c0_i32 = arith.constant 0 : i32
    %c0_i32_0 = arith.constant 0 : i32
    return %arg0, %c0_i32 : i32, i32
  }
  func.func @transform_1(%arg0: i32) -> (i32, i32) {
    %c0_i32 = arith.constant 0 : i32
    %c0_i32_0 = arith.constant 0 : i32
    %c0_i32_1 = arith.constant 0 : i32
    return %c0_i32, %c0_i32_0 : i32, i32
  }
  func.func @transform_2(%arg0: i32) -> (i32, i32) {
    %c0_i32 = arith.constant 0 : i32
    %c0_i32_0 = arith.constant 0 : i32
    %c0_i32_1 = arith.constant 0 : i32
    return %c0_i32, %c0_i32_0 : i32, i32
  }
  func.func @transform_3(%arg0: i32) -> (i32, i32) {
    %c0_i32 = arith.constant 0 : i32
    %c0_i32_0 = arith.constant 0 : i32
    return %arg0, %c0_i32 : i32, i32
  }
}

</mosaic_0001>

<bundles_post_ra>
// kernel: digit_forward.5
= control target key start
LH: loop header
LB: loop body
LE: loop exit
PB: predicated region body
PF: predicated region fallthrough
CT: control target
= control target key end

     0   :  { %v489_v0 = vmov 0.0   ;;  %vm490_vm0 = vmmov 0   ;;  %s821_s1 = inlined_call_operand.vmem [shape: f32[128,128], index: 1, kind: input, shape index: {}]   ;;  %s822_s0 = inlined_call_operand.vmem [shape: f32[200,128], index: 0, kind: input, shape index: {}]   ;;  %s823_s2 = inlined_call_operand.vmem [shape: f32[1,128], index: 2, kind: input, shape index: {}]   ;;  %s824_s3 = inlined_call_operand.vmem [shape: f32[200,128], index: 3, kind: output, shape index: {}]  }
   0x1   :  { %348 = vmatprep.subr.mxu0 %v489_v0  ;;  %v54_v1 = vld [vmem:[%s821_s1 + $0x78] sm:$0xff]  ;;  %455 = vmatprep.subr.mxu1 %v489_v0  ;;  %v53_v2 = vld [vmem:[%s821_s1 + $0x70] sm:$0xff]  ;;  %v52_v3 = vld [vmem:[%s821_s1 + $0x68] sm:$0xff] }
   0x2   :  { %349 = vmatpush3.msra.mxu0 %v54_v1  ;;  %471 = vmatpush3.msra.mxu1 %v54_v1  ;;  %v51_v4 = vld [vmem:[%s821_s1 + $0x60] sm:$0xff]  ;;  %v50_v5 = vld [vmem:[%s821_s1 + $0x58] sm:$0xff]  ;;  %v49_v6 = vld [vmem:[%s821_s1 + $0x50] sm:$0xff] }
   0x3   :  { %350 = vmatprep.subr.mxu0 %v489_v0  ;;  %456 = vmatprep.subr.mxu1 %v489_v0  ;;  %v48_v7 = vld [vmem:[%s821_s1 + $0x48] sm:$0xff]  ;;  %v47_v8 = vld [vmem:[%s821_s1 + $0x40] sm:$0xff]  ;;  %v46_v9 = vld [vmem:[%s821_s1 + $0x38] sm:$0xff] }
   0x4   :  { %351 = vmatpush3.msra.mxu0 %v53_v2  ;;  %472 = vmatpush3.msra.mxu1 %v53_v2  ;;  %v45_v10 = vld [vmem:[%s821_s1 + $0x30] sm:$0xff]  ;;  %v44_v11 = vld [vmem:[%s821_s1 + $0x28] sm:$0xff]  ;;  %v43_v12 = vld [vmem:[%s821_s1 + $0x20] sm:$0xff] }
   0x5   :  { %352 = vmatprep.subr.mxu0 %v489_v0  ;;  %457 = vmatprep.subr.mxu1 %v489_v0  ;;  %v42_v13 = vld [vmem:[%s821_s1 + $0x18] sm:$0xff]  ;;  %v41_v14 = vld [vmem:[%s821_s1 + $0x10] sm:$0xff]  ;;  %v40_v15 = vld [vmem:[%s821_s1 + $0x8] sm:$0xff] }
   0x6   :  { %353 = vmatpush3.msra.mxu0 %v52_v3  ;;  %473 = vmatpush3.msra.mxu1 %v52_v3  ;;  %v39_v16 = vld [vmem:[%s821_s1] sm:$0xff]  ;;  %v27_v18 = vld [vmem:[%s822_s0 + $0x68] sm:$0xff]  ;;  %v28_v20 = vld [vmem:[%s822_s0 + $0x70] sm:$0xff] }
   0x7   :  { %354 = vmatprep.subr.mxu0 %v489_v0  ;;  %458 = vmatprep.subr.mxu1 %v489_v0  ;;  %v14_v17 = vld [vmem:[%s822_s0] sm:$0xff]  ;;  %v15_v19 = vld [vmem:[%s822_s0 + $0x8] sm:$0xff]  ;;  %v16_v21 = vld [vmem:[%s822_s0 + $0x10] sm:$0xff] }
   0x8   :  { %355 = vmatpush3.msra.mxu0 %v51_v4  ;;  %474 = vmatpush3.msra.mxu1 %v51_v4  ;;  %v29_v22 = vld [vmem:[%s822_s0 + $0x78] sm:$0xff]  ;;  %v30_v24 = vld [vmem:[%s822_s0 + $0x80] sm:$0xff]  ;;  %v31_v26 = vld [vmem:[%s822_s0 + $0x88] sm:$0xff] }
   0x9   :  { %356 = vmatprep.subr.mxu0 %v489_v0  ;;  %459 = vmatprep.subr.mxu1 %v489_v0  ;;  %v17_v23 = vld [vmem:[%s822_s0 + $0x18] sm:$0xff]  ;;  %v18_v25 = vld [vmem:[%s822_s0 + $0x20] sm:$0xff]  ;;  %v19_v27 = vld [vmem:[%s822_s0 + $0x28] sm:$0xff] }
   0xa   :  { %357 = vmatpush3.msra.mxu0 %v50_v5  ;;  %475 = vmatpush3.msra.mxu1 %v50_v5  ;;  %v32_v28 = vld [vmem:[%s822_s0 + $0x90] sm:$0xff]  ;;  %v33_v30 = vld [vmem:[%s822_s0 + $0x98] sm:$0xff]  ;;  %v34_v32 = vld [vmem:[%s822_s0 + $0xa0] sm:$0xff] }
   0xb   :  { %358 = vmatprep.subr.mxu0 %v489_v0  ;;  %460 = vmatprep.subr.mxu1 %v489_v0  ;;  %v20_v29 = vld [vmem:[%s822_s0 + $0x30] sm:$0xff]  ;;  %v21_v31 = vld [vmem:[%s822_s0 + $0x38] sm:$0xff]  ;;  %v22_v33 = vld [vmem:[%s822_s0 + $0x40] sm:$0xff] }
   0xc   :  { %359 = vmatpush3.msra.mxu0 %v49_v6  ;;  %476 = vmatpush3.msra.mxu1 %v49_v6  ;;  %v35_v34 = vld [vmem:[%s822_s0 + $0xa8] sm:$0xff]  ;;  %v36_v36 = vld [vmem:[%s822_s0 + $0xb0] sm:$0xff]  ;;  %v37_v38 = vld [vmem:[%s822_s0 + $0xb8] sm:$0xff] }
   0xd   :  { %360 = vmatprep.subr.mxu0 %v489_v0  ;;  %461 = vmatprep.subr.mxu1 %v489_v0  ;;  %v23_v35 = vld [vmem:[%s822_s0 + $0x48] sm:$0xff]  ;;  %v24_v37 = vld [vmem:[%s822_s0 + $0x50] sm:$0xff]  ;;  %v25_v39 = vld [vmem:[%s822_s0 + $0x58] sm:$0xff] }
   0xe   :  { %361 = vmatpush3.msra.mxu0 %v48_v7  ;;  %477 = vmatpush3.msra.mxu1 %v48_v7  ;;  %v38_v40 = vld [vmem:[%s822_s0 + $0xc0] sm:$0xff] }
   0xf   :  { %362 = vmatprep.subr.mxu0 %v489_v0  ;;  %462 = vmatprep.subr.mxu1 %v489_v0  ;;  %v26_v41 = vld [vmem:[%s822_s0 + $0x60] sm:$0xff] }
  0x10   :  { %363 = vmatpush3.msra.mxu0 %v47_v8  ;;  %478 = vmatpush3.msra.mxu1 %v47_v8  ;;  %v719_v42 = vld [vmem:[%s823_s2] ss:$0 sm:$0xff] }
  0x11   :  { %364 = vmatprep.subr.mxu0 %v489_v0  ;;  %463 = vmatprep.subr.mxu1 %v489_v0 }
  0x12   :  { %365 = vmatpush3.msra.mxu0 %v46_v9  ;;  %479 = vmatpush3.msra.mxu1 %v46_v9 }
  0x13   :  { %366 = vmatprep.subr.mxu0 %v489_v0  ;;  %464 = vmatprep.subr.mxu1 %v489_v0 }
  0x14   :  { %367 = vmatpush3.msra.mxu0 %v45_v10  ;;  %480 = vmatpush3.msra.mxu1 %v45_v10 }
  0x15   :  { %368 = vmatprep.subr.mxu0 %v489_v0  ;;  %465 = vmatprep.subr.mxu1 %v489_v0 }
  0x16   :  { %369 = vmatpush3.msra.mxu0 %v44_v11  ;;  %481 = vmatpush3.msra.mxu1 %v44_v11 }
  0x17   :  { %370 = vmatprep.subr.mxu0 %v489_v0  ;;  %466 = vmatprep.subr.mxu1 %v489_v0 }
  0x18   :  { %371 = vmatpush3.msra.mxu0 %v43_v12  ;;  %482 = vmatpush3.msra.mxu1 %v43_v12 }
  0x19   :  { %372 = vmatprep.subr.mxu0 %v489_v0  ;;  %467 = vmatprep.subr.mxu1 %v489_v0 }
  0x1a   :  { %373 = vmatpush3.msra.mxu0 %v42_v13  ;;  %483 = vmatpush3.msra.mxu1 %v42_v13 }
  0x1b   :  { %374 = vmatprep.subr.mxu0 %v489_v0  ;;  %468 = vmatprep.subr.mxu1 %v489_v0 }
  0x1c   :  { %375 = vmatpush3.msra.mxu0 %v41_v14  ;;  %484 = vmatpush3.msra.mxu1 %v41_v14 }
  0x1d   :  { %376 = vmatprep.subr.mxu0 %v489_v0  ;;  %469 = vmatprep.subr.mxu1 %v489_v0 }
  0x1e   :  { %377 = vmatpush3.msra.mxu0 %v40_v15  ;;  %485 = vmatpush3.msra.mxu1 %v40_v15 }
  0x1f   :  { %378 = vmatprep.subr.mxu0 %v489_v0  ;;  %380 = vmatprep.mubr.msk.f32.mxu0 %vm490_vm0, %v489_v0 }
  0x20   :  { %379 = vmatpush3.msra.mxu0 %v39_v16  ;;  %470 = vmatprep.subr.mxu1 %v489_v0 }
  0x21   :  { %381 = vmatmul.mubr.f32.vlgmr.msra.gmra.mxu0 %v14_v17  ;;  %486 = vmatpush3.msra.mxu1 %v39_v16 }
  0x22   :  { %419 = vmatprep.mubr.msk.f32.mxu1 %vm490_vm0, %v489_v0  ;;  %383 = vmatprep.mubr.msk.f32.mxu0 %vm490_vm0, %v489_v0 }
  0x23   :  { %420 = vmatmul.mubr.f32.vlgmr.msra.gmra.mxu1 %v27_v18 }
  0x24   :  { %422 = vmatprep.mubr.msk.f32.mxu1 %vm490_vm0, %v489_v0 }
  0x25   :  { %384 = vmatmul.mubr.f32.gmra.mxu0 %v15_v19 }
  0x26   :  { %386 = vmatprep.mubr.msk.f32.mxu0 %vm490_vm0, %v489_v0 }
  0x27   :  { %423 = vmatmul.mubr.f32.gmra.mxu1 %v28_v20 }
  0x28   :  { %425 = vmatprep.mubr.msk.f32.mxu1 %vm490_vm0, %v489_v0 }
  0x29   :  { %387 = vmatmul.mubr.f32.gmra.mxu0 %v16_v21 }
  0x2a   :  { %389 = vmatprep.mubr.msk.f32.mxu0 %vm490_vm0, %v489_v0 }
  0x2b   :  { %426 = vmatmul.mubr.f32.gmra.mxu1 %v29_v22 }
  0x2c   :  { %428 = vmatprep.mubr.msk.f32.mxu1 %vm490_vm0, %v489_v0 }
  0x2d   :  { %390 = vmatmul.mubr.f32.gmra.mxu0 %v17_v23 }
  0x2e   :  { %392 = vmatprep.mubr.msk.f32.mxu0 %vm490_vm0, %v489_v0 }
  0x2f   :  { %429 = vmatmul.mubr.f32.gmra.mxu1 %v30_v24 }
  0x30   :  { %431 = vmatprep.mubr.msk.f32.mxu1 %vm490_vm0, %v489_v0 }
  0x31   :  { %393 = vmatmul.mubr.f32.gmra.mxu0 %v18_v25 }
  0x32   :  { %395 = vmatprep.mubr.msk.f32.mxu0 %vm490_vm0, %v489_v0 }
  0x33   :  { %432 = vmatmul.mubr.f32.gmra.mxu1 %v31_v26 }
  0x34   :  { %434 = vmatprep.mubr.msk.f32.mxu1 %vm490_vm0, %v489_v0 }
  0x35   :  { %396 = vmatmul.mubr.f32.gmra.mxu0 %v19_v27 }
  0x36   :  { %398 = vmatprep.mubr.msk.f32.mxu0 %vm490_vm0, %v489_v0 }
  0x37   :  { %435 = vmatmul.mubr.f32.gmra.mxu1 %v32_v28 }
  0x38   :  { %437 = vmatprep.mubr.msk.f32.mxu1 %vm490_vm0, %v489_v0 }
  0x39   :  { %399 = vmatmul.mubr.f32.gmra.mxu0 %v20_v29 }
  0x3a   :  { %401 = vmatprep.mubr.msk.f32.mxu0 %vm490_vm0, %v489_v0 }
  0x3b   :  { %438 = vmatmul.mubr.f32.gmra.mxu1 %v33_v30 }
  0x3c   :  { %440 = vmatprep.mubr.msk.f32.mxu1 %vm490_vm0, %v489_v0 }
  0x3d   :  { %402 = vmatmul.mubr.f32.gmra.mxu0 %v21_v31 }
  0x3e   :  { %404 = vmatprep.mubr.msk.f32.mxu0 %vm490_vm0, %v489_v0 }
  0x3f   :  { %441 = vmatmul.mubr.f32.gmra.mxu1 %v34_v32 }
  0x40   :  { %443 = vmatprep.mubr.msk.f32.mxu1 %vm490_vm0, %v489_v0 }
  0x41   :  { %405 = vmatmul.mubr.f32.gmra.mxu0 %v22_v33 }
  0x42   :  { %407 = vmatprep.mubr.msk.f32.mxu0 %vm490_vm0, %v489_v0 }
  0x43   :  { %444 = vmatmul.mubr.f32.gmra.mxu1 %v35_v34 }
  0x44   :  { %446 = vmatprep.mubr.msk.f32.mxu1 %vm490_vm0, %v489_v0 }
  0x45   :  { %408 = vmatmul.mubr.f32.gmra.mxu0 %v23_v35 }
  0x46   :  { %410 = vmatprep.mubr.msk.f32.mxu0 %vm490_vm0, %v489_v0 }
  0x47   :  { %447 = vmatmul.mubr.f32.gmra.mxu1 %v36_v36 }
  0x48   :  { %449 = vmatprep.mubr.msk.f32.mxu1 %vm490_vm0, %v489_v0 }
  0x49   :  { %411 = vmatmul.mubr.f32.gmra.mxu0 %v24_v37 }
  0x4a   :  { %413 = vmatprep.mubr.msk.f32.mxu0 %vm490_vm0, %v489_v0 }
  0x4b   :  { %450 = vmatmul.mubr.f32.gmra.mxu1 %v37_v38 }
  0x4c   :  { %452 = vmatprep.mubr.msk.f32.mxu1 %vm490_vm0, %v489_v0 }
  0x4d   :  { %414 = vmatmul.mubr.f32.gmra.mxu0 %v25_v39 }
  0x4e   :  { %416 = vmatprep.mubr.msk.f32.mxu0 %vm490_vm0, %v489_v0 }
  0x4f   :  { %453 = vmatmul.mubr.f32.gmra.mxu1 %v38_v40 }
  0x51   :  { %417 = vmatmul.mubr.f32.gmra.mxu0 %v26_v41 }
  0xe1   :  { %v128_v43 = vpop.f32.mrf.mxu0 }
  0xe2   :  { %v129_v44 = vadd.f32 %v719_v42, %v128_v43 }
  0xe3   :  { %v382_v45 = vpop.f32.mrf.mxu0  ;;  %v193_v46 = vpop.f32.mrf.mxu1 }
  0xe4   :  { %v252_v47 = vmax.f32 %v129_v44, 0.0  ;;  %v194_v48 = vadd.f32 %v719_v42, %v193_v46 }
  0xe5   :  { %v133_v49 = vpop.f32.mrf.mxu0  ;;  %v421_v50 = vpop.f32.mrf.mxu1 }
  0xe6   :  { %277 = vst [vmem:[%s824_s3] sm:$0xff] %v252_v47  ;;  %v265_v51 = vmax.f32 %v194_v48, 0.0  ;;  %v134_v52 = vadd.f32 %v719_v42, %v133_v49 }
  0xe7   :  { %v385_v53 = vpop.f32.mrf.mxu0  ;;  %v198_v54 = vpop.f32.mrf.mxu1 }
  0xe8   :  { %290 = vst [vmem:[%s824_s3 + $0x68] sm:$0xff] %v265_v51  ;;  %v253_v55 = vmax.f32 %v134_v52, 0.0  ;;  %v199_v56 = vadd.f32 %v719_v42, %v198_v54 }
  0xe9   :  { %v138_v57 = vpop.f32.mrf.mxu0  ;;  %v424_v58 = vpop.f32.mrf.mxu1 }
  0xea   :  { %278 = vst [vmem:[%s824_s3 + $0x8] sm:$0xff] %v253_v55  ;;  %v266_v59 = vmax.f32 %v199_v56, 0.0  ;;  %v139_v60 = vadd.f32 %v719_v42, %v138_v57 }
  0xeb   :  { %v388_v61 = vpop.f32.mrf.mxu0  ;;  %v203_v62 = vpop.f32.mrf.mxu1 }
  0xec   :  { %291 = vst [vmem:[%s824_s3 + $0x70] sm:$0xff] %v266_v59  ;;  %v254_v63 = vmax.f32 %v139_v60, 0.0  ;;  %v204_v0 = vadd.f32 %v719_v42, %v203_v62 }
  0xed   :  { %v143_v1 = vpop.f32.mrf.mxu0  ;;  %v427_v2 = vpop.f32.mrf.mxu1 }
  0xee   :  { %279 = vst [vmem:[%s824_s3 + $0x10] sm:$0xff] %v254_v63  ;;  %v267_v3 = vmax.f32 %v204_v0, 0.0  ;;  %v144_v4 = vadd.f32 %v719_v42, %v143_v1 }
  0xef   :  { %v391_v5 = vpop.f32.mrf.mxu0  ;;  %v208_v6 = vpop.f32.mrf.mxu1 }
  0xf0   :  { %292 = vst [vmem:[%s824_s3 + $0x78] sm:$0xff] %v267_v3  ;;  %v255_v7 = vmax.f32 %v144_v4, 0.0  ;;  %v209_v8 = vadd.f32 %v719_v42, %v208_v6 }
  0xf1   :  { %v148_v9 = vpop.f32.mrf.mxu0  ;;  %v430_v10 = vpop.f32.mrf.mxu1 }
  0xf2   :  { %280 = vst [vmem:[%s824_s3 + $0x18] sm:$0xff] %v255_v7  ;;  %v268_v11 = vmax.f32 %v209_v8, 0.0  ;;  %v149_v12 = vadd.f32 %v719_v42, %v148_v9 }
  0xf3   :  { %v394_v13 = vpop.f32.mrf.mxu0  ;;  %v213_v14 = vpop.f32.mrf.mxu1 }
  0xf4   :  { %293 = vst [vmem:[%s824_s3 + $0x80] sm:$0xff] %v268_v11  ;;  %v256_v15 = vmax.f32 %v149_v12, 0.0  ;;  %v214_v16 = vadd.f32 %v719_v42, %v213_v14 }
  0xf5   :  { %v153_v17 = vpop.f32.mrf.mxu0  ;;  %v433_v18 = vpop.f32.mrf.mxu1 }
  0xf6   :  { %281 = vst [vmem:[%s824_s3 + $0x20] sm:$0xff] %v256_v15  ;;  %v269_v19 = vmax.f32 %v214_v16, 0.0  ;;  %v154_v20 = vadd.f32 %v719_v42, %v153_v17 }
  0xf7   :  { %v397_v21 = vpop.f32.mrf.mxu0  ;;  %v218_v22 = vpop.f32.mrf.mxu1 }
  0xf8   :  { %294 = vst [vmem:[%s824_s3 + $0x88] sm:$0xff] %v269_v19  ;;  %v257_v23 = vmax.f32 %v154_v20, 0.0  ;;  %v219_v24 = vadd.f32 %v719_v42, %v218_v22 }
  0xf9   :  { %v158_v25 = vpop.f32.mrf.mxu0  ;;  %v436_v26 = vpop.f32.mrf.mxu1 }
  0xfa   :  { %282 = vst [vmem:[%s824_s3 + $0x28] sm:$0xff] %v257_v23  ;;  %v270_v27 = vmax.f32 %v219_v24, 0.0  ;;  %v159_v28 = vadd.f32 %v719_v42, %v158_v25 }
  0xfb   :  { %v400_v29 = vpop.f32.mrf.mxu0  ;;  %v223_v30 = vpop.f32.mrf.mxu1 }
  0xfc   :  { %295 = vst [vmem:[%s824_s3 + $0x90] sm:$0xff] %v270_v27  ;;  %v258_v31 = vmax.f32 %v159_v28, 0.0  ;;  %v224_v32 = vadd.f32 %v719_v42, %v223_v30 }
  0xfd   :  { %v163_v33 = vpop.f32.mrf.mxu0  ;;  %v439_v34 = vpop.f32.mrf.mxu1 }
  0xfe   :  { %283 = vst [vmem:[%s824_s3 + $0x30] sm:$0xff] %v258_v31  ;;  %v271_v35 = vmax.f32 %v224_v32, 0.0  ;;  %v164_v36 = vadd.f32 %v719_v42, %v163_v33 }
  0xff   :  { %v403_v37 = vpop.f32.mrf.mxu0  ;;  %v228_v38 = vpop.f32.mrf.mxu1 }
 0x100   :  { %296 = vst [vmem:[%s824_s3 + $0x98] sm:$0xff] %v271_v35  ;;  %v259_v39 = vmax.f32 %v164_v36, 0.0  ;;  %v229_v40 = vadd.f32 %v719_v42, %v228_v38 }
 0x101   :  { %v168_v41 = vpop.f32.mrf.mxu0  ;;  %v442_v43 = vpop.f32.mrf.mxu1 }
 0x102   :  { %284 = vst [vmem:[%s824_s3 + $0x38] sm:$0xff] %v259_v39  ;;  %v272_v44 = vmax.f32 %v229_v40, 0.0  ;;  %v169_v45 = vadd.f32 %v719_v42, %v168_v41 }
 0x103   :  { %v406_v46 = vpop.f32.mrf.mxu0  ;;  %v233_v47 = vpop.f32.mrf.mxu1 }
 0x104   :  { %297 = vst [vmem:[%s824_s3 + $0xa0] sm:$0xff] %v272_v44  ;;  %v260_v48 = vmax.f32 %v169_v45, 0.0  ;;  %v234_v49 = vadd.f32 %v719_v42, %v233_v47 }
 0x105   :  { %v173_v50 = vpop.f32.mrf.mxu0  ;;  %v445_v51 = vpop.f32.mrf.mxu1 }
 0x106   :  { %285 = vst [vmem:[%s824_s3 + $0x40] sm:$0xff] %v260_v48  ;;  %v273_v52 = vmax.f32 %v234_v49, 0.0  ;;  %v174_v53 = vadd.f32 %v719_v42, %v173_v50 }
 0x107   :  { %v409_v54 = vpop.f32.mrf.mxu0  ;;  %v238_v55 = vpop.f32.mrf.mxu1 }
 0x108   :  { %298 = vst [vmem:[%s824_s3 + $0xa8] sm:$0xff] %v273_v52  ;;  %v261_v56 = vmax.f32 %v174_v53, 0.0  ;;  %v239_v57 = vadd.f32 %v719_v42, %v238_v55 }
 0x109   :  { %v178_v58 = vpop.f32.mrf.mxu0  ;;  %v448_v59 = vpop.f32.mrf.mxu1 }
 0x10a   :  { %286 = vst [vmem:[%s824_s3 + $0x48] sm:$0xff] %v261_v56  ;;  %v274_v60 = vmax.f32 %v239_v57, 0.0  ;;  %v179_v61 = vadd.f32 %v719_v42, %v178_v58 }
 0x10b   :  { %v412_v62 = vpop.f32.mrf.mxu0  ;;  %v243_v63 = vpop.f32.mrf.mxu1 }
 0x10c   :  { %299 = vst [vmem:[%s824_s3 + $0xb0] sm:$0xff] %v274_v60  ;;  %v262_v0 = vmax.f32 %v179_v61, 0.0  ;;  %v244_v1 = vadd.f32 %v719_v42, %v243_v63 }
 0x10d   :  { %v183_v2 = vpop.f32.mrf.mxu0  ;;  %v451_v3 = vpop.f32.mrf.mxu1 }
 0x10e   :  { %287 = vst [vmem:[%s824_s3 + $0x50] sm:$0xff] %v262_v0  ;;  %v275_v4 = vmax.f32 %v244_v1, 0.0  ;;  %v184_v5 = vadd.f32 %v719_v42, %v183_v2 }
 0x10f   :  { %v415_v6 = vpop.f32.mrf.mxu0  ;;  %v248_v7 = vpop.f32.mrf.mxu1 }
 0x110   :  { %300 = vst [vmem:[%s824_s3 + $0xb8] sm:$0xff] %v275_v4  ;;  %v263_v8 = vmax.f32 %v184_v5, 0.0  ;;  %v249_v9 = vadd.f32 %v719_v42, %v248_v7 }
 0x111   :  { %v188_v10 = vpop.f32.mrf.mxu0  ;;  %v454_v11 = vpop.f32.mrf.mxu1 }
 0x112   :  { %288 = vst [vmem:[%s824_s3 + $0x58] sm:$0xff] %v263_v8  ;;  %v276_v12 = vmax.f32 %v249_v9, 0.0  ;;  %v189_v13 = vadd.f32 %v719_v42, %v188_v10 }
 0x113   :  { %v418_v14 = vpop.f32.mrf.mxu0 }
 0x114   :  { %301 = vst [vmem:[%s824_s3 + $0xc0] sm:$0xff] %v276_v12  ;;  %v264_v15 = vmax.f32 %v189_v13, 0.0 }
 0x116   :  { %289 = vst [vmem:[%s824_s3 + $0x60] sm:$0xff] %v264_v15 }

// kernel: digit_forward.4
= control target key start
LH: loop header
LB: loop body
LE: loop exit
PB: predicated region body
PF: predicated region fallthrough
CT: control target
= control target key end

     0   :  { %s3091_s4 = inlined_call_operand.vmem [shape: f32[128,128], index: 4, kind: input, shape index: {}]   ;;  %s3092_s0 = inlined_call_operand.vmem [shape: f32[288,128], index: 0, kind: input, shape index: {}]   ;;  %s3093_s1 = inlined_call_operand.vmem [shape: f32[288,128], index: 1, kind: input, shape index: {}]   ;;  %s3094_s2 = inlined_call_operand.vmem [shape: f32[288,128], index: 2, kind: input, shape index: {}]   ;;  %s3095_s3 = inlined_call_operand.vmem [shape: f32[288,128], index: 3, kind: input, shape index: {}]   ;;  %s3096_s5 = inlined_call_operand.vmem [shape: f32[1,128], index: 5, kind: input, shape index: {}]   ;;  %s3097_s6 = inlined_call_operand.vmem [shape: f32[288,128], index: 6, kind: output, shape index: {}]  }
   0x1   :  { %v1981_v0 = vld [vmem:[%s3091_s4 + $0x78] sm:$0xff]  ;;  %v1986_v1 = vld [vmem:[%s3091_s4 + $0x70] sm:$0xff]  ;;  %v1995_v2 = vld [vmem:[%s3091_s4 + $0x68] sm:$0xff] }
   0x2   :  { %1599 = vmatprep.subr.mxu0 %v1981_v0  ;;  %1685 = vmatprep.subr.mxu1 %v1981_v0  ;;  %v2004_v3 = vld [vmem:[%s3091_s4 + $0x60] sm:$0xff]  ;;  %v2013_v4 = vld [vmem:[%s3091_s4 + $0x58] sm:$0xff]  ;;  %v2022_v5 = vld [vmem:[%s3091_s4 + $0x50] sm:$0xff] }
   0x3   :  { %1600 = vmatpush3.msra.mxu0 %v1981_v0  ;;  %1686 = vmatpush3.msra.mxu1 %v1981_v0  ;;  %v2031_v6 = vld [vmem:[%s3091_s4 + $0x48] sm:$0xff]  ;;  %v2040_v7 = vld [vmem:[%s3091_s4 + $0x40] sm:$0xff]  ;;  %v2049_v8 = vld [vmem:[%s3091_s4 + $0x38] sm:$0xff] }
   0x4   :  { %1601 = vmatprep.subr.mxu0 %v1986_v1  ;;  %1687 = vmatprep.subr.mxu1 %v1986_v1  ;;  %v2058_v9 = vld [vmem:[%s3091_s4 + $0x30] sm:$0xff]  ;;  %v2067_v10 = vld [vmem:[%s3091_s4 + $0x28] sm:$0xff]  ;;  %v2076_v11 = vld [vmem:[%s3091_s4 + $0x20] sm:$0xff] }
   0x5   :  { %1602 = vmatpush3.msra.mxu0 %v1986_v1  ;;  %1688 = vmatpush3.msra.mxu1 %v1986_v1  ;;  %v2085_v12 = vld [vmem:[%s3091_s4 + $0x18] sm:$0xff]  ;;  %v2094_v13 = vld [vmem:[%s3091_s4 + $0x10] sm:$0xff]  ;;  %v2103_v14 = vld [vmem:[%s3091_s4 + $0x8] sm:$0xff] }
   0x6   :  { %1603 = vmatprep.subr.mxu0 %v1995_v2  ;;  %1689 = vmatprep.subr.mxu1 %v1995_v2  ;;  %v2112_v15 = vld [vmem:[%s3091_s4] sm:$0xff]  ;;  %v40_v18 = vld [vmem:[%s3092_s0 + $0x8] sm:$0xff]  ;;  %v41_v20 = vld [vmem:[%s3092_s0 + $0x10] sm:$0xff] }
   0x7   :  { %1604 = vmatpush3.msra.mxu0 %v1995_v2  ;;  %1690 = vmatpush3.msra.mxu1 %v1995_v2  ;;  %v39_v16 = vld [vmem:[%s3092_s0] sm:$0xff]  ;;  %v321_v19 = vld [vmem:[%s3093_s1 + $0x8] sm:$0xff]  ;;  %v322_v21 = vld [vmem:[%s3093_s1 + $0x10] sm:$0xff] }
   0x8   :  { %1605 = vmatprep.subr.mxu0 %v2004_v3  ;;  %1691 = vmatprep.subr.mxu1 %v2004_v3  ;;  %v320_v17 = vld [vmem:[%s3093_s1] sm:$0xff]  ;;  %v42_v22 = vld [vmem:[%s3092_s0 + $0x18] sm:$0xff]  ;;  %v44_v26 = vld [vmem:[%s3092_s0 + $0x28] sm:$0xff] }
   0x9   :  { %1606 = vmatpush3.msra.mxu0 %v2004_v3  ;;  %1692 = vmatpush3.msra.mxu1 %v2004_v3  ;;  %v323_v23 = vld [vmem:[%s3093_s1 + $0x18] sm:$0xff]  ;;  %v43_v24 = vld [vmem:[%s3092_s0 + $0x20] sm:$0xff]  ;;  %v325_v27 = vld [vmem:[%s3093_s1 + $0x28] sm:$0xff] }
   0xa   :  { %1607 = vmatprep.subr.mxu0 %v2013_v4  ;;  %1693 = vmatprep.subr.mxu1 %v2013_v4  ;;  %v324_v25 = vld [vmem:[%s3093_s1 + $0x20] sm:$0xff]  ;;  %v45_v28 = vld [vmem:[%s3092_s0 + $0x30] sm:$0xff]  ;;  %v46_v30 = vld [vmem:[%s3092_s0 + $0x38] sm:$0xff] }
   0xb   :  { %1608 = vmatpush3.msra.mxu0 %v2013_v4  ;;  %1694 = vmatpush3.msra.mxu1 %v2013_v4  ;;  %v326_v29 = vld [vmem:[%s3093_s1 + $0x30] sm:$0xff]  ;;  %v327_v31 = vld [vmem:[%s3093_s1 + $0x38] sm:$0xff]  ;;  %v47_v32 = vld [vmem:[%s3092_s0 + $0x40] sm:$0xff] }
   0xc   :  { %1609 = vmatprep.subr.mxu0 %v2022_v5  ;;  %1695 = vmatprep.subr.mxu1 %v2022_v5  ;;  %v328_v33 = vld [vmem:[%s3093_s1 + $0x40] sm:$0xff]  ;;  %v48_v34 = vld [vmem:[%s3092_s0 + $0x48] sm:$0xff]  ;;  %v49_v36 = vld [vmem:[%s3092_s0 + $0x50] sm:$0xff] }
   0xd   :  { %1610 = vmatpush3.msra.mxu0 %v2022_v5  ;;  %1696 = vmatpush3.msra.mxu1 %v2022_v5  ;;  %v329_v35 = vld [vmem:[%s3093_s1 + $0x48] sm:$0xff]  ;;  %v330_v37 = vld [vmem:[%s3093_s1 + $0x50] sm:$0xff]  ;;  %v50_v38 = vld [vmem:[%s3092_s0 + $0x58] sm:$0xff] }
   0xe   :  { %1611 = vmatprep.subr.mxu0 %v2031_v6  ;;  %1697 = vmatprep.subr.mxu1 %v2031_v6  ;;  %v331_v39 = vld [vmem:[%s3093_s1 + $0x58] sm:$0xff]  ;;  %v51_v40 = vld [vmem:[%s3092_s0 + $0x60] sm:$0xff]  ;;  %v52_v42 = vld [vmem:[%s3092_s0 + $0x68] sm:$0xff] }
   0xf   :  { %1612 = vmatpush3.msra.mxu0 %v2031_v6  ;;  %1698 = vmatpush3.msra.mxu1 %v2031_v6  ;;  %v332_v41 = vld [vmem:[%s3093_s1 + $0x60] sm:$0xff]  ;;  %v333_v43 = vld [vmem:[%s3093_s1 + $0x68] sm:$0xff]  ;;  %v53_v44 = vld [vmem:[%s3092_s0 + $0x70] sm:$0xff] }
  0x10   :  { %1613 = vmatprep.subr.mxu0 %v2040_v7  ;;  %1699 = vmatprep.subr.mxu1 %v2040_v7  ;;  %v334_v45 = vld [vmem:[%s3093_s1 + $0x70] sm:$0xff]  ;;  %v54_v46 = vld [vmem:[%s3092_s0 + $0x78] sm:$0xff]  ;;  %v55_v48 = vld [vmem:[%s3092_s0 + $0x80] sm:$0xff] }
  0x11   :  { %1614 = vmatpush3.msra.mxu0 %v2040_v7  ;;  %1700 = vmatpush3.msra.mxu1 %v2040_v7  ;;  %v335_v47 = vld [vmem:[%s3093_s1 + $0x78] sm:$0xff]  ;;  %v336_v49 = vld [vmem:[%s3093_s1 + $0x80] sm:$0xff]  ;;  %v56_v50 = vld [vmem:[%s3092_s0 + $0x88] sm:$0xff] }
  0x12   :  { %1615 = vmatprep.subr.mxu0 %v2049_v8  ;;  %1701 = vmatprep.subr.mxu1 %v2049_v8  ;;  %v337_v51 = vld [vmem:[%s3093_s1 + $0x88] sm:$0xff]  ;;  %v57_v52 = vld [vmem:[%s3092_s0 + $0x90] sm:$0xff]  ;;  %v58_v54 = vld [vmem:[%s3092_s0 + $0x98] sm:$0xff] }
  0x13   :  { %1616 = vmatpush3.msra.mxu0 %v2049_v8  ;;  %1702 = vmatpush3.msra.mxu1 %v2049_v8  ;;  %v338_v53 = vld [vmem:[%s3093_s1 + $0x90] sm:$0xff]  ;;  %v339_v55 = vld [vmem:[%s3093_s1 + $0x98] sm:$0xff]  ;;  %v59_v56 = vld [vmem:[%s3092_s0 + $0xa0] sm:$0xff] }
  0x14   :  { %1617 = vmatprep.subr.mxu0 %v2058_v9  ;;  %1703 = vmatprep.subr.mxu1 %v2058_v9  ;;  %v340_v57 = vld [vmem:[%s3093_s1 + $0xa0] sm:$0xff]  ;;  %v60_v58 = vld [vmem:[%s3092_s0 + $0xa8] sm:$0xff]  ;;  %v61_v60 = vld [vmem:[%s3092_s0 + $0xb0] sm:$0xff] }
  0x15   :  { %1618 = vmatpush3.msra.mxu0 %v2058_v9  ;;  %1704 = vmatpush3.msra.mxu1 %v2058_v9  ;;  %v341_v59 = vld [vmem:[%s3093_s1 + $0xa8] sm:$0xff]  ;;  %v342_v61 = vld [vmem:[%s3093_s1 + $0xb0] sm:$0xff]  ;;  %v62_v62 = vld [vmem:[%s3092_s0 + $0xb8] sm:$0xff] }
  0x16   :  { %1619 = vmatprep.subr.mxu0 %v2067_v10  ;;  %1705 = vmatprep.subr.mxu1 %v2067_v10  ;;  %v343_v63 = vld [vmem:[%s3093_s1 + $0xb8] sm:$0xff] }
  0x17   :  { %1620 = vmatpush3.msra.mxu0 %v2067_v10  ;;  %1706 = vmatpush3.msra.mxu1 %v2067_v10 }
  0x18   :  { %1621 = vmatprep.subr.mxu0 %v2076_v11  ;;  %1707 = vmatprep.subr.mxu1 %v2076_v11 }
  0x19   :  { %1622 = vmatpush3.msra.mxu0 %v2076_v11  ;;  %1708 = vmatpush3.msra.mxu1 %v2076_v11 }
  0x1a   :  { %1623 = vmatprep.subr.mxu0 %v2085_v12  ;;  %1709 = vmatprep.subr.mxu1 %v2085_v12 }
  0x1b   :  { %1624 = vmatpush3.msra.mxu0 %v2085_v12  ;;  %1710 = vmatpush3.msra.mxu1 %v2085_v12 }
  0x1c   :  { %1625 = vmatprep.subr.mxu0 %v2094_v13  ;;  %1711 = vmatprep.subr.mxu1 %v2094_v13 }
  0x1d   :  { %1626 = vmatpush3.msra.mxu0 %v2094_v13  ;;  %1712 = vmatpush3.msra.mxu1 %v2094_v13 }
  0x1e   :  { %1627 = vmatprep.subr.mxu0 %v2103_v14  ;;  %1713 = vmatprep.subr.mxu1 %v2103_v14 }
  0x1f   :  { %1628 = vmatpush3.msra.mxu0 %v2103_v14  ;;  %1714 = vmatpush3.msra.mxu1 %v2103_v14 }
  0x20   :  { %1629 = vmatprep.subr.mxu0 %v2112_v15  ;;  %1715 = vmatprep.subr.mxu1 %v2112_v15 }
  0x21   :  { %1630 = vmatpush3.msra.mxu0 %v2112_v15  ;;  %1631 = vmatprep.mubr.f32.mxu0 %v39_v16  ;;  %v69_v16 = vld [vmem:[%s3092_s0 + $0xf0] sm:$0xff] }
  0x22   :  { %1716 = vmatpush3.msra.mxu1 %v2112_v15  ;;  %1717 = vmatprep.mubr.f32.mxu1 %v320_v17  ;;  %v70_v17 = vld [vmem:[%s3092_s0 + $0xf8] sm:$0xff] }
  0x23   :  { %1632 = vmatmul.mubr.f32.vlgmr.msra.gmra.mxu0 %v40_v18  ;;  %1718 = vmatmul.mubr.f32.vlgmr.msra.gmra.mxu1 %v321_v19  ;;  %v351_v18 = vld [vmem:[%s3093_s1 + $0xf8] sm:$0xff]  ;;  %v71_v19 = vld [vmem:[%s3092_s0 + $0x100] sm:$0xff] }
  0x24   :  { %1771 = vmatprep.subr.mxu0 %v1981_v0  ;;  %1857 = vmatprep.subr.mxu1 %v1981_v0 }
  0x25   :  { %1772 = vmatpush3.msra.mxu0 %v1981_v0  ;;  %1858 = vmatpush3.msra.mxu1 %v1981_v0  ;;  %v63_v0 = vld [vmem:[%s3092_s0 + $0xc0] sm:$0xff] }
  0x26   :  { %1634 = vmatprep.mubr.f32.mxu0 %v41_v20  ;;  %1720 = vmatprep.mubr.f32.mxu1 %v322_v21  ;;  %v72_v20 = vld [vmem:[%s3092_s0 + $0x108] sm:$0xff] }
  0x27   :  { %1635 = vmatmul.mubr.f32.gmra.mxu0 %v42_v22  ;;  %1721 = vmatmul.mubr.f32.gmra.mxu1 %v323_v23  ;;  %v353_v21 = vld [vmem:[%s3093_s1 + $0x108] sm:$0xff]  ;;  %v73_v22 = vld [vmem:[%s3092_s0 + $0x110] sm:$0xff]  ;;  %v74_v23 = vld [vmem:[%s3092_s0 + $0x118] sm:$0xff] }
  0x28   :  { %1773 = vmatprep.subr.mxu0 %v1986_v1  ;;  %1859 = vmatprep.subr.mxu1 %v1986_v1 }
  0x29   :  { %1774 = vmatpush3.msra.mxu0 %v1986_v1  ;;  %1860 = vmatpush3.msra.mxu1 %v1986_v1  ;;  %v344_v1 = vld [vmem:[%s3093_s1 + $0xc0] sm:$0xff] }
  0x2a   :  { %1637 = vmatprep.mubr.f32.mxu0 %v43_v24  ;;  %1723 = vmatprep.mubr.f32.mxu1 %v324_v25  ;;  %v355_v24 = vld [vmem:[%s3093_s1 + $0x118] sm:$0xff]  ;;  %v601_v25 = vld [vmem:[%s3094_s2] sm:$0xff] }
  0x2b   :  { %1638 = vmatmul.mubr.f32.gmra.mxu0 %v44_v26  ;;  %1724 = vmatmul.mubr.f32.gmra.mxu1 %v325_v27  ;;  %v602_v26 = vld [vmem:[%s3094_s2 + $0x8] sm:$0xff] }
  0x2c   :  { %1775 = vmatprep.subr.mxu0 %v1995_v2  ;;  %1861 = vmatprep.subr.mxu1 %v1995_v2  ;;  %v883_v27 = vld [vmem:[%s3095_s3 + $0x8] sm:$0xff] }
  0x2d   :  { %1776 = vmatpush3.msra.mxu0 %v1995_v2  ;;  %1862 = vmatpush3.msra.mxu1 %v1995_v2  ;;  %v64_v2 = vld [vmem:[%s3092_s0 + $0xc8] sm:$0xff] }
  0x2e   :  { %1640 = vmatprep.mubr.f32.mxu0 %v45_v28  ;;  %1726 = vmatprep.mubr.f32.mxu1 %v326_v29  ;;  %v603_v28 = vld [vmem:[%s3094_s2 + $0x10] sm:$0xff] }
  0x2f   :  { %1641 = vmatmul.mubr.f32.gmra.mxu0 %v46_v30  ;;  %1727 = vmatmul.mubr.f32.gmra.mxu1 %v327_v31  ;;  %v884_v29 = vld [vmem:[%s3095_s3 + $0x10] sm:$0xff]  ;;  %v604_v30 = vld [vmem:[%s3094_s2 + $0x18] sm:$0xff] }
  0x30   :  { %1777 = vmatprep.subr.mxu0 %v2004_v3  ;;  %1863 = vmatprep.subr.mxu1 %v2004_v3  ;;  %v885_v31 = vld [vmem:[%s3095_s3 + $0x18] sm:$0xff] }
  0x31   :  { %1643 = vmatprep.mubr.f32.mxu0 %v47_v32  ;;  %1729 = vmatprep.mubr.f32.mxu1 %v328_v33  ;;  %v605_v32 = vld [vmem:[%s3094_s2 + $0x20] sm:$0xff] }
  0x32   :  { %1778 = vmatpush3.msra.mxu0 %v2004_v3  ;;  %1864 = vmatpush3.msra.mxu1 %v2004_v3  ;;  %v345_v3 = vld [vmem:[%s3093_s1 + $0xc8] sm:$0xff]  ;;  %v886_v33 = vld [vmem:[%s3095_s3 + $0x20] sm:$0xff] }
  0x33   :  { %1644 = vmatmul.mubr.f32.gmra.mxu0 %v48_v34  ;;  %1730 = vmatmul.mubr.f32.gmra.mxu1 %v329_v35  ;;  %v606_v34 = vld [vmem:[%s3094_s2 + $0x28] sm:$0xff] }
  0x34   :  { %1779 = vmatprep.subr.mxu0 %v2013_v4  ;;  %1865 = vmatprep.subr.mxu1 %v2013_v4  ;;  %v887_v35 = vld [vmem:[%s3095_s3 + $0x28] sm:$0xff] }
  0x35   :  { %1646 = vmatprep.mubr.f32.mxu0 %v49_v36  ;;  %1732 = vmatprep.mubr.f32.mxu1 %v330_v37  ;;  %v607_v36 = vld [vmem:[%s3094_s2 + $0x30] sm:$0xff] }
  0x36   :  { %1780 = vmatpush3.msra.mxu0 %v2013_v4  ;;  %1866 = vmatpush3.msra.mxu1 %v2013_v4  ;;  %v65_v4 = vld [vmem:[%s3092_s0 + $0xd0] sm:$0xff] }
  0x37   :  { %1647 = vmatmul.mubr.f32.gmra.mxu0 %v50_v38  ;;  %1733 = vmatmul.mubr.f32.gmra.mxu1 %v331_v39  ;;  %v888_v37 = vld [vmem:[%s3095_s3 + $0x30] sm:$0xff]  ;;  %v608_v38 = vld [vmem:[%s3094_s2 + $0x38] sm:$0xff] }
  0x38   :  { %1649 = vmatprep.mubr.f32.mxu0 %v51_v40  ;;  %1735 = vmatprep.mubr.f32.mxu1 %v332_v41  ;;  %v889_v39 = vld [vmem:[%s3095_s3 + $0x38] sm:$0xff]  ;;  %v609_v40 = vld [vmem:[%s3094_s2 + $0x40] sm:$0xff] }
  0x39   :  { %1781 = vmatprep.subr.mxu0 %v2022_v5  ;;  %1867 = vmatprep.subr.mxu1 %v2022_v5  ;;  %v890_v41 = vld [vmem:[%s3095_s3 + $0x40] sm:$0xff] }
  0x3a   :  { %1782 = vmatpush3.msra.mxu0 %v2022_v5  ;;  %1868 = vmatpush3.msra.mxu1 %v2022_v5  ;;  %v346_v5 = vld [vmem:[%s3093_s1 + $0xd0] sm:$0xff] }
  0x3b   :  { %1650 = vmatmul.mubr.f32.gmra.mxu0 %v52_v42  ;;  %1736 = vmatmul.mubr.f32.gmra.mxu1 %v333_v43  ;;  %v610_v42 = vld [vmem:[%s3094_s2 + $0x48] sm:$0xff] }
  0x3c   :  { %1652 = vmatprep.mubr.f32.mxu0 %v53_v44  ;;  %1738 = vmatprep.mubr.f32.mxu1 %v334_v45  ;;  %v891_v43 = vld [vmem:[%s3095_s3 + $0x48] sm:$0xff]  ;;  %v611_v44 = vld [vmem:[%s3094_s2 + $0x50] sm:$0xff] }
  0x3d   :  { %1783 = vmatprep.subr.mxu0 %v2031_v6  ;;  %1869 = vmatprep.subr.mxu1 %v2031_v6  ;;  %v892_v45 = vld [vmem:[%s3095_s3 + $0x50] sm:$0xff] }
  0x3e   :  { %1784 = vmatpush3.msra.mxu0 %v2031_v6  ;;  %1870 = vmatpush3.msra.mxu1 %v2031_v6  ;;  %v66_v6 = vld [vmem:[%s3092_s0 + $0xd8] sm:$0xff] }
  0x3f   :  { %1653 = vmatmul.mubr.f32.gmra.mxu0 %v54_v46  ;;  %1739 = vmatmul.mubr.f32.gmra.mxu1 %v335_v47  ;;  %v612_v46 = vld [vmem:[%s3094_s2 + $0x58] sm:$0xff] }
  0x40   :  { %1655 = vmatprep.mubr.f32.mxu0 %v55_v48  ;;  %1741 = vmatprep.mubr.f32.mxu1 %v336_v49  ;;  %v893_v47 = vld [vmem:[%s3095_s3 + $0x58] sm:$0xff]  ;;  %v613_v48 = vld [vmem:[%s3094_s2 + $0x60] sm:$0xff] }
  0x41   :  { %1785 = vmatprep.subr.mxu0 %v2040_v7  ;;  %1871 = vmatprep.subr.mxu1 %v2040_v7  ;;  %v894_v49 = vld [vmem:[%s3095_s3 + $0x60] sm:$0xff] }
  0x42   :  { %1786 = vmatpush3.msra.mxu0 %v2040_v7  ;;  %1872 = vmatpush3.msra.mxu1 %v2040_v7  ;;  %v347_v7 = vld [vmem:[%s3093_s1 + $0xd8] sm:$0xff] }
  0x43   :  { %1656 = vmatmul.mubr.f32.gmra.mxu0 %v56_v50  ;;  %1742 = vmatmul.mubr.f32.gmra.mxu1 %v337_v51  ;;  %v614_v50 = vld [vmem:[%s3094_s2 + $0x68] sm:$0xff] }
  0x44   :  { %1658 = vmatprep.mubr.f32.mxu0 %v57_v52  ;;  %1744 = vmatprep.mubr.f32.mxu1 %v338_v53  ;;  %v895_v51 = vld [vmem:[%s3095_s3 + $0x68] sm:$0xff]  ;;  %v615_v52 = vld [vmem:[%s3094_s2 + $0x70] sm:$0xff] }
  0x45   :  { %1787 = vmatprep.subr.mxu0 %v2049_v8  ;;  %1873 = vmatprep.subr.mxu1 %v2049_v8  ;;  %v896_v53 = vld [vmem:[%s3095_s3 + $0x70] sm:$0xff] }
  0x46   :  { %1788 = vmatpush3.msra.mxu0 %v2049_v8  ;;  %1874 = vmatpush3.msra.mxu1 %v2049_v8  ;;  %v67_v8 = vld [vmem:[%s3092_s0 + $0xe0] sm:$0xff] }
  0x47   :  { %1659 = vmatmul.mubr.f32.gmra.mxu0 %v58_v54  ;;  %1745 = vmatmul.mubr.f32.gmra.mxu1 %v339_v55  ;;  %v616_v54 = vld [vmem:[%s3094_s2 + $0x78] sm:$0xff] }
  0x48   :  { %1661 = vmatprep.mubr.f32.mxu0 %v59_v56  ;;  %1747 = vmatprep.mubr.f32.mxu1 %v340_v57  ;;  %v897_v55 = vld [vmem:[%s3095_s3 + $0x78] sm:$0xff]  ;;  %v617_v56 = vld [vmem:[%s3094_s2 + $0x80] sm:$0xff] }
  0x49   :  { %1789 = vmatprep.subr.mxu0 %v2058_v9  ;;  %1875 = vmatprep.subr.mxu1 %v2058_v9  ;;  %v898_v57 = vld [vmem:[%s3095_s3 + $0x80] sm:$0xff] }
  0x4a   :  { %1790 = vmatpush3.msra.mxu0 %v2058_v9  ;;  %1876 = vmatpush3.msra.mxu1 %v2058_v9  ;;  %v348_v9 = vld [vmem:[%s3093_s1 + $0xe0] sm:$0xff] }
  0x4b   :  { %1662 = vmatmul.mubr.f32.gmra.mxu0 %v60_v58  ;;  %1748 = vmatmul.mubr.f32.gmra.mxu1 %v341_v59  ;;  %v618_v58 = vld [vmem:[%s3094_s2 + $0x88] sm:$0xff] }
  0x4c   :  { %1664 = vmatprep.mubr.f32.mxu0 %v61_v60  ;;  %1750 = vmatprep.mubr.f32.mxu1 %v342_v61  ;;  %v899_v59 = vld [vmem:[%s3095_s3 + $0x88] sm:$0xff]  ;;  %v619_v60 = vld [vmem:[%s3094_s2 + $0x90] sm:$0xff] }
  0x4d   :  { %1791 = vmatprep.subr.mxu0 %v2067_v10  ;;  %1877 = vmatprep.subr.mxu1 %v2067_v10  ;;  %v900_v61 = vld [vmem:[%s3095_s3 + $0x90] sm:$0xff] }
  0x4e   :  { %1792 = vmatpush3.msra.mxu0 %v2067_v10  ;;  %1878 = vmatpush3.msra.mxu1 %v2067_v10  ;;  %v68_v10 = vld [vmem:[%s3092_s0 + $0xe8] sm:$0xff] }
  0x4f   :  { %1665 = vmatmul.mubr.f32.gmra.mxu0 %v62_v62  ;;  %1751 = vmatmul.mubr.f32.gmra.mxu1 %v343_v63  ;;  %v620_v62 = vld [vmem:[%s3094_s2 + $0x98] sm:$0xff] }
  0x50   :  { %1667 = vmatprep.mubr.f32.mxu0 %v63_v0  ;;  %1753 = vmatprep.mubr.f32.mxu1 %v344_v1  ;;  %v901_v63 = vld [vmem:[%s3095_s3 + $0x98] sm:$0xff]  ;;  %v621_v0 = vld [vmem:[%s3094_s2 + $0xa0] sm:$0xff] }
  0x51   :  { %1793 = vmatprep.subr.mxu0 %v2076_v11  ;;  %1879 = vmatprep.subr.mxu1 %v2076_v11  ;;  %v902_v1 = vld [vmem:[%s3095_s3 + $0xa0] sm:$0xff] }
  0x52   :  { %1794 = vmatpush3.msra.mxu0 %v2076_v11  ;;  %1880 = vmatpush3.msra.mxu1 %v2076_v11  ;;  %v349_v11 = vld [vmem:[%s3093_s1 + $0xe8] sm:$0xff] }
  0x53   :  { %1668 = vmatmul.mubr.f32.gmra.mxu0 %v64_v2  ;;  %1754 = vmatmul.mubr.f32.gmra.mxu1 %v345_v3  ;;  %v622_v2 = vld [vmem:[%s3094_s2 + $0xa8] sm:$0xff] }
  0x54   :  { %1670 = vmatprep.mubr.f32.mxu0 %v65_v4  ;;  %1756 = vmatprep.mubr.f32.mxu1 %v346_v5  ;;  %v903_v3 = vld [vmem:[%s3095_s3 + $0xa8] sm:$0xff]  ;;  %v623_v4 = vld [vmem:[%s3094_s2 + $0xb0] sm:$0xff] }
  0x55   :  { %1795 = vmatprep.subr.mxu0 %v2085_v12  ;;  %1881 = vmatprep.subr.mxu1 %v2085_v12  ;;  %v904_v5 = vld [vmem:[%s3095_s3 + $0xb0] sm:$0xff] }
  0x56   :  { %1796 = vmatpush3.msra.mxu0 %v2085_v12  ;;  %1882 = vmatpush3.msra.mxu1 %v2085_v12  ;;  %v350_v12 = vld [vmem:[%s3093_s1 + $0xf0] sm:$0xff] }
  0x57   :  { %1671 = vmatmul.mubr.f32.gmra.mxu0 %v66_v6  ;;  %1757 = vmatmul.mubr.f32.gmra.mxu1 %v347_v7  ;;  %v624_v6 = vld [vmem:[%s3094_s2 + $0xb8] sm:$0xff] }
  0x58   :  { %1673 = vmatprep.mubr.f32.mxu0 %v67_v8  ;;  %1759 = vmatprep.mubr.f32.mxu1 %v348_v9  ;;  %v905_v7 = vld [vmem:[%s3095_s3 + $0xb8] sm:$0xff]  ;;  %v625_v8 = vld [vmem:[%s3094_s2 + $0xc0] sm:$0xff] }
  0x59   :  { %1797 = vmatprep.subr.mxu0 %v2094_v13  ;;  %1883 = vmatprep.subr.mxu1 %v2094_v13  ;;  %v906_v9 = vld [vmem:[%s3095_s3 + $0xc0] sm:$0xff] }
  0x5a   :  { %1798 = vmatpush3.msra.mxu0 %v2094_v13  ;;  %1884 = vmatpush3.msra.mxu1 %v2094_v13  ;;  %v352_v13 = vld [vmem:[%s3093_s1 + $0x100] sm:$0xff] }
  0x5b   :  { %1674 = vmatmul.mubr.f32.gmra.mxu0 %v68_v10  ;;  %1760 = vmatmul.mubr.f32.gmra.mxu1 %v349_v11  ;;  %v626_v10 = vld [vmem:[%s3094_s2 + $0xc8] sm:$0xff] }
  0x5c   :  { %1676 = vmatprep.mubr.f32.mxu0 %v69_v16  ;;  %1762 = vmatprep.mubr.f32.mxu1 %v350_v12  ;;  %v907_v11 = vld [vmem:[%s3095_s3 + $0xc8] sm:$0xff]  ;;  %v627_v16 = vld [vmem:[%s3094_s2 + $0xd0] sm:$0xff] }
  0x5d   :  { %1799 = vmatprep.subr.mxu0 %v2103_v14  ;;  %1885 = vmatprep.subr.mxu1 %v2103_v14  ;;  %v908_v12 = vld [vmem:[%s3095_s3 + $0xd0] sm:$0xff] }
  0x5e   :  { %1800 = vmatpush3.msra.mxu0 %v2103_v14  ;;  %1886 = vmatpush3.msra.mxu1 %v2103_v14  ;;  %v354_v14 = vld [vmem:[%s3093_s1 + $0x110] sm:$0xff] }
  0x5f   :  { %1677 = vmatmul.mubr.f32.gmra.mxu0 %v70_v17  ;;  %1763 = vmatmul.mubr.f32.gmra.mxu1 %v351_v18  ;;  %v628_v17 = vld [vmem:[%s3094_s2 + $0xd8] sm:$0xff] }
  0x60   :  { %1679 = vmatprep.mubr.f32.mxu0 %v71_v19  ;;  %1765 = vmatprep.mubr.f32.mxu1 %v352_v13  ;;  %v909_v18 = vld [vmem:[%s3095_s3 + $0xd8] sm:$0xff]  ;;  %v629_v19 = vld [vmem:[%s3094_s2 + $0xe0] sm:$0xff] }
  0x61   :  { %1801 = vmatprep.subr.mxu0 %v2112_v15  ;;  %1887 = vmatprep.subr.mxu1 %v2112_v15  ;;  %v910_v13 = vld [vmem:[%s3095_s3 + $0xe0] sm:$0xff] }
  0x62   :  { %1802 = vmatpush3.msra.mxu0 %v2112_v15  ;;  %1888 = vmatpush3.msra.mxu1 %v2112_v15  ;;  %v882_v15 = vld [vmem:[%s3095_s3] sm:$0xff] }
  0x63   :  { %1680 = vmatmul.mubr.f32.gmra.mxu0 %v72_v20  ;;  %1766 = vmatmul.mubr.f32.gmra.mxu1 %v353_v21  ;;  %v630_v20 = vld [vmem:[%s3094_s2 + $0xe8] sm:$0xff] }
  0x64   :  { %1682 = vmatprep.mubr.f32.mxu0 %v73_v22  ;;  %1768 = vmatprep.mubr.f32.mxu1 %v354_v14  ;;  %v911_v21 = vld [vmem:[%s3095_s3 + $0xe8] sm:$0xff]  ;;  %v631_v22 = vld [vmem:[%s3094_s2 + $0xf0] sm:$0xff] }
  0x65   :  { %v912_v14 = vld [vmem:[%s3095_s3 + $0xf0] sm:$0xff] }
  0x67   :  { %1683 = vmatmul.mubr.f32.gmra.mxu0 %v74_v23  ;;  %1769 = vmatmul.mubr.f32.gmra.mxu1 %v355_v24  ;;  %v632_v23 = vld [vmem:[%s3094_s2 + $0xf8] sm:$0xff] }
  0x68   :  { %1803 = vmatprep.mubr.f32.mxu0 %v601_v25  ;;  %1889 = vmatprep.mubr.f32.mxu1 %v882_v15  ;;  %v913_v24 = vld [vmem:[%s3095_s3 + $0xf8] sm:$0xff]  ;;  %v633_v25 = vld [vmem:[%s3094_s2 + $0x100] sm:$0xff] }
  0x69   :  { %v914_v15 = vld [vmem:[%s3095_s3 + $0x100] sm:$0xff] }
  0x6b   :  { %1804 = vmatmul.mubr.f32.vlgmr.msra.gmra.mxu0 %v602_v26  ;;  %1890 = vmatmul.mubr.f32.vlgmr.msra.gmra.mxu1 %v883_v27  ;;  %v634_v26 = vld [vmem:[%s3094_s2 + $0x108] sm:$0xff] }
  0x6c   :  { %1806 = vmatprep.mubr.f32.mxu0 %v603_v28  ;;  %1892 = vmatprep.mubr.f32.mxu1 %v884_v29  ;;  %v915_v27 = vld [vmem:[%s3095_s3 + $0x108] sm:$0xff]  ;;  %v635_v28 = vld [vmem:[%s3094_s2 + $0x110] sm:$0xff] }
  0x6d   :  { %v916_v29 = vld [vmem:[%s3095_s3 + $0x110] sm:$0xff] }
  0x6f   :  { %1807 = vmatmul.mubr.f32.gmra.mxu0 %v604_v30  ;;  %1893 = vmatmul.mubr.f32.gmra.mxu1 %v885_v31  ;;  %v636_v30 = vld [vmem:[%s3094_s2 + $0x118] sm:$0xff] }
  0x70   :  { %1809 = vmatprep.mubr.f32.mxu0 %v605_v32  ;;  %1895 = vmatprep.mubr.f32.mxu1 %v886_v33  ;;  %v917_v31 = vld [vmem:[%s3095_s3 + $0x118] sm:$0xff] }
  0x73   :  { %1810 = vmatmul.mubr.f32.gmra.mxu0 %v606_v34  ;;  %1896 = vmatmul.mubr.f32.gmra.mxu1 %v887_v35 }
  0x74   :  { %1812 = vmatprep.mubr.f32.mxu0 %v607_v36  ;;  %1898 = vmatprep.mubr.f32.mxu1 %v888_v37 }
  0x77   :  { %1813 = vmatmul.mubr.f32.gmra.mxu0 %v608_v38  ;;  %1899 = vmatmul.mubr.f32.gmra.mxu1 %v889_v39 }
  0x78   :  { %1815 = vmatprep.mubr.f32.mxu0 %v609_v40  ;;  %1901 = vmatprep.mubr.f32.mxu1 %v890_v41 }
  0x7b   :  { %1816 = vmatmul.mubr.f32.gmra.mxu0 %v610_v42  ;;  %1902 = vmatmul.mubr.f32.gmra.mxu1 %v891_v43 }
  0x7c   :  { %1818 = vmatprep.mubr.f32.mxu0 %v611_v44  ;;  %1904 = vmatprep.mubr.f32.mxu1 %v892_v45 }
  0x7f   :  { %1819 = vmatmul.mubr.f32.gmra.mxu0 %v612_v46  ;;  %1905 = vmatmul.mubr.f32.gmra.mxu1 %v893_v47 }
  0x80   :  { %1821 = vmatprep.mubr.f32.mxu0 %v613_v48  ;;  %1907 = vmatprep.mubr.f32.mxu1 %v894_v49 }
  0x83   :  { %1822 = vmatmul.mubr.f32.gmra.mxu0 %v614_v50  ;;  %1908 = vmatmul.mubr.f32.gmra.mxu1 %v895_v51 }
  0x84   :  { %1824 = vmatprep.mubr.f32.mxu0 %v615_v52  ;;  %1910 = vmatprep.mubr.f32.mxu1 %v896_v53 }
  0x87   :  { %1825 = vmatmul.mubr.f32.gmra.mxu0 %v616_v54  ;;  %1911 = vmatmul.mubr.f32.gmra.mxu1 %v897_v55 }
  0x88   :  { %1827 = vmatprep.mubr.f32.mxu0 %v617_v56  ;;  %1913 = vmatprep.mubr.f32.mxu1 %v898_v57 }
  0x8b   :  { %1828 = vmatmul.mubr.f32.gmra.mxu0 %v618_v58  ;;  %1914 = vmatmul.mubr.f32.gmra.mxu1 %v899_v59 }
  0x8c   :  { %1830 = vmatprep.mubr.f32.mxu0 %v619_v60  ;;  %1916 = vmatprep.mubr.f32.mxu1 %v900_v61 }
  0x8f   :  { %1831 = vmatmul.mubr.f32.gmra.mxu0 %v620_v62  ;;  %1917 = vmatmul.mubr.f32.gmra.mxu1 %v901_v63 }
  0x90   :  { %1833 = vmatprep.mubr.f32.mxu0 %v621_v0  ;;  %1919 = vmatprep.mubr.f32.mxu1 %v902_v1 }
  0x93   :  { %1834 = vmatmul.mubr.f32.gmra.mxu0 %v622_v2  ;;  %1920 = vmatmul.mubr.f32.gmra.mxu1 %v903_v3 }
  0x94   :  { %1836 = vmatprep.mubr.f32.mxu0 %v623_v4  ;;  %1922 = vmatprep.mubr.f32.mxu1 %v904_v5 }
  0x97   :  { %1837 = vmatmul.mubr.f32.gmra.mxu0 %v624_v6  ;;  %1923 = vmatmul.mubr.f32.gmra.mxu1 %v905_v7 }
  0x98   :  { %1839 = vmatprep.mubr.f32.mxu0 %v625_v8  ;;  %1925 = vmatprep.mubr.f32.mxu1 %v906_v9 }
  0x9b   :  { %1840 = vmatmul.mubr.f32.gmra.mxu0 %v626_v10  ;;  %1926 = vmatmul.mubr.f32.gmra.mxu1 %v907_v11 }
  0x9c   :  { %1842 = vmatprep.mubr.f32.mxu0 %v627_v16  ;;  %1928 = vmatprep.mubr.f32.mxu1 %v908_v12 }
  0x9f   :  { %1843 = vmatmul.mubr.f32.gmra.mxu0 %v628_v17  ;;  %1929 = vmatmul.mubr.f32.gmra.mxu1 %v909_v18 }
  0xa0   :  { %1845 = vmatprep.mubr.f32.mxu0 %v629_v19  ;;  %1931 = vmatprep.mubr.f32.mxu1 %v910_v13 }
  0xa3   :  { %1846 = vmatmul.mubr.f32.gmra.mxu0 %v630_v20  ;;  %1932 = vmatmul.mubr.f32.gmra.mxu1 %v911_v21 }
  0xa4   :  { %1848 = vmatprep.mubr.f32.mxu0 %v631_v22  ;;  %1934 = vmatprep.mubr.f32.mxu1 %v912_v14 }
  0xa7   :  { %1849 = vmatmul.mubr.f32.gmra.mxu0 %v632_v23  ;;  %1935 = vmatmul.mubr.f32.gmra.mxu1 %v913_v24 }
  0xa8   :  { %1851 = vmatprep.mubr.f32.mxu0 %v633_v25  ;;  %1937 = vmatprep.mubr.f32.mxu1 %v914_v15  ;;  %v2837_v25 = vld [vmem:[%s3096_s5] ss:$0 sm:$0xff] }
  0xab   :  { %1852 = vmatmul.mubr.f32.gmra.mxu0 %v634_v26  ;;  %1938 = vmatmul.mubr.f32.gmra.mxu1 %v915_v27 }
  0xac   :  { %1854 = vmatprep.mubr.f32.mxu0 %v635_v28  ;;  %1940 = vmatprep.mubr.f32.mxu1 %v916_v29 }
  0xaf   :  { %1855 = vmatmul.mubr.f32.gmra.mxu0 %v636_v30  ;;  %1941 = vmatmul.mubr.f32.gmra.mxu1 %v917_v31 }
  0xe3   :  { %v2618_v32 = vpop.f32.mrf.mxu0  ;;  %v2620_v33 = vpop.f32.mrf.mxu1 }
  0xe4   :  { %v3150_v27 = vmax.f32 %v2618_v32, %v2620_v33 }
  0xe5   :  { %v2624_v35 = vpop.f32.mrf.mxu0  ;;  %v2626_v36 = vpop.f32.mrf.mxu1 }
  0xe6   :  { %v3151_v30 = vmax.f32 %v2624_v35, %v2626_v36 }
  0xe7   :  { %v2630_v38 = vpop.f32.mrf.mxu0  ;;  %v2632_v39 = vpop.f32.mrf.mxu1 }
  0xe9   :  { %v2636_v41 = vpop.f32.mrf.mxu0  ;;  %v2638_v42 = vpop.f32.mrf.mxu1 }
  0xea   :  { %v3153_v36 = vmax.f32 %v2636_v41, %v2638_v42 }
  0xeb   :  { %v2642_v44 = vpop.f32.mrf.mxu0  ;;  %v2644_v45 = vpop.f32.mrf.mxu1 }
  0xed   :  { %v2648_v47 = vpop.f32.mrf.mxu0  ;;  %v2650_v48 = vpop.f32.mrf.mxu1 }
  0xef   :  { %v2654_v50 = vpop.f32.mrf.mxu0  ;;  %v2656_v51 = vpop.f32.mrf.mxu1 }
  0xf1   :  { %v2660_v53 = vpop.f32.mrf.mxu0  ;;  %v2662_v54 = vpop.f32.mrf.mxu1 }
  0xf3   :  { %v2666_v56 = vpop.f32.mrf.mxu0  ;;  %v2668_v57 = vpop.f32.mrf.mxu1 }
  0xf5   :  { %v2672_v59 = vpop.f32.mrf.mxu0  ;;  %v2674_v60 = vpop.f32.mrf.mxu1 }
  0xf7   :  { %v2678_v62 = vpop.f32.mrf.mxu0  ;;  %v2680_v63 = vpop.f32.mrf.mxu1 }
  0xf9   :  { %v2684_v1 = vpop.f32.mrf.mxu0  ;;  %v2686_v2 = vpop.f32.mrf.mxu1 }
  0xfb   :  { %v2690_v4 = vpop.f32.mrf.mxu0  ;;  %v2692_v5 = vpop.f32.mrf.mxu1 }
  0xfd   :  { %v2696_v7 = vpop.f32.mrf.mxu0  ;;  %v2698_v8 = vpop.f32.mrf.mxu1 }
  0xff   :  { %v2702_v10 = vpop.f32.mrf.mxu0  ;;  %v2704_v11 = vpop.f32.mrf.mxu1 }
 0x101   :  { %v2708_v12 = vpop.f32.mrf.mxu0  ;;  %v2710_v17 = vpop.f32.mrf.mxu1 }
 0x103   :  { %v2714_v19 = vpop.f32.mrf.mxu0  ;;  %v2716_v13 = vpop.f32.mrf.mxu1 }
 0x105   :  { %v2720_v21 = vpop.f32.mrf.mxu0  ;;  %v2722_v22 = vpop.f32.mrf.mxu1 }
 0x107   :  { %v2726_v23 = vpop.f32.mrf.mxu0  ;;  %v2728_v24 = vpop.f32.mrf.mxu1 }
 0x109   :  { %v2732_v15 = vpop.f32.mrf.mxu0  ;;  %v2734_v26 = vpop.f32.mrf.mxu1 }
 0x10b   :  { %v2738_v28 = vpop.f32.mrf.mxu0  ;;  %v2740_v29 = vpop.f32.mrf.mxu1 }
 0x10d   :  { %v2744_v31 = vpop.f32.mrf.mxu0  ;;  %v2746_v14 = vpop.f32.mrf.mxu1 }
 0x10f   :  { %v2750_v20 = vpop.f32.mrf.mxu0  ;;  %v2752_v18 = vpop.f32.mrf.mxu1 }
 0x111   :  { %v2756_v16 = vpop.f32.mrf.mxu0  ;;  %v2758_v9 = vpop.f32.mrf.mxu1 }
 0x112   :  { %3124 = vst [vmem:[#allocation2_spill] sm:$0xff] %v2756_v16  ;;  %3125 = vst [vmem:[#allocation3_spill] sm:$0xff] %v2758_v9  ;;  %v3152_v16 = vmax.f32 %v2630_v38, %v2632_v39 }
 0x113   :  { %v2762_v6 = vpop.f32.mrf.mxu0  ;;  %v2764_v3 = vpop.f32.mrf.mxu1 }
 0x114   :  { %3126 = vst [vmem:[#allocation4_spill] sm:$0xff] %v2762_v6  ;;  %3127 = vst [vmem:[#allocation5_spill] sm:$0xff] %v2764_v3 }
 0x115   :  { %v2768_v0 = vpop.f32.mrf.mxu0  ;;  %v2770_v61 = vpop.f32.mrf.mxu1 }
 0x116   :  { %3128 = vst [vmem:[#allocation6_spill] sm:$0xff] %v2768_v0  ;;  %3129 = vst [vmem:[#allocation7_spill] sm:$0xff] %v2770_v61 }
 0x117   :  { %v2774_v58 = vpop.f32.mrf.mxu0  ;;  %v2776_v55 = vpop.f32.mrf.mxu1 }
 0x118   :  { %3130 = vst [vmem:[#allocation8_spill] sm:$0xff] %v2774_v58  ;;  %3131 = vst [vmem:[#allocation9_spill] sm:$0xff] %v2776_v55 }
 0x119   :  { %v2780_v52 = vpop.f32.mrf.mxu0  ;;  %v2782_v49 = vpop.f32.mrf.mxu1 }
 0x11a   :  { %3132 = vst [vmem:[#allocation10_spill] sm:$0xff] %v2780_v52  ;;  %3133 = vst [vmem:[#allocation11_spill] sm:$0xff] %v2782_v49 }
 0x11b   :  { %v2786_v46 = vpop.f32.mrf.mxu0  ;;  %v2788_v43 = vpop.f32.mrf.mxu1 }
 0x11c   :  { %3134 = vst [vmem:[#allocation12_spill] sm:$0xff] %v2786_v46  ;;  %3135 = vst [vmem:[#allocation13_spill] sm:$0xff] %v2788_v43 }
 0x11d   :  { %v2792_v40 = vpop.f32.mrf.mxu0  ;;  %v2794_v37 = vpop.f32.mrf.mxu1 }
 0x11e   :  { %3136 = vst [vmem:[#allocation14_spill] sm:$0xff] %v2792_v40  ;;  %3137 = vst [vmem:[#allocation15_spill] sm:$0xff] %v2794_v37 }
 0x11f   :  { %v2798_v34 = vpop.f32.mrf.mxu0  ;;  %v2800_v55 = vpop.f32.mrf.mxu1 }
 0x120   :  { %3138 = vst [vmem:[#allocation16_spill] sm:$0xff] %v2798_v34  ;;  %3139 = vst [vmem:[#allocation17_spill] sm:$0xff] %v2800_v55 }
 0x121   :  { %v2804_v49 = vpop.f32.mrf.mxu0  ;;  %v2806_v52 = vpop.f32.mrf.mxu1 }
 0x122   :  { %3140 = vst [vmem:[#allocation18_spill] sm:$0xff] %v2804_v49  ;;  %3141 = vst [vmem:[#allocation19_spill] sm:$0xff] %v2806_v52 }
 0x123   :  { %v2810_v43 = vpop.f32.mrf.mxu0  ;;  %v2812_v46 = vpop.f32.mrf.mxu1 }
 0x124   :  { %3142 = vst [vmem:[#allocation20_spill] sm:$0xff] %v2810_v43  ;;  %3143 = vst [vmem:[#allocation21_spill] sm:$0xff] %v2812_v46 }
 0x125   :  { %v2816_v37 = vpop.f32.mrf.mxu0  ;;  %v2818_v40 = vpop.f32.mrf.mxu1 }
 0x126   :  { %3144 = vst [vmem:[#allocation22_spill] sm:$0xff] %v2816_v37  ;;  %3145 = vst [vmem:[#allocation23_spill] sm:$0xff] %v2818_v40 }
 0x127   :  { %v2822_v55 = vpop.f32.mrf.mxu0  ;;  %v2824_v34 = vpop.f32.mrf.mxu1 }
 0x128   :  { %3146 = vst [vmem:[#allocation24_spill] sm:$0xff] %v2822_v55  ;;  %3147 = vst [vmem:[#allocation25_spill] sm:$0xff] %v2824_v34 }
 0x129   :  { %v2828_v52 = vpop.f32.mrf.mxu0  ;;  %v2830_v49 = vpop.f32.mrf.mxu1 }
 0x12a   :  { %3148 = vst [vmem:[#allocation26_spill] sm:$0xff] %v2828_v52  ;;  %3149 = vst [vmem:[#allocation27_spill] sm:$0xff] %v2830_v49 }
 0x12b   :  { %v1805_v46 = vpop.f32.mrf.mxu0  ;;  %v1891_v43 = vpop.f32.mrf.mxu1 }
 0x12c   :  { %v1200_v58 = vmax.f32 %v1805_v46, %v1891_v43 }
 0x12d   :  { %v703_v40 = vpop.f32.mrf.mxu0  ;;  %v984_v37 = vpop.f32.mrf.mxu1 }
 0x12e   :  { %v1236_v34 = vmax.f32 %v3150_v27, %v1200_v58  ;;  %v1199_v55 = vmax.f32 %v703_v40, %v984_v37 }
 0x12f   :  { %v1808_v61 = vpop.f32.mrf.mxu0  ;;  %v1894_v0 = vpop.f32.mrf.mxu1 }
 0x130   :  { %v1279_v3 = vadd.f32 %v2837_v25, %v1236_v34  ;;  %v1235_v43 = vmax.f32 %v3151_v30, %v1199_v55  ;;  %v1202_v46 = vmax.f32 %v1808_v61, %v1894_v0 }
 0x131   :  { %v713_v49 = vpop.f32.mrf.mxu0  ;;  %v994_v52 = vpop.f32.mrf.mxu1 }
 0x132   :  { %v1315_v6 = vmax.f32 %v1279_v3, 0.0  ;;  %v1278_v9 = vadd.f32 %v2837_v25, %v1235_v43  ;;  %v1238_v32 = vmax.f32 %v3152_v16, %v1202_v46  ;;  %v1201_v33 = vmax.f32 %v713_v49, %v994_v52 }
 0x133   :  { %v1811_v37 = vpop.f32.mrf.mxu0  ;;  %v1897_v40 = vpop.f32.mrf.mxu1  ;;  %v3154_v49 = vmax.f32 %v2642_v44, %v2644_v45  ;;  %v3155_v16 = vmax.f32 %v2648_v47, %v2650_v48 }
 0x134   :  { %1351 = vst [vmem:[%s3097_s6 + $0x8] sm:$0xff] %v1315_v6  ;;  %v1314_v34 = vmax.f32 %v1278_v9, 0.0  ;;  %v1281_v35 = vadd.f32 %v2837_v25, %v1238_v32  ;;  %v1237_v55 = vmax.f32 %v3153_v36, %v1201_v33  ;;  %v1204_v58 = vmax.f32 %v1811_v37, %v1897_v40 }
 0x135   :  { %v723_v61 = vpop.f32.mrf.mxu0  ;;  %v1004_v0 = vpop.f32.mrf.mxu1  ;;  %v3156_v32 = vmax.f32 %v2654_v50, %v2656_v51 }
 0x136   :  { %1350 = vst [vmem:[%s3097_s6] sm:$0xff] %v1314_v34  ;;  %v1317_v38 = vmax.f32 %v1281_v35, 0.0  ;;  %v1280_v39 = vadd.f32 %v2837_v25, %v1237_v55  ;;  %v1240_v52 = vmax.f32 %v3154_v49, %v1204_v58  ;;  %v1203_v3 = vmax.f32 %v723_v61, %v1004_v0 }
 0x137   :  { %v1814_v6 = vpop.f32.mrf.mxu0  ;;  %v1900_v9 = vpop.f32.mrf.mxu1  ;;  %v3157_v35 = vmax.f32 %v2660_v53, %v2662_v54  ;;  %v3158_v0 = vmax.f32 %v2666_v56, %v2668_v57 }
 0x138   :  { %1353 = vst [vmem:[%s3097_s6 + $0x18] sm:$0xff] %v1317_v38  ;;  %v1316_v41 = vmax.f32 %v1280_v39, 0.0  ;;  %v1283_v42 = vadd.f32 %v2837_v25, %v1240_v52  ;;  %v1239_v27 = vmax.f32 %v3155_v16, %v1203_v3  ;;  %v1206_v30 = vmax.f32 %v1814_v6, %v1900_v9 }
 0x139   :  { %v733_v43 = vpop.f32.mrf.mxu0  ;;  %v1014_v46 = vpop.f32.mrf.mxu1  ;;  %v3159_v3 = vmax.f32 %v2672_v59, %v2674_v60  ;;  %v3160_v16 = vmax.f32 %v2678_v62, %v2680_v63 }
 0x13a   :  { %1352 = vst [vmem:[%s3097_s6 + $0x10] sm:$0xff] %v1316_v41  ;;  %v1319_v44 = vmax.f32 %v1283_v42, 0.0  ;;  %v1282_v45 = vadd.f32 %v2837_v25, %v1239_v27  ;;  %v1242_v33 = vmax.f32 %v3156_v32, %v1206_v30  ;;  %v1205_v37 = vmax.f32 %v733_v43, %v1014_v46 }
 0x13b   :  { %v1817_v40 = vpop.f32.mrf.mxu0  ;;  %v1903_v34 = vpop.f32.mrf.mxu1 }
 0x13c   :  { %1355 = vst [vmem:[%s3097_s6 + $0x28] sm:$0xff] %v1319_v44  ;;  %v1318_v47 = vmax.f32 %v1282_v45, 0.0  ;;  %v1285_v48 = vadd.f32 %v2837_v25, %v1242_v33  ;;  %v1241_v36 = vmax.f32 %v3157_v35, %v1205_v37  ;;  %v1208_v55 = vmax.f32 %v1817_v40, %v1903_v34 }
 0x13d   :  { %v743_v58 = vpop.f32.mrf.mxu0  ;;  %v1024_v61 = vpop.f32.mrf.mxu1  ;;  %v3161_v44 = vmax.f32 %v2684_v1, %v2686_v2  ;;  %v3162_v40 = vmax.f32 %v2690_v4, %v2692_v5 }
 0x13e   :  { %1354 = vst [vmem:[%s3097_s6 + $0x20] sm:$0xff] %v1318_v47  ;;  %v1321_v50 = vmax.f32 %v1285_v48, 0.0  ;;  %v1284_v51 = vadd.f32 %v2837_v25, %v1241_v36  ;;  %v1244_v38 = vmax.f32 %v3158_v0, %v1208_v55  ;;  %v1207_v39 = vmax.f32 %v743_v58, %v1024_v61 }
 0x13f   :  { %v1820_v49 = vpop.f32.mrf.mxu0  ;;  %v1906_v52 = vpop.f32.mrf.mxu1  ;;  %v3163_v36 = vmax.f32 %v2696_v7, %v2698_v8 }
 0x140   :  { %1357 = vst [vmem:[%s3097_s6 + $0x38] sm:$0xff] %v1321_v50  ;;  %v1320_v53 = vmax.f32 %v1284_v51, 0.0  ;;  %v1287_v54 = vadd.f32 %v2837_v25, %v1244_v38  ;;  %v1243_v6 = vmax.f32 %v3159_v3, %v1207_v39  ;;  %v1210_v9 = vmax.f32 %v1820_v49, %v1906_v52 }
 0x141   :  { %v753_v41 = vpop.f32.mrf.mxu0  ;;  %v1034_v42 = vpop.f32.mrf.mxu1  ;;  %v3164_v51 = vmax.f32 %v2702_v10, %v2704_v11  ;;  %v3165_v52 = vmax.f32 %v2708_v12, %v2710_v17 }
 0x142   :  { %1356 = vst [vmem:[%s3097_s6 + $0x30] sm:$0xff] %v1320_v53  ;;  %v1323_v56 = vmax.f32 %v1287_v54, 0.0  ;;  %v1286_v57 = vadd.f32 %v2837_v25, %v1243_v6  ;;  %v1246_v27 = vmax.f32 %v3160_v16, %v1210_v9  ;;  %v1209_v30 = vmax.f32 %v753_v41, %v1034_v42 }
 0x143   :  { %v1823_v43 = vpop.f32.mrf.mxu0  ;;  %v1909_v46 = vpop.f32.mrf.mxu1  ;;  %v3166_v9 = vmax.f32 %v2714_v19, %v2716_v13  ;;  %v3167_v16 = vmax.f32 %v2720_v21, %v2722_v22 }
 0x144   :  { %1359 = vst [vmem:[%s3097_s6 + $0x48] sm:$0xff] %v1323_v56  ;;  %v1322_v59 = vmax.f32 %v1286_v57, 0.0  ;;  %v1289_v60 = vadd.f32 %v2837_v25, %v1246_v27  ;;  %v1245_v45 = vmax.f32 %v3161_v44, %v1209_v30  ;;  %v1212_v32 = vmax.f32 %v1823_v43, %v1909_v46 }
 0x145   :  { %v763_v33 = vpop.f32.mrf.mxu0  ;;  %v1044_v37 = vpop.f32.mrf.mxu1 }
 0x146   :  { %1358 = vst [vmem:[%s3097_s6 + $0x40] sm:$0xff] %v1322_v59  ;;  %v1325_v62 = vmax.f32 %v1289_v60, 0.0  ;;  %v1288_v63 = vadd.f32 %v2837_v25, %v1245_v45  ;;  %v1248_v34 = vmax.f32 %v3162_v40, %v1212_v32  ;;  %v1211_v47 = vmax.f32 %v763_v33, %v1044_v37 }
 0x147   :  { %v1826_v48 = vpop.f32.mrf.mxu0  ;;  %v1912_v35 = vpop.f32.mrf.mxu1  ;;  %v3168_v59 = vmax.f32 %v2726_v23, %v2728_v24  ;;  %v3169_v33 = vmax.f32 %v2732_v15, %v2734_v26 }
 0x148   :  { %1361 = vst [vmem:[%s3097_s6 + $0x58] sm:$0xff] %v1325_v62  ;;  %v1324_v1 = vmax.f32 %v1288_v63, 0.0  ;;  %v1291_v2 = vadd.f32 %v2837_v25, %v1248_v34  ;;  %v1247_v55 = vmax.f32 %v3163_v36, %v1211_v47  ;;  %v1214_v58 = vmax.f32 %v1826_v48, %v1912_v35 }
 0x149   :  { %v773_v61 = vpop.f32.mrf.mxu0  ;;  %v1054_v50 = vpop.f32.mrf.mxu1  ;;  %v3170_v34 = vmax.f32 %v2738_v28, %v2740_v29 }
 0x14a   :  { %1360 = vst [vmem:[%s3097_s6 + $0x50] sm:$0xff] %v1324_v1  ;;  %v1327_v4 = vmax.f32 %v1291_v2, 0.0  ;;  %v1290_v5 = vadd.f32 %v2837_v25, %v1247_v55  ;;  %v1250_v0 = vmax.f32 %v3164_v51, %v1214_v58  ;;  %v1213_v38 = vmax.f32 %v773_v61, %v1054_v50 }
 0x14b   :  { %v1829_v39 = vpop.f32.mrf.mxu0  ;;  %v1915_v49 = vpop.f32.mrf.mxu1  ;;  %v3171_v2 = vmax.f32 %v2744_v31, %v2746_v14  ;;  %v3172_v50 = vmax.f32 %v2750_v20, %v2752_v18 }
 0x14c   :  { %1363 = vst [vmem:[%s3097_s6 + $0x68] sm:$0xff] %v1327_v4  ;;  %v1326_v7 = vmax.f32 %v1290_v5, 0.0  ;;  %v1293_v8 = vadd.f32 %v2837_v25, %v1250_v0  ;;  %v1249_v53 = vmax.f32 %v3165_v52, %v1213_v38  ;;  %v1216_v54 = vmax.f32 %v1829_v39, %v1915_v49  ;;  %v3173_v38 = vld [vmem:[#allocation2_spill] sm:$0xff]  ;;  %v3174_v39 = vld [vmem:[#allocation3_spill] sm:$0xff] }
 0x14d   :  { %v783_v3 = vpop.f32.mrf.mxu0  ;;  %v1064_v6 = vpop.f32.mrf.mxu1  ;;  %v3175_v49 = vmax.f32 %v3173_v38, %v3174_v39  ;;  %v3194_v38 = vld [vmem:[#allocation16_spill] sm:$0xff]  ;;  %v3195_v39 = vld [vmem:[#allocation17_spill] sm:$0xff] }
 0x14e   :  { %1362 = vst [vmem:[%s3097_s6 + $0x60] sm:$0xff] %v1326_v7  ;;  %v1329_v10 = vmax.f32 %v1293_v8, 0.0  ;;  %v1292_v11 = vadd.f32 %v2837_v25, %v1249_v53  ;;  %v1252_v41 = vmax.f32 %v3166_v9, %v1216_v54  ;;  %v1215_v42 = vmax.f32 %v783_v3, %v1064_v6  ;;  %v3176_v54 = vld [vmem:[#allocation4_spill] sm:$0xff]  ;;  %v3177_v3 = vld [vmem:[#allocation5_spill] sm:$0xff] }
 0x14f   :  { %v1832_v56 = vpop.f32.mrf.mxu0  ;;  %v1918_v57 = vpop.f32.mrf.mxu1  ;;  %v3178_v6 = vmax.f32 %v3176_v54, %v3177_v3  ;;  %v3197_v54 = vld [vmem:[#allocation18_spill] sm:$0xff]  ;;  %v3198_v3 = vld [vmem:[#allocation19_spill] sm:$0xff] }
 0x150   :  { %1365 = vst [vmem:[%s3097_s6 + $0x78] sm:$0xff] %v1329_v10  ;;  %v1328_v12 = vmax.f32 %v1292_v11, 0.0  ;;  %v1295_v17 = vadd.f32 %v2837_v25, %v1252_v41  ;;  %v1251_v27 = vmax.f32 %v3167_v16, %v1215_v42  ;;  %v1218_v30 = vmax.f32 %v1832_v56, %v1918_v57  ;;  %v3179_v57 = vld [vmem:[#allocation6_spill] sm:$0xff] }
 0x151   :  { %v793_v43 = vpop.f32.mrf.mxu0  ;;  %v1074_v46 = vpop.f32.mrf.mxu1 }
 0x152   :  { %1364 = vst [vmem:[%s3097_s6 + $0x70] sm:$0xff] %v1328_v12  ;;  %v1331_v19 = vmax.f32 %v1295_v17, 0.0  ;;  %v1294_v13 = vadd.f32 %v2837_v25, %v1251_v27  ;;  %v1254_v60 = vmax.f32 %v3168_v59, %v1218_v30  ;;  %v1217_v44 = vmax.f32 %v793_v43, %v1074_v46  ;;  %v3180_v12 = vld [vmem:[#allocation7_spill] sm:$0xff]  ;;  %v3183_v59 = vld [vmem:[#allocation9_spill] sm:$0xff] }
 0x153   :  { %v1835_v45 = vpop.f32.mrf.mxu0  ;;  %v1921_v32 = vpop.f32.mrf.mxu1  ;;  %v3181_v17 = vmax.f32 %v3179_v57, %v3180_v12  ;;  %v3200_v57 = vld [vmem:[#allocation20_spill] sm:$0xff]  ;;  %v3201_v12 = vld [vmem:[#allocation21_spill] sm:$0xff] }
 0x154   :  { %1367 = vst [vmem:[%s3097_s6 + $0x88] sm:$0xff] %v1331_v19  ;;  %v1330_v21 = vmax.f32 %v1294_v13, 0.0  ;;  %v1297_v22 = vadd.f32 %v2837_v25, %v1254_v60  ;;  %v1253_v37 = vmax.f32 %v3169_v33, %v1217_v44  ;;  %v1220_v62 = vmax.f32 %v1835_v45, %v1921_v32  ;;  %v3182_v13 = vld [vmem:[#allocation8_spill] sm:$0xff] }
 0x155   :  { %v803_v63 = vpop.f32.mrf.mxu0  ;;  %v1084_v40 = vpop.f32.mrf.mxu1  ;;  %v3184_v60 = vmax.f32 %v3182_v13, %v3183_v59  ;;  %v3203_v13 = vld [vmem:[#allocation22_spill] sm:$0xff]  ;;  %v3204_v59 = vld [vmem:[#allocation23_spill] sm:$0xff] }
 0x156   :  { %1366 = vst [vmem:[%s3097_s6 + $0x80] sm:$0xff] %v1330_v21  ;;  %v1333_v23 = vmax.f32 %v1297_v22, 0.0  ;;  %v1296_v24 = vadd.f32 %v2837_v25, %v1253_v37  ;;  %v1256_v47 = vmax.f32 %v3170_v34, %v1220_v62  ;;  %v1219_v48 = vmax.f32 %v803_v63, %v1084_v40  ;;  %v3185_v37 = vld [vmem:[#allocation10_spill] sm:$0xff]  ;;  %v3186_v62 = vld [vmem:[#allocation11_spill] sm:$0xff] }
 0x157   :  { %v1838_v35 = vpop.f32.mrf.mxu0  ;;  %v1924_v1 = vpop.f32.mrf.mxu1  ;;  %v3187_v63 = vmax.f32 %v3185_v37, %v3186_v62  ;;  %v3206_v37 = vld [vmem:[#allocation24_spill] sm:$0xff]  ;;  %v3207_v62 = vld [vmem:[#allocation25_spill] sm:$0xff] }
 0x158   :  { %1369 = vst [vmem:[%s3097_s6 + $0x98] sm:$0xff] %v1333_v23  ;;  %v1332_v15 = vmax.f32 %v1296_v24, 0.0  ;;  %v1299_v26 = vadd.f32 %v2837_v25, %v1256_v47  ;;  %v1255_v36 = vmax.f32 %v3171_v2, %v1219_v48  ;;  %v1222_v55 = vmax.f32 %v1838_v35, %v1924_v1  ;;  %v3188_v35 = vld [vmem:[#allocation12_spill] sm:$0xff]  ;;  %v3189_v1 = vld [vmem:[#allocation13_spill] sm:$0xff] }
 0x159   :  { %v813_v58 = vpop.f32.mrf.mxu0  ;;  %v1094_v61 = vpop.f32.mrf.mxu1 }
 0x15a   :  { %1368 = vst [vmem:[%s3097_s6 + $0x90] sm:$0xff] %v1332_v15  ;;  %v1335_v28 = vmax.f32 %v1299_v26, 0.0  ;;  %v1298_v29 = vadd.f32 %v2837_v25, %v1255_v36  ;;  %v1258_v4 = vmax.f32 %v3172_v50, %v1222_v55  ;;  %v1221_v5 = vmax.f32 %v813_v58, %v1094_v61 }
 0x15b   :  { %v1841_v51 = vpop.f32.mrf.mxu0  ;;  %v1927_v0 = vpop.f32.mrf.mxu1  ;;  %v3190_v15 = vmax.f32 %v3188_v35, %v3189_v1 }
 0x15c   :  { %1371 = vst [vmem:[%s3097_s6 + $0xa8] sm:$0xff] %v1335_v28  ;;  %v1334_v14 = vmax.f32 %v1298_v29, 0.0  ;;  %v1301_v31 = vadd.f32 %v2837_v25, %v1258_v4  ;;  %v1257_v7 = vmax.f32 %v3175_v49, %v1221_v5  ;;  %v1224_v8 = vmax.f32 %v1841_v51, %v1927_v0  ;;  %v3191_v28 = vld [vmem:[#allocation14_spill] sm:$0xff]  ;;  %v3192_v29 = vld [vmem:[#allocation15_spill] sm:$0xff] }
 0x15d   :  { %v823_v52 = vpop.f32.mrf.mxu0  ;;  %v1104_v53 = vpop.f32.mrf.mxu1  ;;  %v3193_v50 = vmax.f32 %v3191_v28, %v3192_v29  ;;  %v3196_v49 = vmax.f32 %v3194_v38, %v3195_v39 }
 0x15e   :  { %1370 = vst [vmem:[%s3097_s6 + $0xa0] sm:$0xff] %v1334_v14  ;;  %v1337_v18 = vmax.f32 %v1301_v31, 0.0  ;;  %v1300_v20 = vadd.f32 %v2837_v25, %v1257_v7  ;;  %v1260_v10 = vmax.f32 %v3178_v6, %v1224_v8  ;;  %v1223_v11 = vmax.f32 %v823_v52, %v1104_v53 }
 0x15f   :  { %v1844_v9 = vpop.f32.mrf.mxu0  ;;  %v1930_v41 = vpop.f32.mrf.mxu1  ;;  %v3199_v6 = vmax.f32 %v3197_v54, %v3198_v3 }
 0x160   :  { %1373 = vst [vmem:[%s3097_s6 + $0xb8] sm:$0xff] %v1337_v18  ;;  %v1336_v42 = vmax.f32 %v1300_v20, 0.0  ;;  %v1303_v56 = vadd.f32 %v2837_v25, %v1260_v10  ;;  %v1259_v16 = vmax.f32 %v3181_v17, %v1223_v11  ;;  %v1226_v27 = vmax.f32 %v1844_v9, %v1930_v41 }
 0x161   :  { %v833_v30 = vpop.f32.mrf.mxu0  ;;  %v1114_v43 = vpop.f32.mrf.mxu1  ;;  %v3202_v17 = vmax.f32 %v3200_v57, %v3201_v12 }
 0x162   :  { %1372 = vst [vmem:[%s3097_s6 + $0xb0] sm:$0xff] %v1336_v42  ;;  %v1339_v46 = vmax.f32 %v1303_v56, 0.0  ;;  %v1302_v19 = vadd.f32 %v2837_v25, %v1259_v16  ;;  %v1262_v44 = vmax.f32 %v3184_v60, %v1226_v27  ;;  %v1225_v45 = vmax.f32 %v833_v30, %v1114_v43 }
 0x163   :  { %v1847_v32 = vpop.f32.mrf.mxu0  ;;  %v1933_v21 = vpop.f32.mrf.mxu1  ;;  %v3205_v60 = vmax.f32 %v3203_v13, %v3204_v59 }
 0x164   :  { %1375 = vst [vmem:[%s3097_s6 + $0xc8] sm:$0xff] %v1339_v46  ;;  %v1338_v22 = vmax.f32 %v1302_v19, 0.0  ;;  %v1305_v33 = vadd.f32 %v2837_v25, %v1262_v44  ;;  %v1261_v40 = vmax.f32 %v3187_v63, %v1225_v45  ;;  %v1228_v23 = vmax.f32 %v1847_v32, %v1933_v21 }
 0x165   :  { %v843_v24 = vpop.f32.mrf.mxu0  ;;  %v1124_v34 = vpop.f32.mrf.mxu1  ;;  %v3208_v63 = vmax.f32 %v3206_v37, %v3207_v62 }
 0x166   :  { %1374 = vst [vmem:[%s3097_s6 + $0xc0] sm:$0xff] %v1338_v22  ;;  %v1341_v47 = vmax.f32 %v1305_v33, 0.0  ;;  %v1304_v48 = vadd.f32 %v2837_v25, %v1261_v40  ;;  %v1264_v26 = vmax.f32 %v3190_v15, %v1228_v23  ;;  %v1227_v2 = vmax.f32 %v843_v24, %v1124_v34 }
 0x167   :  { %v1850_v36 = vpop.f32.mrf.mxu0  ;;  %v1936_v55 = vpop.f32.mrf.mxu1 }
 0x168   :  { %1377 = vst [vmem:[%s3097_s6 + $0xd8] sm:$0xff] %v1341_v47  ;;  %v1340_v58 = vmax.f32 %v1304_v48, 0.0  ;;  %v1307_v61 = vadd.f32 %v2837_v25, %v1264_v26  ;;  %v1263_v4 = vmax.f32 %v3193_v50, %v1227_v2  ;;  %v1230_v5 = vmax.f32 %v1850_v36, %v1936_v55  ;;  %v3209_v47 = vld [vmem:[#allocation26_spill] sm:$0xff]  ;;  %v3210_v48 = vld [vmem:[#allocation27_spill] sm:$0xff] }
 0x169   :  { %v853_v51 = vpop.f32.mrf.mxu0  ;;  %v1134_v0 = vpop.f32.mrf.mxu1  ;;  %v3211_v35 = vmax.f32 %v3209_v47, %v3210_v48 }
 0x16a   :  { %1376 = vst [vmem:[%s3097_s6 + $0xd0] sm:$0xff] %v1340_v58  ;;  %v1343_v14 = vmax.f32 %v1307_v61, 0.0  ;;  %v1306_v31 = vadd.f32 %v2837_v25, %v1263_v4  ;;  %v1266_v7 = vmax.f32 %v3196_v49, %v1230_v5  ;;  %v1229_v8 = vmax.f32 %v853_v51, %v1134_v0 }
 0x16b   :  { %v1853_v52 = vpop.f32.mrf.mxu0  ;;  %v1939_v53 = vpop.f32.mrf.mxu1 }
 0x16c   :  { %1379 = vst [vmem:[%s3097_s6 + $0xe8] sm:$0xff] %v1343_v14  ;;  %v1342_v18 = vmax.f32 %v1306_v31, 0.0  ;;  %v1309_v20 = vadd.f32 %v2837_v25, %v1266_v7  ;;  %v1265_v10 = vmax.f32 %v3199_v6, %v1229_v8  ;;  %v1232_v11 = vmax.f32 %v1853_v52, %v1939_v53 }
 0x16d   :  { %v863_v9 = vpop.f32.mrf.mxu0  ;;  %v1144_v41 = vpop.f32.mrf.mxu1 }
 0x16e   :  { %1378 = vst [vmem:[%s3097_s6 + $0xe0] sm:$0xff] %v1342_v18  ;;  %v1345_v42 = vmax.f32 %v1309_v20, 0.0  ;;  %v1308_v56 = vadd.f32 %v2837_v25, %v1265_v10  ;;  %v1268_v16 = vmax.f32 %v3202_v17, %v1232_v11  ;;  %v1231_v27 = vmax.f32 %v863_v9, %v1144_v41 }
 0x16f   :  { %v1856_v30 = vpop.f32.mrf.mxu0  ;;  %v1942_v43 = vpop.f32.mrf.mxu1 }
 0x170   :  { %1381 = vst [vmem:[%s3097_s6 + $0xf8] sm:$0xff] %v1345_v42  ;;  %v1344_v46 = vmax.f32 %v1308_v56, 0.0  ;;  %v1311_v19 = vadd.f32 %v2837_v25, %v1268_v16  ;;  %v1267_v44 = vmax.f32 %v3205_v60, %v1231_v27  ;;  %v1234_v45 = vmax.f32 %v1856_v30, %v1942_v43 }
 0x171   :  { %v873_v32 = vpop.f32.mrf.mxu0  ;;  %v1154_v21 = vpop.f32.mrf.mxu1 }
 0x172   :  { %1380 = vst [vmem:[%s3097_s6 + $0xf0] sm:$0xff] %v1344_v46  ;;  %v1347_v22 = vmax.f32 %v1311_v19, 0.0  ;;  %v1310_v33 = vadd.f32 %v2837_v25, %v1267_v44  ;;  %v1270_v40 = vmax.f32 %v3208_v63, %v1234_v45  ;;  %v1233_v23 = vmax.f32 %v873_v32, %v1154_v21 }
 0x174   :  { %1383 = vst [vmem:[%s3097_s6 + $0x108] sm:$0xff] %v1347_v22  ;;  %v1346_v24 = vmax.f32 %v1310_v33, 0.0  ;;  %v1313_v34 = vadd.f32 %v2837_v25, %v1270_v40  ;;  %v1269_v1 = vmax.f32 %v3211_v35, %v1233_v23 }
 0x176   :  { %1382 = vst [vmem:[%s3097_s6 + $0x100] sm:$0xff] %v1346_v24  ;;  %v1349_v15 = vmax.f32 %v1313_v34, 0.0  ;;  %v1312_v26 = vadd.f32 %v2837_v25, %v1269_v1 }
 0x178   :  { %1385 = vst [vmem:[%s3097_s6 + $0x118] sm:$0xff] %v1349_v15  ;;  %v1348_v2 = vmax.f32 %v1312_v26, 0.0 }
 0x17a   :  { %1384 = vst [vmem:[%s3097_s6 + $0x110] sm:$0xff] %v1348_v2 }

// kernel: digit_forward.7
= control target key start
LH: loop header
LB: loop body
LE: loop exit
PB: predicated region body
PF: predicated region fallthrough
CT: control target
= control target key end

     0   :  { %s555_s1 = inlined_call_operand.vmem [shape: f32[512,128], index: 1, kind: input, shape index: {}]   ;;  %s556_s0 = inlined_call_operand.vmem [shape: f32[8,512], index: 0, kind: input, shape index: {}]   ;;  %s557_s2 = inlined_call_operand.vmem [shape: f32[1,128], index: 2, kind: input, shape index: {}]   ;;  %s558_s3 = inlined_call_operand.vmem [shape: f32[8,128], index: 3, kind: output, shape index: {}]  }
   0x1   :  { %v49_v0 = vld [vmem:[%s555_s1 + $0xf8] sm:$0xff]  ;;  %v48_v4 = vld [vmem:[%s555_s1 + $0xf0] sm:$0xff]  ;;  %v47_v8 = vld [vmem:[%s555_s1 + $0xe8] sm:$0xff] }
   0x2   :  { %v81_v1 = vld [vmem:[%s555_s1 + $0x1f8] sm:$0xff]  ;;  %251 = vmatprep.subr.mxu0 %v49_v0  ;;  %v80_v5 = vld [vmem:[%s555_s1 + $0x1f0] sm:$0xff]  ;;  %v79_v9 = vld [vmem:[%s555_s1 + $0x1e8] sm:$0xff] }
   0x3   :  { %v33_v2 = vld [vmem:[%s555_s1 + $0x78] sm:$0xff]  ;;  %286 = vmatprep.subr.mxu1 %v81_v1  ;;  %v32_v6 = vld [vmem:[%s555_s1 + $0x70] sm:$0xff]  ;;  %v31_v10 = vld [vmem:[%s555_s1 + $0x68] sm:$0xff] }
   0x4   :  { %v65_v3 = vld [vmem:[%s555_s1 + $0x178] sm:$0xff]  ;;  %252 = vmatpush3.msra.mxu0 %v33_v2  ;;  %v64_v7 = vld [vmem:[%s555_s1 + $0x170] sm:$0xff]  ;;  %v63_v11 = vld [vmem:[%s555_s1 + $0x168] sm:$0xff] }
   0x5   :  { %287 = vmatpush3.msra.mxu1 %v65_v3  ;;  %253 = vmatprep.subr.mxu0 %v48_v4  ;;  %v46_v12 = vld [vmem:[%s555_s1 + $0xe0] sm:$0xff]  ;;  %v45_v16 = vld [vmem:[%s555_s1 + $0xd8] sm:$0xff]  ;;  %v44_v20 = vld [vmem:[%s555_s1 + $0xd0] sm:$0xff]  ;;  %v229_v4 = vlaneseq }
   0x6   :  { %288 = vmatprep.subr.mxu1 %v80_v5  ;;  %254 = vmatpush3.msra.mxu0 %v32_v6  ;;  %v78_v13 = vld [vmem:[%s555_s1 + $0x1e0] sm:$0xff]  ;;  %v77_v17 = vld [vmem:[%s555_s1 + $0x1d8] sm:$0xff]  ;;  %v76_v21 = vld [vmem:[%s555_s1 + $0x1d0] sm:$0xff] }
   0x7   :  { %289 = vmatpush3.msra.mxu1 %v64_v7  ;;  %255 = vmatprep.subr.mxu0 %v47_v8  ;;  %v30_v14 = vld [vmem:[%s555_s1 + $0x60] sm:$0xff]  ;;  %v29_v18 = vld [vmem:[%s555_s1 + $0x58] sm:$0xff]  ;;  %v28_v22 = vld [vmem:[%s555_s1 + $0x50] sm:$0xff] }
   0x8   :  { %290 = vmatprep.subr.mxu1 %v79_v9  ;;  %v62_v15 = vld [vmem:[%s555_s1 + $0x160] sm:$0xff]  ;;  %256 = vmatpush3.msra.mxu0 %v31_v10  ;;  %v61_v19 = vld [vmem:[%s555_s1 + $0x158] sm:$0xff]  ;;  %v60_v23 = vld [vmem:[%s555_s1 + $0x150] sm:$0xff]  ;;  %v230_v10 = vand.u32 127, %v229_v4 }
   0x9   :  { %291 = vmatpush3.msra.mxu1 %v63_v11  ;;  %257 = vmatprep.subr.mxu0 %v46_v12  ;;  %v43_v24 = vld [vmem:[%s555_s1 + $0xc8] sm:$0xff]  ;;  %v42_v28 = vld [vmem:[%s555_s1 + $0xc0] sm:$0xff]  ;;  %v41_v32 = vld [vmem:[%s555_s1 + $0xb8] sm:$0xff] }
   0xa   :  { %292 = vmatprep.subr.mxu1 %v78_v13  ;;  %258 = vmatpush3.msra.mxu0 %v30_v14  ;;  %v75_v25 = vld [vmem:[%s555_s1 + $0x1c8] sm:$0xff]  ;;  %v74_v29 = vld [vmem:[%s555_s1 + $0x1c0] sm:$0xff]  ;;  %v73_v33 = vld [vmem:[%s555_s1 + $0x1b8] sm:$0xff]  ;;  %vm231_vm0 = vcmp.lt.s32.totalorder %v230_v10, 10 }
   0xb   :  { %293 = vmatpush3.msra.mxu1 %v62_v15  ;;  %259 = vmatprep.subr.mxu0 %v45_v16  ;;  %v27_v26 = vld [vmem:[%s555_s1 + $0x48] sm:$0xff]  ;;  %v26_v30 = vld [vmem:[%s555_s1 + $0x40] sm:$0xff]  ;;  %v25_v34 = vld [vmem:[%s555_s1 + $0x38] sm:$0xff] }
   0xc   :  { %294 = vmatprep.subr.mxu1 %v77_v17  ;;  %260 = vmatpush3.msra.mxu0 %v29_v18  ;;  %v59_v27 = vld [vmem:[%s555_s1 + $0x148] sm:$0xff]  ;;  %v58_v31 = vld [vmem:[%s555_s1 + $0x140] sm:$0xff]  ;;  %v57_v35 = vld [vmem:[%s555_s1 + $0x138] sm:$0xff] }
   0xd   :  { %295 = vmatpush3.msra.mxu1 %v61_v19  ;;  %261 = vmatprep.subr.mxu0 %v44_v20  ;;  %v40_v36 = vld [vmem:[%s555_s1 + $0xb0] sm:$0xff]  ;;  %v39_v40 = vld [vmem:[%s555_s1 + $0xa8] sm:$0xff]  ;;  %v38_v44 = vld [vmem:[%s555_s1 + $0xa0] sm:$0xff] }
   0xe   :  { %296 = vmatprep.subr.mxu1 %v76_v21  ;;  %262 = vmatpush3.msra.mxu0 %v28_v22  ;;  %v72_v37 = vld [vmem:[%s555_s1 + $0x1b0] sm:$0xff]  ;;  %v71_v41 = vld [vmem:[%s555_s1 + $0x1a8] sm:$0xff]  ;;  %v70_v45 = vld [vmem:[%s555_s1 + $0x1a0] sm:$0xff] }
   0xf   :  { %297 = vmatpush3.msra.mxu1 %v60_v23  ;;  %263 = vmatprep.subr.mxu0 %v43_v24  ;;  %v24_v38 = vld [vmem:[%s555_s1 + $0x30] sm:$0xff]  ;;  %v23_v42 = vld [vmem:[%s555_s1 + $0x28] sm:$0xff]  ;;  %v22_v46 = vld [vmem:[%s555_s1 + $0x20] sm:$0xff] }
  0x10   :  { %298 = vmatprep.subr.mxu1 %v75_v25  ;;  %264 = vmatpush3.msra.mxu0 %v27_v26  ;;  %v56_v39 = vld [vmem:[%s555_s1 + $0x130] sm:$0xff]  ;;  %v55_v43 = vld [vmem:[%s555_s1 + $0x128] sm:$0xff]  ;;  %v54_v47 = vld [vmem:[%s555_s1 + $0x120] sm:$0xff] }
  0x11   :  { %299 = vmatpush3.msra.mxu1 %v59_v27  ;;  %265 = vmatprep.subr.mxu0 %v42_v28  ;;  %v37_v48 = vld [vmem:[%s555_s1 + $0x98] sm:$0xff]  ;;  %v36_v52 = vld [vmem:[%s555_s1 + $0x90] sm:$0xff]  ;;  %v35_v56 = vld [vmem:[%s555_s1 + $0x88] sm:$0xff] }
  0x12   :  { %300 = vmatprep.subr.mxu1 %v74_v29  ;;  %266 = vmatpush3.msra.mxu0 %v26_v30  ;;  %v69_v49 = vld [vmem:[%s555_s1 + $0x198] sm:$0xff]  ;;  %v68_v53 = vld [vmem:[%s555_s1 + $0x190] sm:$0xff]  ;;  %v67_v57 = vld [vmem:[%s555_s1 + $0x188] sm:$0xff] }
  0x13   :  { %301 = vmatpush3.msra.mxu1 %v58_v31  ;;  %267 = vmatprep.subr.mxu0 %v41_v32  ;;  %v21_v50 = vld [vmem:[%s555_s1 + $0x18] sm:$0xff]  ;;  %v20_v54 = vld [vmem:[%s555_s1 + $0x10] sm:$0xff]  ;;  %v19_v58 = vld [vmem:[%s555_s1 + $0x8] sm:$0xff] }
  0x14   :  { %302 = vmatprep.subr.mxu1 %v73_v33  ;;  %268 = vmatpush3.msra.mxu0 %v25_v34  ;;  %v53_v51 = vld [vmem:[%s555_s1 + $0x118] sm:$0xff]  ;;  %v52_v55 = vld [vmem:[%s555_s1 + $0x110] sm:$0xff]  ;;  %v51_v59 = vld [vmem:[%s555_s1 + $0x108] sm:$0xff] }
  0x15   :  { %303 = vmatpush3.msra.mxu1 %v57_v35  ;;  %269 = vmatprep.subr.mxu0 %v40_v36  ;;  %v34_v60 = vld [vmem:[%s555_s1 + $0x80] sm:$0xff]  ;;  %v15_v63 = vld [vmem:[%s556_s0 + $0x8] sm:$0xff]  ;;  %v17_v1 = vld [vmem:[%s556_s0 + $0x18] sm:$0xff] }
  0x16   :  { %304 = vmatprep.subr.mxu1 %v72_v37  ;;  %270 = vmatpush3.msra.mxu0 %v24_v38  ;;  %v66_v61 = vld [vmem:[%s555_s1 + $0x180] sm:$0xff]  ;;  %v16_v3 = vld [vmem:[%s556_s0 + $0x10] sm:$0xff] }
  0x17   :  { %305 = vmatpush3.msra.mxu1 %v56_v39  ;;  %271 = vmatprep.subr.mxu0 %v39_v40  ;;  %v18_v62 = vld [vmem:[%s555_s1] sm:$0xff] }
  0x18   :  { %306 = vmatprep.subr.mxu1 %v71_v41  ;;  %272 = vmatpush3.msra.mxu0 %v23_v42  ;;  %v50_v0 = vld [vmem:[%s555_s1 + $0x100] sm:$0xff] }
  0x19   :  { %307 = vmatpush3.msra.mxu1 %v55_v43  ;;  %273 = vmatprep.subr.mxu0 %v38_v44  ;;  %v14_v2 = vld [vmem:[%s556_s0] sm:$0xff] }
  0x1a   :  { %308 = vmatprep.subr.mxu1 %v70_v45  ;;  %274 = vmatpush3.msra.mxu0 %v22_v46  ;;  %v250_v7 = vld [vmem:[%s557_s2] ss:$0 sm:$0xff] }
  0x1b   :  { %309 = vmatpush3.msra.mxu1 %v54_v47  ;;  %275 = vmatprep.subr.mxu0 %v37_v48 }
  0x1c   :  { %310 = vmatprep.subr.mxu1 %v69_v49  ;;  %276 = vmatpush3.msra.mxu0 %v21_v50 }
  0x1d   :  { %311 = vmatpush3.msra.mxu1 %v53_v51  ;;  %277 = vmatprep.subr.mxu0 %v36_v52 }
  0x1e   :  { %312 = vmatprep.subr.mxu1 %v68_v53  ;;  %278 = vmatpush3.msra.mxu0 %v20_v54 }
  0x1f   :  { %313 = vmatpush3.msra.mxu1 %v52_v55  ;;  %279 = vmatprep.subr.mxu0 %v35_v56 }
  0x20   :  { %314 = vmatprep.subr.mxu1 %v67_v57  ;;  %280 = vmatpush3.msra.mxu0 %v19_v58 }
  0x21   :  { %315 = vmatpush3.msra.mxu1 %v51_v59  ;;  %281 = vmatprep.subr.mxu0 %v34_v60 }
  0x22   :  { %316 = vmatprep.subr.mxu1 %v66_v61  ;;  %282 = vmatpush3.msra.mxu0 %v18_v62 }
  0x23   :  { %153 = vmatprep.mubr.f32.mxu0 %v15_v63  ;;  %317 = vmatpush3.msra.mxu1 %v50_v0 }
  0x24   :  { %223 = vmatprep.mubr.f32.mxu1 %v17_v1  ;;  %154 = vmatmul.mubr.f32.vlgmr.msra.gmra.mxu0 %v14_v2 }
  0x25   :  { %224 = vmatmul.mubr.f32.vlgmr.msra.gmra.mxu1 %v16_v3 }
  0xe4   :  { %v283_v5 = vpop.f32.mrf.mxu0 }
  0xe5   :  { %v318_v6 = vpop.f32.mrf.mxu1 }
  0xe6   :  { %v284_v8 = vpop.f32.mrf.mxu0 }
  0xe7   :  { %v319_v9 = vpop.f32.mrf.mxu1  ;;  %v285_v11 = vadd.f32 %v284_v8, %v283_v5 }
  0xe8   :  { %v320_v13 = vadd.f32 %v319_v9, %v318_v6 }
  0xe9   :  { %v156_v12 = vadd.f32 %v285_v11, %v250_v7 }
  0xeb   :  { %v226_v14 = vadd.f32 %v320_v13, %v156_v12 }
  0xed   :  { %v232_v15 = vsel %vm231_vm0, %v226_v14, -inf }
  0xee   :  { %233 = vmax.xlane.f32.xlu0 %v232_v15 }
 0x177   :  { %v234_v16 = vpop.xlane.xlu0 %233 }
 0x178   :  { %v235_v17 = vsub.f32 %v232_v15, %v234_v16 }
 0x17a   :  { %v236_v18 = vmul.f32 1.442695, %v235_v17 }
 0x17c   :  { %321 = vpow2.f32 %v236_v18 }
 0x189   :  { %v322_v19 = vpop.eup %321 }
 0x18a   :  { %v238_v20 = vsel %vm231_vm0, %v322_v19, 0.0 }
 0x18b   :  { %239 = vadd.xlane.f32.xlu0 %v238_v20 }
 0x214   :  { %v240_v21 = vpop.xlane.xlu0 %239 }
 0x215   :  { %323 = vlog2.f32 %v240_v21 }
 0x222   :  { %v324_v22 = vpop.eup %323 }
 0x223   :  { %v242_v23 = vmul.f32 0.6931472, %v324_v22 }
 0x225   :  { %v243_v24 = vadd.f32 %v242_v23, %v234_v16 }
 0x227   :  { %v244_v25 = vsub.f32 %v226_v14, %v243_v24 }
 0x229   :  { %245 = vst [vmem:[%s558_s3] sm:$0xff] %v244_v25 }

// kernel: digit_forward.6
= control target key start
LH: loop header
LB: loop body
LE: loop exit
PB: predicated region body
PF: predicated region fallthrough
CT: control target
= control target key end

     0   :  { %s5455_s1 = inlined_call_operand.vmem [shape: f32[2048,512], index: 1, kind: input, shape index: {}]   ;;  %s5456_s0 = inlined_call_operand.vmem [shape: f32[8,2048], index: 0, kind: input, shape index: {}]   ;;  %s5457_s2 = inlined_call_operand.vmem [shape: f32[1,512], index: 2, kind: input, shape index: {}]   ;;  %s5458_s3 = inlined_call_operand.vmem [shape: f32[8,512], index: 3, kind: output, shape index: {}]  }
   0x1   :  { %v91_v0 = vld [vmem:[%s5455_s1 + $0x1e8] sm:$0xff]  ;;  %v90_v2 = vld [vmem:[%s5455_s1 + $0x1e0] sm:$0xff] }
   0x2   :  { %v219_v1 = vld [vmem:[%s5455_s1 + $0x5e8] sm:$0xff]  ;;  %1076 = vmatprep.subr.mxu0 %v91_v0  ;;  %v218_v3 = vld [vmem:[%s5455_s1 + $0x5e0] sm:$0xff] }
   0x3   :  { %1147 = vmatprep.subr.mxu1 %v219_v1  ;;  %v87_v4 = vld [vmem:[%s5455_s1 + $0x1c8] sm:$0xff]  ;;  %1077 = vmatpush1.msra.mxu0 %v90_v2  ;;  %v86_v6 = vld [vmem:[%s5455_s1 + $0x1c0] sm:$0xff] }
   0x4   :  { %v215_v5 = vld [vmem:[%s5455_s1 + $0x5c8] sm:$0xff]  ;;  %1148 = vmatpush1.msra.mxu1 %v218_v3  ;;  %v214_v7 = vld [vmem:[%s5455_s1 + $0x5c0] sm:$0xff]  ;;  %1078 = vmatprep.subr.mxu0 %v87_v4 }
   0x5   :  { %v83_v8 = vld [vmem:[%s5455_s1 + $0x1a8] sm:$0xff]  ;;  %1149 = vmatprep.subr.mxu1 %v215_v5  ;;  %v82_v10 = vld [vmem:[%s5455_s1 + $0x1a0] sm:$0xff]  ;;  %1079 = vmatpush1.msra.mxu0 %v86_v6 }
   0x6   :  { %v211_v9 = vld [vmem:[%s5455_s1 + $0x5a8] sm:$0xff]  ;;  %v210_v11 = vld [vmem:[%s5455_s1 + $0x5a0] sm:$0xff]  ;;  %1150 = vmatpush1.msra.mxu1 %v214_v7  ;;  %1080 = vmatprep.subr.mxu0 %v83_v8 }
   0x7   :  { %v79_v12 = vld [vmem:[%s5455_s1 + $0x188] sm:$0xff]  ;;  %1151 = vmatprep.subr.mxu1 %v211_v9  ;;  %v78_v14 = vld [vmem:[%s5455_s1 + $0x180] sm:$0xff]  ;;  %1081 = vmatpush1.msra.mxu0 %v82_v10 }
   0x8   :  { %v207_v13 = vld [vmem:[%s5455_s1 + $0x588] sm:$0xff]  ;;  %v206_v15 = vld [vmem:[%s5455_s1 + $0x580] sm:$0xff]  ;;  %1152 = vmatpush1.msra.mxu1 %v210_v11  ;;  %1082 = vmatprep.subr.mxu0 %v79_v12 }
   0x9   :  { %v75_v16 = vld [vmem:[%s5455_s1 + $0x168] sm:$0xff]  ;;  %1153 = vmatprep.subr.mxu1 %v207_v13  ;;  %v74_v18 = vld [vmem:[%s5455_s1 + $0x160] sm:$0xff]  ;;  %1083 = vmatpush1.msra.mxu0 %v78_v14 }
   0xa   :  { %v203_v17 = vld [vmem:[%s5455_s1 + $0x568] sm:$0xff]  ;;  %v202_v19 = vld [vmem:[%s5455_s1 + $0x560] sm:$0xff]  ;;  %1154 = vmatpush1.msra.mxu1 %v206_v15  ;;  %1084 = vmatprep.subr.mxu0 %v75_v16 }
   0xb   :  { %v71_v20 = vld [vmem:[%s5455_s1 + $0x148] sm:$0xff]  ;;  %1155 = vmatprep.subr.mxu1 %v203_v17  ;;  %v70_v22 = vld [vmem:[%s5455_s1 + $0x140] sm:$0xff]  ;;  %1085 = vmatpush1.msra.mxu0 %v74_v18 }
   0xc   :  { %v199_v21 = vld [vmem:[%s5455_s1 + $0x548] sm:$0xff]  ;;  %v198_v23 = vld [vmem:[%s5455_s1 + $0x540] sm:$0xff]  ;;  %1156 = vmatpush1.msra.mxu1 %v202_v19  ;;  %1086 = vmatprep.subr.mxu0 %v71_v20 }
   0xd   :  { %v67_v24 = vld [vmem:[%s5455_s1 + $0x128] sm:$0xff]  ;;  %1157 = vmatprep.subr.mxu1 %v199_v21  ;;  %v66_v26 = vld [vmem:[%s5455_s1 + $0x120] sm:$0xff]  ;;  %1087 = vmatpush1.msra.mxu0 %v70_v22 }
   0xe   :  { %v195_v25 = vld [vmem:[%s5455_s1 + $0x528] sm:$0xff]  ;;  %v194_v27 = vld [vmem:[%s5455_s1 + $0x520] sm:$0xff]  ;;  %1158 = vmatpush1.msra.mxu1 %v198_v23  ;;  %1088 = vmatprep.subr.mxu0 %v67_v24 }
   0xf   :  { %v63_v28 = vld [vmem:[%s5455_s1 + $0x108] sm:$0xff]  ;;  %1159 = vmatprep.subr.mxu1 %v195_v25  ;;  %v62_v30 = vld [vmem:[%s5455_s1 + $0x100] sm:$0xff]  ;;  %1089 = vmatpush1.msra.mxu0 %v66_v26 }
  0x10   :  { %v191_v29 = vld [vmem:[%s5455_s1 + $0x508] sm:$0xff]  ;;  %v190_v31 = vld [vmem:[%s5455_s1 + $0x500] sm:$0xff]  ;;  %1160 = vmatpush1.msra.mxu1 %v194_v27  ;;  %1090 = vmatprep.subr.mxu0 %v63_v28 }
  0x11   :  { %v59_v32 = vld [vmem:[%s5455_s1 + $0xe8] sm:$0xff]  ;;  %1161 = vmatprep.subr.mxu1 %v191_v29  ;;  %v58_v34 = vld [vmem:[%s5455_s1 + $0xe0] sm:$0xff]  ;;  %1091 = vmatpush1.msra.mxu0 %v62_v30 }
  0x12   :  { %v187_v33 = vld [vmem:[%s5455_s1 + $0x4e8] sm:$0xff]  ;;  %v186_v35 = vld [vmem:[%s5455_s1 + $0x4e0] sm:$0xff]  ;;  %1162 = vmatpush1.msra.mxu1 %v190_v31  ;;  %1092 = vmatprep.subr.mxu0 %v59_v32 }
  0x13   :  { %v55_v36 = vld [vmem:[%s5455_s1 + $0xc8] sm:$0xff]  ;;  %1163 = vmatprep.subr.mxu1 %v187_v33  ;;  %v54_v38 = vld [vmem:[%s5455_s1 + $0xc0] sm:$0xff]  ;;  %1093 = vmatpush1.msra.mxu0 %v58_v34 }
  0x14   :  { %v183_v37 = vld [vmem:[%s5455_s1 + $0x4c8] sm:$0xff]  ;;  %v182_v39 = vld [vmem:[%s5455_s1 + $0x4c0] sm:$0xff]  ;;  %1164 = vmatpush1.msra.mxu1 %v186_v35  ;;  %1094 = vmatprep.subr.mxu0 %v55_v36 }
  0x15   :  { %v51_v40 = vld [vmem:[%s5455_s1 + $0xa8] sm:$0xff]  ;;  %1165 = vmatprep.subr.mxu1 %v183_v37  ;;  %v50_v42 = vld [vmem:[%s5455_s1 + $0xa0] sm:$0xff]  ;;  %1095 = vmatpush1.msra.mxu0 %v54_v38 }
  0x16   :  { %v179_v41 = vld [vmem:[%s5455_s1 + $0x4a8] sm:$0xff]  ;;  %v178_v43 = vld [vmem:[%s5455_s1 + $0x4a0] sm:$0xff]  ;;  %1166 = vmatpush1.msra.mxu1 %v182_v39  ;;  %1096 = vmatprep.subr.mxu0 %v51_v40 }
  0x17   :  { %v47_v44 = vld [vmem:[%s5455_s1 + $0x88] sm:$0xff]  ;;  %1167 = vmatprep.subr.mxu1 %v179_v41  ;;  %v46_v46 = vld [vmem:[%s5455_s1 + $0x80] sm:$0xff]  ;;  %1097 = vmatpush1.msra.mxu0 %v50_v42 }
  0x18   :  { %v175_v45 = vld [vmem:[%s5455_s1 + $0x488] sm:$0xff]  ;;  %v174_v47 = vld [vmem:[%s5455_s1 + $0x480] sm:$0xff]  ;;  %1168 = vmatpush1.msra.mxu1 %v178_v43  ;;  %1098 = vmatprep.subr.mxu0 %v47_v44 }
  0x19   :  { %v43_v48 = vld [vmem:[%s5455_s1 + $0x68] sm:$0xff]  ;;  %1169 = vmatprep.subr.mxu1 %v175_v45  ;;  %v42_v50 = vld [vmem:[%s5455_s1 + $0x60] sm:$0xff]  ;;  %1099 = vmatpush1.msra.mxu0 %v46_v46 }
  0x1a   :  { %v171_v49 = vld [vmem:[%s5455_s1 + $0x468] sm:$0xff]  ;;  %v170_v51 = vld [vmem:[%s5455_s1 + $0x460] sm:$0xff]  ;;  %1170 = vmatpush1.msra.mxu1 %v174_v47  ;;  %1100 = vmatprep.subr.mxu0 %v43_v48 }
  0x1b   :  { %v39_v52 = vld [vmem:[%s5455_s1 + $0x48] sm:$0xff]  ;;  %1171 = vmatprep.subr.mxu1 %v171_v49  ;;  %v38_v54 = vld [vmem:[%s5455_s1 + $0x40] sm:$0xff]  ;;  %1101 = vmatpush1.msra.mxu0 %v42_v50 }
  0x1c   :  { %v167_v53 = vld [vmem:[%s5455_s1 + $0x448] sm:$0xff]  ;;  %v166_v55 = vld [vmem:[%s5455_s1 + $0x440] sm:$0xff]  ;;  %1172 = vmatpush1.msra.mxu1 %v170_v51  ;;  %1102 = vmatprep.subr.mxu0 %v39_v52 }
  0x1d   :  { %v35_v56 = vld [vmem:[%s5455_s1 + $0x28] sm:$0xff]  ;;  %1173 = vmatprep.subr.mxu1 %v167_v53  ;;  %v34_v58 = vld [vmem:[%s5455_s1 + $0x20] sm:$0xff]  ;;  %1103 = vmatpush1.msra.mxu0 %v38_v54 }
  0x1e   :  { %v163_v57 = vld [vmem:[%s5455_s1 + $0x428] sm:$0xff]  ;;  %v162_v59 = vld [vmem:[%s5455_s1 + $0x420] sm:$0xff]  ;;  %1174 = vmatpush1.msra.mxu1 %v166_v55  ;;  %1104 = vmatprep.subr.mxu0 %v35_v56 }
  0x1f   :  { %v31_v60 = vld [vmem:[%s5455_s1 + $0x8] sm:$0xff]  ;;  %1175 = vmatprep.subr.mxu1 %v163_v57  ;;  %v30_v62 = vld [vmem:[%s5455_s1] sm:$0xff]  ;;  %1105 = vmatpush1.msra.mxu0 %v34_v58 }
  0x20   :  { %v159_v61 = vld [vmem:[%s5455_s1 + $0x408] sm:$0xff]  ;;  %v158_v63 = vld [vmem:[%s5455_s1 + $0x400] sm:$0xff]  ;;  %1176 = vmatpush1.msra.mxu1 %v162_v59  ;;  %1106 = vmatprep.subr.mxu0 %v31_v60 }
  0x21   :  { %v155_v0 = vld [vmem:[%s5455_s1 + $0x3e8] sm:$0xff]  ;;  %1177 = vmatprep.subr.mxu1 %v159_v61  ;;  %v154_v2 = vld [vmem:[%s5455_s1 + $0x3e0] sm:$0xff]  ;;  %1107 = vmatpush1.msra.mxu0 %v30_v62 }
  0x22   :  { %v283_v1 = vld [vmem:[%s5455_s1 + $0x7e8] sm:$0xff]  ;;  %v282_v3 = vld [vmem:[%s5455_s1 + $0x7e0] sm:$0xff]  ;;  %1178 = vmatpush1.msra.mxu1 %v158_v63  ;;  %1108 = vmatprep.subr.mxu0 %v155_v0 }
  0x23   :  { %v151_v4 = vld [vmem:[%s5455_s1 + $0x3c8] sm:$0xff]  ;;  %1179 = vmatprep.subr.mxu1 %v283_v1  ;;  %v150_v6 = vld [vmem:[%s5455_s1 + $0x3c0] sm:$0xff]  ;;  %1109 = vmatpush2.msra.mxu0 %v154_v2  ;;  %v17_v2 = vld [vmem:[%s5456_s0 + $0x18] sm:$0xff] }
  0x24   :  { %v279_v5 = vld [vmem:[%s5455_s1 + $0x7c8] sm:$0xff]  ;;  %v278_v7 = vld [vmem:[%s5455_s1 + $0x7c0] sm:$0xff]  ;;  %1180 = vmatpush2.msra.mxu1 %v282_v3  ;;  %1110 = vmatprep.subr.mxu0 %v151_v4 }
  0x25   :  { %v147_v8 = vld [vmem:[%s5455_s1 + $0x3a8] sm:$0xff]  ;;  %1181 = vmatprep.subr.mxu1 %v279_v5  ;;  %v146_v10 = vld [vmem:[%s5455_s1 + $0x3a0] sm:$0xff]  ;;  %1111 = vmatpush2.msra.mxu0 %v150_v6  ;;  %v16_v5 = vld [vmem:[%s5456_s0 + $0x10] sm:$0xff] }
  0x26   :  { %v275_v9 = vld [vmem:[%s5455_s1 + $0x7a8] sm:$0xff]  ;;  %v274_v11 = vld [vmem:[%s5455_s1 + $0x7a0] sm:$0xff]  ;;  %1182 = vmatpush2.msra.mxu1 %v278_v7  ;;  %1112 = vmatprep.subr.mxu0 %v147_v8 }
  0x27   :  { %v143_v12 = vld [vmem:[%s5455_s1 + $0x388] sm:$0xff]  ;;  %1183 = vmatprep.subr.mxu1 %v275_v9  ;;  %v142_v14 = vld [vmem:[%s5455_s1 + $0x380] sm:$0xff]  ;;  %1113 = vmatpush2.msra.mxu0 %v146_v10 }
  0x28   :  { %v271_v13 = vld [vmem:[%s5455_s1 + $0x788] sm:$0xff]  ;;  %v270_v15 = vld [vmem:[%s5455_s1 + $0x780] sm:$0xff]  ;;  %1184 = vmatpush2.msra.mxu1 %v274_v11  ;;  %1114 = vmatprep.subr.mxu0 %v143_v12 }
  0x29   :  { %v139_v16 = vld [vmem:[%s5455_s1 + $0x368] sm:$0xff]  ;;  %1185 = vmatprep.subr.mxu1 %v271_v13  ;;  %v138_v18 = vld [vmem:[%s5455_s1 + $0x360] sm:$0xff]  ;;  %1115 = vmatpush2.msra.mxu0 %v142_v14 }
  0x2a   :  { %v267_v17 = vld [vmem:[%s5455_s1 + $0x768] sm:$0xff]  ;;  %v266_v19 = vld [vmem:[%s5455_s1 + $0x760] sm:$0xff]  ;;  %1186 = vmatpush2.msra.mxu1 %v270_v15  ;;  %1116 = vmatprep.subr.mxu0 %v139_v16 }
  0x2b   :  { %v135_v20 = vld [vmem:[%s5455_s1 + $0x348] sm:$0xff]  ;;  %1187 = vmatprep.subr.mxu1 %v267_v17  ;;  %v134_v22 = vld [vmem:[%s5455_s1 + $0x340] sm:$0xff]  ;;  %1117 = vmatpush2.msra.mxu0 %v138_v18 }
  0x2c   :  { %v263_v21 = vld [vmem:[%s5455_s1 + $0x748] sm:$0xff]  ;;  %v262_v23 = vld [vmem:[%s5455_s1 + $0x740] sm:$0xff]  ;;  %1188 = vmatpush2.msra.mxu1 %v266_v19  ;;  %1118 = vmatprep.subr.mxu0 %v135_v20 }
  0x2d   :  { %v131_v24 = vld [vmem:[%s5455_s1 + $0x328] sm:$0xff]  ;;  %1189 = vmatprep.subr.mxu1 %v263_v21  ;;  %v130_v26 = vld [vmem:[%s5455_s1 + $0x320] sm:$0xff]  ;;  %1119 = vmatpush2.msra.mxu0 %v134_v22 }
  0x2e   :  { %v259_v25 = vld [vmem:[%s5455_s1 + $0x728] sm:$0xff]  ;;  %v258_v27 = vld [vmem:[%s5455_s1 + $0x720] sm:$0xff]  ;;  %1190 = vmatpush2.msra.mxu1 %v262_v23  ;;  %1120 = vmatprep.subr.mxu0 %v131_v24 }
  0x2f   :  { %v127_v28 = vld [vmem:[%s5455_s1 + $0x308] sm:$0xff]  ;;  %1191 = vmatprep.subr.mxu1 %v259_v25  ;;  %v126_v30 = vld [vmem:[%s5455_s1 + $0x300] sm:$0xff]  ;;  %1121 = vmatpush2.msra.mxu0 %v130_v26 }
  0x30   :  { %v255_v29 = vld [vmem:[%s5455_s1 + $0x708] sm:$0xff]  ;;  %v254_v31 = vld [vmem:[%s5455_s1 + $0x700] sm:$0xff]  ;;  %1192 = vmatpush2.msra.mxu1 %v258_v27  ;;  %1122 = vmatprep.subr.mxu0 %v127_v28 }
  0x31   :  { %v123_v32 = vld [vmem:[%s5455_s1 + $0x2e8] sm:$0xff]  ;;  %1193 = vmatprep.subr.mxu1 %v255_v29  ;;  %v122_v34 = vld [vmem:[%s5455_s1 + $0x2e0] sm:$0xff]  ;;  %1123 = vmatpush2.msra.mxu0 %v126_v30 }
  0x32   :  { %v251_v33 = vld [vmem:[%s5455_s1 + $0x6e8] sm:$0xff]  ;;  %v250_v35 = vld [vmem:[%s5455_s1 + $0x6e0] sm:$0xff]  ;;  %1194 = vmatpush2.msra.mxu1 %v254_v31  ;;  %1124 = vmatprep.subr.mxu0 %v123_v32 }
  0x33   :  { %v119_v36 = vld [vmem:[%s5455_s1 + $0x2c8] sm:$0xff]  ;;  %1195 = vmatprep.subr.mxu1 %v251_v33  ;;  %v118_v38 = vld [vmem:[%s5455_s1 + $0x2c0] sm:$0xff]  ;;  %1125 = vmatpush2.msra.mxu0 %v122_v34 }
  0x34   :  { %v247_v37 = vld [vmem:[%s5455_s1 + $0x6c8] sm:$0xff]  ;;  %v246_v39 = vld [vmem:[%s5455_s1 + $0x6c0] sm:$0xff]  ;;  %1196 = vmatpush2.msra.mxu1 %v250_v35  ;;  %1126 = vmatprep.subr.mxu0 %v119_v36 }
  0x35   :  { %v115_v40 = vld [vmem:[%s5455_s1 + $0x2a8] sm:$0xff]  ;;  %1197 = vmatprep.subr.mxu1 %v247_v37  ;;  %v114_v42 = vld [vmem:[%s5455_s1 + $0x2a0] sm:$0xff]  ;;  %1127 = vmatpush2.msra.mxu0 %v118_v38 }
  0x36   :  { %v243_v41 = vld [vmem:[%s5455_s1 + $0x6a8] sm:$0xff]  ;;  %v242_v43 = vld [vmem:[%s5455_s1 + $0x6a0] sm:$0xff]  ;;  %1198 = vmatpush2.msra.mxu1 %v246_v39  ;;  %1128 = vmatprep.subr.mxu0 %v115_v40 }
  0x37   :  { %v111_v44 = vld [vmem:[%s5455_s1 + $0x288] sm:$0xff]  ;;  %1199 = vmatprep.subr.mxu1 %v243_v41  ;;  %v110_v46 = vld [vmem:[%s5455_s1 + $0x280] sm:$0xff]  ;;  %1129 = vmatpush2.msra.mxu0 %v114_v42 }
  0x38   :  { %v239_v45 = vld [vmem:[%s5455_s1 + $0x688] sm:$0xff]  ;;  %v238_v47 = vld [vmem:[%s5455_s1 + $0x680] sm:$0xff]  ;;  %1200 = vmatpush2.msra.mxu1 %v242_v43  ;;  %1130 = vmatprep.subr.mxu0 %v111_v44 }
  0x39   :  { %v107_v48 = vld [vmem:[%s5455_s1 + $0x268] sm:$0xff]  ;;  %1201 = vmatprep.subr.mxu1 %v239_v45  ;;  %v106_v50 = vld [vmem:[%s5455_s1 + $0x260] sm:$0xff]  ;;  %1131 = vmatpush2.msra.mxu0 %v110_v46 }
  0x3a   :  { %v235_v49 = vld [vmem:[%s5455_s1 + $0x668] sm:$0xff]  ;;  %v234_v51 = vld [vmem:[%s5455_s1 + $0x660] sm:$0xff]  ;;  %1202 = vmatpush2.msra.mxu1 %v238_v47  ;;  %1132 = vmatprep.subr.mxu0 %v107_v48 }
  0x3b   :  { %v103_v52 = vld [vmem:[%s5455_s1 + $0x248] sm:$0xff]  ;;  %1203 = vmatprep.subr.mxu1 %v235_v49  ;;  %v102_v54 = vld [vmem:[%s5455_s1 + $0x240] sm:$0xff]  ;;  %1133 = vmatpush2.msra.mxu0 %v106_v50 }
  0x3c   :  { %v231_v53 = vld [vmem:[%s5455_s1 + $0x648] sm:$0xff]  ;;  %v230_v55 = vld [vmem:[%s5455_s1 + $0x640] sm:$0xff]  ;;  %1204 = vmatpush2.msra.mxu1 %v234_v51  ;;  %1134 = vmatprep.subr.mxu0 %v103_v52 }
  0x3d   :  { %v99_v56 = vld [vmem:[%s5455_s1 + $0x228] sm:$0xff]  ;;  %1205 = vmatprep.subr.mxu1 %v231_v53  ;;  %v98_v58 = vld [vmem:[%s5455_s1 + $0x220] sm:$0xff]  ;;  %1135 = vmatpush2.msra.mxu0 %v102_v54 }
  0x3e   :  { %v227_v57 = vld [vmem:[%s5455_s1 + $0x628] sm:$0xff]  ;;  %v226_v59 = vld [vmem:[%s5455_s1 + $0x620] sm:$0xff]  ;;  %1206 = vmatpush2.msra.mxu1 %v230_v55  ;;  %1136 = vmatprep.subr.mxu0 %v99_v56 }
  0x3f   :  { %v95_v60 = vld [vmem:[%s5455_s1 + $0x208] sm:$0xff]  ;;  %1207 = vmatprep.subr.mxu1 %v227_v57  ;;  %v94_v62 = vld [vmem:[%s5455_s1 + $0x200] sm:$0xff]  ;;  %1137 = vmatpush2.msra.mxu0 %v98_v58 }
  0x40   :  { %v223_v61 = vld [vmem:[%s5455_s1 + $0x608] sm:$0xff]  ;;  %1208 = vmatpush2.msra.mxu1 %v226_v59  ;;  %v222_v0 = vld [vmem:[%s5455_s1 + $0x600] sm:$0xff]  ;;  %1138 = vmatprep.subr.mxu0 %v95_v60 }
  0x41   :  { %v15_v63 = vld [vmem:[%s5456_s0 + $0x8] sm:$0xff]  ;;  %v14_v1 = vld [vmem:[%s5456_s0] sm:$0xff]  ;;  %1209 = vmatprep.subr.mxu1 %v223_v61  ;;  %1139 = vmatpush2.msra.mxu0 %v94_v62 }
  0x42   :  { %v347_v3 = vld [vmem:[%s5455_s1 + $0x9e8] sm:$0xff]  ;;  %1140 = vmatprep.mubr.f32.mxu0 %v15_v63  ;;  %1210 = vmatpush2.msra.mxu1 %v222_v0  ;;  %v346_v6 = vld [vmem:[%s5455_s1 + $0x9e0] sm:$0xff] }
  0x43   :  { %v475_v4 = vld [vmem:[%s5455_s1 + $0xde8] sm:$0xff]  ;;  %1141 = vmatmul.mubr.f32.vlgmr.msra.gmra.mxu0 %v14_v1  ;;  %v474_v7 = vld [vmem:[%s5455_s1 + $0xde0] sm:$0xff]  ;;  %1211 = vmatprep.mubr.f32.mxu1 %v17_v2 }
  0x44   :  { %1218 = vmatprep.subr.mxu0 %v347_v3  ;;  %v343_v8 = vld [vmem:[%s5455_s1 + $0x9c8] sm:$0xff]  ;;  %1289 = vmatprep.subr.mxu1 %v475_v4  ;;  %v342_v10 = vld [vmem:[%s5455_s1 + $0x9c0] sm:$0xff] }
  0x45   :  { %v471_v9 = vld [vmem:[%s5455_s1 + $0xdc8] sm:$0xff]  ;;  %1212 = vmatmul.mubr.f32.vlgmr.msra.gmra.mxu1 %v16_v5  ;;  %v470_v11 = vld [vmem:[%s5455_s1 + $0xdc0] sm:$0xff]  ;;  %1219 = vmatpush1.msra.mxu0 %v346_v6 }
  0x46   :  { %1290 = vmatpush1.msra.mxu1 %v474_v7  ;;  %v339_v12 = vld [vmem:[%s5455_s1 + $0x9a8] sm:$0xff]  ;;  %1220 = vmatprep.subr.mxu0 %v343_v8  ;;  %v338_v14 = vld [vmem:[%s5455_s1 + $0x9a0] sm:$0xff] }
  0x47   :  { %v467_v13 = vld [vmem:[%s5455_s1 + $0xda8] sm:$0xff]  ;;  %1291 = vmatprep.subr.mxu1 %v471_v9  ;;  %v466_v15 = vld [vmem:[%s5455_s1 + $0xda0] sm:$0xff]  ;;  %1221 = vmatpush1.msra.mxu0 %v342_v10 }
  0x48   :  { %1292 = vmatpush1.msra.mxu1 %v470_v11  ;;  %v335_v16 = vld [vmem:[%s5455_s1 + $0x988] sm:$0xff]  ;;  %1222 = vmatprep.subr.mxu0 %v339_v12  ;;  %v334_v18 = vld [vmem:[%s5455_s1 + $0x980] sm:$0xff] }
  0x49   :  { %v463_v17 = vld [vmem:[%s5455_s1 + $0xd88] sm:$0xff]  ;;  %1293 = vmatprep.subr.mxu1 %v467_v13  ;;  %v462_v19 = vld [vmem:[%s5455_s1 + $0xd80] sm:$0xff]  ;;  %1223 = vmatpush1.msra.mxu0 %v338_v14 }
  0x4a   :  { %1294 = vmatpush1.msra.mxu1 %v466_v15  ;;  %v331_v20 = vld [vmem:[%s5455_s1 + $0x968] sm:$0xff]  ;;  %1224 = vmatprep.subr.mxu0 %v335_v16  ;;  %v330_v22 = vld [vmem:[%s5455_s1 + $0x960] sm:$0xff] }
  0x4b   :  { %v459_v21 = vld [vmem:[%s5455_s1 + $0xd68] sm:$0xff]  ;;  %1295 = vmatprep.subr.mxu1 %v463_v17  ;;  %v458_v23 = vld [vmem:[%s5455_s1 + $0xd60] sm:$0xff]  ;;  %1225 = vmatpush1.msra.mxu0 %v334_v18 }
  0x4c   :  { %1296 = vmatpush1.msra.mxu1 %v462_v19  ;;  %v327_v24 = vld [vmem:[%s5455_s1 + $0x948] sm:$0xff]  ;;  %1226 = vmatprep.subr.mxu0 %v331_v20  ;;  %v326_v26 = vld [vmem:[%s5455_s1 + $0x940] sm:$0xff] }
  0x4d   :  { %v455_v25 = vld [vmem:[%s5455_s1 + $0xd48] sm:$0xff]  ;;  %1297 = vmatprep.subr.mxu1 %v459_v21  ;;  %v454_v27 = vld [vmem:[%s5455_s1 + $0xd40] sm:$0xff]  ;;  %1227 = vmatpush1.msra.mxu0 %v330_v22 }
  0x4e   :  { %1298 = vmatpush1.msra.mxu1 %v458_v23  ;;  %v323_v28 = vld [vmem:[%s5455_s1 + $0x928] sm:$0xff]  ;;  %1228 = vmatprep.subr.mxu0 %v327_v24  ;;  %v322_v30 = vld [vmem:[%s5455_s1 + $0x920] sm:$0xff] }
  0x4f   :  { %v451_v29 = vld [vmem:[%s5455_s1 + $0xd28] sm:$0xff]  ;;  %1299 = vmatprep.subr.mxu1 %v455_v25  ;;  %v450_v31 = vld [vmem:[%s5455_s1 + $0xd20] sm:$0xff]  ;;  %1229 = vmatpush1.msra.mxu0 %v326_v26 }
  0x50   :  { %1300 = vmatpush1.msra.mxu1 %v454_v27  ;;  %v319_v32 = vld [vmem:[%s5455_s1 + $0x908] sm:$0xff]  ;;  %1230 = vmatprep.subr.mxu0 %v323_v28  ;;  %v318_v34 = vld [vmem:[%s5455_s1 + $0x900] sm:$0xff] }
  0x51   :  { %v447_v33 = vld [vmem:[%s5455_s1 + $0xd08] sm:$0xff]  ;;  %1301 = vmatprep.subr.mxu1 %v451_v29  ;;  %v446_v35 = vld [vmem:[%s5455_s1 + $0xd00] sm:$0xff]  ;;  %1231 = vmatpush1.msra.mxu0 %v322_v30 }
  0x52   :  { %1302 = vmatpush1.msra.mxu1 %v450_v31  ;;  %v315_v36 = vld [vmem:[%s5455_s1 + $0x8e8] sm:$0xff]  ;;  %1232 = vmatprep.subr.mxu0 %v319_v32  ;;  %v314_v38 = vld [vmem:[%s5455_s1 + $0x8e0] sm:$0xff] }
  0x53   :  { %v443_v37 = vld [vmem:[%s5455_s1 + $0xce8] sm:$0xff]  ;;  %1303 = vmatprep.subr.mxu1 %v447_v33  ;;  %v442_v39 = vld [vmem:[%s5455_s1 + $0xce0] sm:$0xff]  ;;  %1233 = vmatpush1.msra.mxu0 %v318_v34 }
  0x54   :  { %1304 = vmatpush1.msra.mxu1 %v446_v35  ;;  %v311_v40 = vld [vmem:[%s5455_s1 + $0x8c8] sm:$0xff]  ;;  %1234 = vmatprep.subr.mxu0 %v315_v36  ;;  %v310_v42 = vld [vmem:[%s5455_s1 + $0x8c0] sm:$0xff] }
  0x55   :  { %v439_v41 = vld [vmem:[%s5455_s1 + $0xcc8] sm:$0xff]  ;;  %1305 = vmatprep.subr.mxu1 %v443_v37  ;;  %v438_v43 = vld [vmem:[%s5455_s1 + $0xcc0] sm:$0xff]  ;;  %1235 = vmatpush1.msra.mxu0 %v314_v38 }
  0x56   :  { %1306 = vmatpush1.msra.mxu1 %v442_v39  ;;  %v307_v44 = vld [vmem:[%s5455_s1 + $0x8a8] sm:$0xff]  ;;  %1236 = vmatprep.subr.mxu0 %v311_v40  ;;  %v306_v46 = vld [vmem:[%s5455_s1 + $0x8a0] sm:$0xff] }
  0x57   :  { %v435_v45 = vld [vmem:[%s5455_s1 + $0xca8] sm:$0xff]  ;;  %1307 = vmatprep.subr.mxu1 %v439_v41  ;;  %v434_v47 = vld [vmem:[%s5455_s1 + $0xca0] sm:$0xff]  ;;  %1237 = vmatpush1.msra.mxu0 %v310_v42 }
  0x58   :  { %1308 = vmatpush1.msra.mxu1 %v438_v43  ;;  %v303_v48 = vld [vmem:[%s5455_s1 + $0x888] sm:$0xff]  ;;  %1238 = vmatprep.subr.mxu0 %v307_v44  ;;  %v302_v50 = vld [vmem:[%s5455_s1 + $0x880] sm:$0xff] }
  0x59   :  { %v431_v49 = vld [vmem:[%s5455_s1 + $0xc88] sm:$0xff]  ;;  %1309 = vmatprep.subr.mxu1 %v435_v45  ;;  %v430_v51 = vld [vmem:[%s5455_s1 + $0xc80] sm:$0xff]  ;;  %1239 = vmatpush1.msra.mxu0 %v306_v46 }
  0x5a   :  { %1310 = vmatpush1.msra.mxu1 %v434_v47  ;;  %v299_v52 = vld [vmem:[%s5455_s1 + $0x868] sm:$0xff]  ;;  %1240 = vmatprep.subr.mxu0 %v303_v48  ;;  %v298_v54 = vld [vmem:[%s5455_s1 + $0x860] sm:$0xff] }
  0x5b   :  { %v427_v53 = vld [vmem:[%s5455_s1 + $0xc68] sm:$0xff]  ;;  %1311 = vmatprep.subr.mxu1 %v431_v49  ;;  %v426_v55 = vld [vmem:[%s5455_s1 + $0xc60] sm:$0xff]  ;;  %1241 = vmatpush1.msra.mxu0 %v302_v50 }
  0x5c   :  { %1312 = vmatpush1.msra.mxu1 %v430_v51  ;;  %v295_v56 = vld [vmem:[%s5455_s1 + $0x848] sm:$0xff]  ;;  %1242 = vmatprep.subr.mxu0 %v299_v52  ;;  %v294_v58 = vld [vmem:[%s5455_s1 + $0x840] sm:$0xff] }
  0x5d   :  { %v423_v57 = vld [vmem:[%s5455_s1 + $0xc48] sm:$0xff]  ;;  %1313 = vmatprep.subr.mxu1 %v427_v53  ;;  %v422_v59 = vld [vmem:[%s5455_s1 + $0xc40] sm:$0xff]  ;;  %1243 = vmatpush1.msra.mxu0 %v298_v54 }
  0x5e   :  { %1314 = vmatpush1.msra.mxu1 %v426_v55  ;;  %v291_v60 = vld [vmem:[%s5455_s1 + $0x828] sm:$0xff]  ;;  %1244 = vmatprep.subr.mxu0 %v295_v56  ;;  %v290_v62 = vld [vmem:[%s5455_s1 + $0x820] sm:$0xff] }
  0x5f   :  { %v419_v61 = vld [vmem:[%s5455_s1 + $0xc28] sm:$0xff]  ;;  %1315 = vmatprep.subr.mxu1 %v423_v57  ;;  %v418_v63 = vld [vmem:[%s5455_s1 + $0xc20] sm:$0xff]  ;;  %1245 = vmatpush1.msra.mxu0 %v294_v58 }
  0x60   :  { %1316 = vmatpush1.msra.mxu1 %v422_v59  ;;  %v287_v0 = vld [vmem:[%s5455_s1 + $0x808] sm:$0xff]  ;;  %1246 = vmatprep.subr.mxu0 %v291_v60  ;;  %v286_v2 = vld [vmem:[%s5455_s1 + $0x800] sm:$0xff] }
  0x61   :  { %v415_v1 = vld [vmem:[%s5455_s1 + $0xc08] sm:$0xff]  ;;  %1317 = vmatprep.subr.mxu1 %v419_v61  ;;  %v414_v3 = vld [vmem:[%s5455_s1 + $0xc00] sm:$0xff]  ;;  %1247 = vmatpush1.msra.mxu0 %v290_v62 }
  0x62   :  { %1318 = vmatpush1.msra.mxu1 %v418_v63  ;;  %v411_v4 = vld [vmem:[%s5455_s1 + $0xbe8] sm:$0xff]  ;;  %1248 = vmatprep.subr.mxu0 %v287_v0  ;;  %v410_v6 = vld [vmem:[%s5455_s1 + $0xbe0] sm:$0xff] }
  0x63   :  { %v539_v5 = vld [vmem:[%s5455_s1 + $0xfe8] sm:$0xff]  ;;  %1319 = vmatprep.subr.mxu1 %v415_v1  ;;  %v538_v7 = vld [vmem:[%s5455_s1 + $0xfe0] sm:$0xff]  ;;  %1249 = vmatpush1.msra.mxu0 %v286_v2 }
  0x64   :  { %1320 = vmatpush1.msra.mxu1 %v414_v3  ;;  %v407_v8 = vld [vmem:[%s5455_s1 + $0xbc8] sm:$0xff]  ;;  %1250 = vmatprep.subr.mxu0 %v411_v4  ;;  %v406_v10 = vld [vmem:[%s5455_s1 + $0xbc0] sm:$0xff] }
  0x65   :  { %v535_v9 = vld [vmem:[%s5455_s1 + $0xfc8] sm:$0xff]  ;;  %1321 = vmatprep.subr.mxu1 %v539_v5  ;;  %v534_v11 = vld [vmem:[%s5455_s1 + $0xfc0] sm:$0xff]  ;;  %1251 = vmatpush2.msra.mxu0 %v410_v6  ;;  %v21_v6 = vld [vmem:[%s5456_s0 + $0x38] sm:$0xff] }
  0x66   :  { %1322 = vmatpush2.msra.mxu1 %v538_v7  ;;  %v403_v12 = vld [vmem:[%s5455_s1 + $0xba8] sm:$0xff]  ;;  %1252 = vmatprep.subr.mxu0 %v407_v8  ;;  %v402_v14 = vld [vmem:[%s5455_s1 + $0xba0] sm:$0xff] }
  0x67   :  { %v531_v13 = vld [vmem:[%s5455_s1 + $0xfa8] sm:$0xff]  ;;  %1323 = vmatprep.subr.mxu1 %v535_v9  ;;  %v530_v15 = vld [vmem:[%s5455_s1 + $0xfa0] sm:$0xff]  ;;  %1253 = vmatpush2.msra.mxu0 %v406_v10  ;;  %v20_v9 = vld [vmem:[%s5456_s0 + $0x30] sm:$0xff] }
  0x68   :  { %1324 = vmatpush2.msra.mxu1 %v534_v11  ;;  %v399_v16 = vld [vmem:[%s5455_s1 + $0xb88] sm:$0xff]  ;;  %1254 = vmatprep.subr.mxu0 %v403_v12  ;;  %v398_v18 = vld [vmem:[%s5455_s1 + $0xb80] sm:$0xff] }
  0x69   :  { %v527_v17 = vld [vmem:[%s5455_s1 + $0xf88] sm:$0xff]  ;;  %1325 = vmatprep.subr.mxu1 %v531_v13  ;;  %v526_v19 = vld [vmem:[%s5455_s1 + $0xf80] sm:$0xff]  ;;  %1255 = vmatpush2.msra.mxu0 %v402_v14 }
  0x6a   :  { %1326 = vmatpush2.msra.mxu1 %v530_v15  ;;  %v395_v20 = vld [vmem:[%s5455_s1 + $0xb68] sm:$0xff]  ;;  %1256 = vmatprep.subr.mxu0 %v399_v16  ;;  %v394_v22 = vld [vmem:[%s5455_s1 + $0xb60] sm:$0xff] }
  0x6b   :  { %v523_v21 = vld [vmem:[%s5455_s1 + $0xf68] sm:$0xff]  ;;  %1327 = vmatprep.subr.mxu1 %v527_v17  ;;  %v522_v23 = vld [vmem:[%s5455_s1 + $0xf60] sm:$0xff]  ;;  %1257 = vmatpush2.msra.mxu0 %v398_v18 }
  0x6c   :  { %1328 = vmatpush2.msra.mxu1 %v526_v19  ;;  %v391_v24 = vld [vmem:[%s5455_s1 + $0xb48] sm:$0xff]  ;;  %1258 = vmatprep.subr.mxu0 %v395_v20  ;;  %v390_v26 = vld [vmem:[%s5455_s1 + $0xb40] sm:$0xff] }
  0x6d   :  { %v519_v25 = vld [vmem:[%s5455_s1 + $0xf48] sm:$0xff]  ;;  %1329 = vmatprep.subr.mxu1 %v523_v21  ;;  %v518_v27 = vld [vmem:[%s5455_s1 + $0xf40] sm:$0xff]  ;;  %1259 = vmatpush2.msra.mxu0 %v394_v22 }
  0x6e   :  { %1330 = vmatpush2.msra.mxu1 %v522_v23  ;;  %v387_v28 = vld [vmem:[%s5455_s1 + $0xb28] sm:$0xff]  ;;  %1260 = vmatprep.subr.mxu0 %v391_v24  ;;  %v386_v30 = vld [vmem:[%s5455_s1 + $0xb20] sm:$0xff] }
  0x6f   :  { %v515_v29 = vld [vmem:[%s5455_s1 + $0xf28] sm:$0xff]  ;;  %1331 = vmatprep.subr.mxu1 %v519_v25  ;;  %v514_v31 = vld [vmem:[%s5455_s1 + $0xf20] sm:$0xff]  ;;  %1261 = vmatpush2.msra.mxu0 %v390_v26 }
  0x70   :  { %1332 = vmatpush2.msra.mxu1 %v518_v27  ;;  %v383_v32 = vld [vmem:[%s5455_s1 + $0xb08] sm:$0xff]  ;;  %1262 = vmatprep.subr.mxu0 %v387_v28  ;;  %v382_v34 = vld [vmem:[%s5455_s1 + $0xb00] sm:$0xff] }
  0x71   :  { %v511_v33 = vld [vmem:[%s5455_s1 + $0xf08] sm:$0xff]  ;;  %1333 = vmatprep.subr.mxu1 %v515_v29  ;;  %v510_v35 = vld [vmem:[%s5455_s1 + $0xf00] sm:$0xff]  ;;  %1263 = vmatpush2.msra.mxu0 %v386_v30 }
  0x72   :  { %1334 = vmatpush2.msra.mxu1 %v514_v31  ;;  %v379_v36 = vld [vmem:[%s5455_s1 + $0xae8] sm:$0xff]  ;;  %1264 = vmatprep.subr.mxu0 %v383_v32  ;;  %v378_v38 = vld [vmem:[%s5455_s1 + $0xae0] sm:$0xff] }
  0x73   :  { %v507_v37 = vld [vmem:[%s5455_s1 + $0xee8] sm:$0xff]  ;;  %1335 = vmatprep.subr.mxu1 %v511_v33  ;;  %v506_v39 = vld [vmem:[%s5455_s1 + $0xee0] sm:$0xff]  ;;  %1265 = vmatpush2.msra.mxu0 %v382_v34 }
  0x74   :  { %1336 = vmatpush2.msra.mxu1 %v510_v35  ;;  %v375_v40 = vld [vmem:[%s5455_s1 + $0xac8] sm:$0xff]  ;;  %1266 = vmatprep.subr.mxu0 %v379_v36  ;;  %v374_v42 = vld [vmem:[%s5455_s1 + $0xac0] sm:$0xff] }
  0x75   :  { %v503_v41 = vld [vmem:[%s5455_s1 + $0xec8] sm:$0xff]  ;;  %1337 = vmatprep.subr.mxu1 %v507_v37  ;;  %v502_v43 = vld [vmem:[%s5455_s1 + $0xec0] sm:$0xff]  ;;  %1267 = vmatpush2.msra.mxu0 %v378_v38 }
  0x76   :  { %1338 = vmatpush2.msra.mxu1 %v506_v39  ;;  %v371_v44 = vld [vmem:[%s5455_s1 + $0xaa8] sm:$0xff]  ;;  %1268 = vmatprep.subr.mxu0 %v375_v40  ;;  %v370_v46 = vld [vmem:[%s5455_s1 + $0xaa0] sm:$0xff] }
  0x77   :  { %v499_v45 = vld [vmem:[%s5455_s1 + $0xea8] sm:$0xff]  ;;  %1339 = vmatprep.subr.mxu1 %v503_v41  ;;  %v498_v47 = vld [vmem:[%s5455_s1 + $0xea0] sm:$0xff]  ;;  %1269 = vmatpush2.msra.mxu0 %v374_v42 }
  0x78   :  { %1340 = vmatpush2.msra.mxu1 %v502_v43  ;;  %v367_v48 = vld [vmem:[%s5455_s1 + $0xa88] sm:$0xff]  ;;  %1270 = vmatprep.subr.mxu0 %v371_v44  ;;  %v366_v50 = vld [vmem:[%s5455_s1 + $0xa80] sm:$0xff] }
  0x79   :  { %v495_v49 = vld [vmem:[%s5455_s1 + $0xe88] sm:$0xff]  ;;  %1341 = vmatprep.subr.mxu1 %v499_v45  ;;  %v494_v51 = vld [vmem:[%s5455_s1 + $0xe80] sm:$0xff]  ;;  %1271 = vmatpush2.msra.mxu0 %v370_v46 }
  0x7a   :  { %1342 = vmatpush2.msra.mxu1 %v498_v47  ;;  %v363_v52 = vld [vmem:[%s5455_s1 + $0xa68] sm:$0xff]  ;;  %1272 = vmatprep.subr.mxu0 %v367_v48  ;;  %v362_v54 = vld [vmem:[%s5455_s1 + $0xa60] sm:$0xff] }
  0x7b   :  { %v491_v53 = vld [vmem:[%s5455_s1 + $0xe68] sm:$0xff]  ;;  %1343 = vmatprep.subr.mxu1 %v495_v49  ;;  %v490_v55 = vld [vmem:[%s5455_s1 + $0xe60] sm:$0xff]  ;;  %1273 = vmatpush2.msra.mxu0 %v366_v50 }
  0x7c   :  { %1344 = vmatpush2.msra.mxu1 %v494_v51  ;;  %v359_v56 = vld [vmem:[%s5455_s1 + $0xa48] sm:$0xff]  ;;  %1274 = vmatprep.subr.mxu0 %v363_v52  ;;  %v358_v58 = vld [vmem:[%s5455_s1 + $0xa40] sm:$0xff] }
  0x7d   :  { %v487_v57 = vld [vmem:[%s5455_s1 + $0xe48] sm:$0xff]  ;;  %1345 = vmatprep.subr.mxu1 %v491_v53  ;;  %v486_v59 = vld [vmem:[%s5455_s1 + $0xe40] sm:$0xff]  ;;  %1275 = vmatpush2.msra.mxu0 %v362_v54 }
  0x7e   :  { %1346 = vmatpush2.msra.mxu1 %v490_v55  ;;  %v355_v60 = vld [vmem:[%s5455_s1 + $0xa28] sm:$0xff]  ;;  %1276 = vmatprep.subr.mxu0 %v359_v56  ;;  %v354_v62 = vld [vmem:[%s5455_s1 + $0xa20] sm:$0xff] }
  0x7f   :  { %v483_v61 = vld [vmem:[%s5455_s1 + $0xe28] sm:$0xff]  ;;  %1347 = vmatprep.subr.mxu1 %v487_v57  ;;  %v482_v63 = vld [vmem:[%s5455_s1 + $0xe20] sm:$0xff]  ;;  %1277 = vmatpush2.msra.mxu0 %v358_v58 }
  0x80   :  { %1348 = vmatpush2.msra.mxu1 %v486_v59  ;;  %v351_v0 = vld [vmem:[%s5455_s1 + $0xa08] sm:$0xff]  ;;  %1278 = vmatprep.subr.mxu0 %v355_v60  ;;  %v350_v2 = vld [vmem:[%s5455_s1 + $0xa00] sm:$0xff] }
  0x81   :  { %v479_v1 = vld [vmem:[%s5455_s1 + $0xe08] sm:$0xff]  ;;  %1349 = vmatprep.subr.mxu1 %v483_v61  ;;  %1279 = vmatpush2.msra.mxu0 %v354_v62  ;;  %v478_v4 = vld [vmem:[%s5455_s1 + $0xe00] sm:$0xff] }
  0x82   :  { %v19_v3 = vld [vmem:[%s5456_s0 + $0x28] sm:$0xff]  ;;  %1350 = vmatpush2.msra.mxu1 %v482_v63  ;;  %v18_v5 = vld [vmem:[%s5456_s0 + $0x20] sm:$0xff]  ;;  %1280 = vmatprep.subr.mxu0 %v351_v0 }
  0x83   :  { %1351 = vmatprep.subr.mxu1 %v479_v1  ;;  %v603_v7 = vld [vmem:[%s5455_s1 + $0x11e8] sm:$0xff]  ;;  %1281 = vmatpush2.msra.mxu0 %v350_v2  ;;  %v602_v10 = vld [vmem:[%s5455_s1 + $0x11e0] sm:$0xff] }
  0x84   :  { %1282 = vmatprep.mubr.f32.mxu0 %v19_v3  ;;  %v731_v8 = vld [vmem:[%s5455_s1 + $0x15e8] sm:$0xff]  ;;  %1352 = vmatpush2.msra.mxu1 %v478_v4  ;;  %v730_v11 = vld [vmem:[%s5455_s1 + $0x15e0] sm:$0xff] }
  0x85   :  { %1283 = vmatmul.mubr.f32.vlgmr.msra.gmra.mxu0 %v18_v5  ;;  %1353 = vmatprep.mubr.f32.mxu1 %v21_v6  ;;  %v599_v12 = vld [vmem:[%s5455_s1 + $0x11c8] sm:$0xff]  ;;  %v598_v14 = vld [vmem:[%s5455_s1 + $0x11c0] sm:$0xff] }
  0x86   :  { %1360 = vmatprep.subr.mxu0 %v603_v7  ;;  %v727_v13 = vld [vmem:[%s5455_s1 + $0x15c8] sm:$0xff]  ;;  %1431 = vmatprep.subr.mxu1 %v731_v8  ;;  %v726_v15 = vld [vmem:[%s5455_s1 + $0x15c0] sm:$0xff] }
  0x87   :  { %1354 = vmatmul.mubr.f32.vlgmr.msra.gmra.mxu1 %v20_v9  ;;  %1361 = vmatpush1.msra.mxu0 %v602_v10  ;;  %v595_v16 = vld [vmem:[%s5455_s1 + $0x11a8] sm:$0xff]  ;;  %v594_v18 = vld [vmem:[%s5455_s1 + $0x11a0] sm:$0xff] }
  0x88   :  { %1432 = vmatpush1.msra.mxu1 %v730_v11  ;;  %v723_v17 = vld [vmem:[%s5455_s1 + $0x15a8] sm:$0xff]  ;;  %1362 = vmatprep.subr.mxu0 %v599_v12  ;;  %v722_v19 = vld [vmem:[%s5455_s1 + $0x15a0] sm:$0xff] }
  0x89   :  { %1433 = vmatprep.subr.mxu1 %v727_v13  ;;  %1363 = vmatpush1.msra.mxu0 %v598_v14  ;;  %v591_v20 = vld [vmem:[%s5455_s1 + $0x1188] sm:$0xff]  ;;  %v590_v22 = vld [vmem:[%s5455_s1 + $0x1180] sm:$0xff] }
  0x8a   :  { %1434 = vmatpush1.msra.mxu1 %v726_v15  ;;  %v719_v21 = vld [vmem:[%s5455_s1 + $0x1588] sm:$0xff]  ;;  %1364 = vmatprep.subr.mxu0 %v595_v16  ;;  %v718_v23 = vld [vmem:[%s5455_s1 + $0x1580] sm:$0xff] }
  0x8b   :  { %1435 = vmatprep.subr.mxu1 %v723_v17  ;;  %1365 = vmatpush1.msra.mxu0 %v594_v18  ;;  %v587_v24 = vld [vmem:[%s5455_s1 + $0x1168] sm:$0xff]  ;;  %v586_v26 = vld [vmem:[%s5455_s1 + $0x1160] sm:$0xff] }
  0x8c   :  { %1436 = vmatpush1.msra.mxu1 %v722_v19  ;;  %v715_v25 = vld [vmem:[%s5455_s1 + $0x1568] sm:$0xff]  ;;  %1366 = vmatprep.subr.mxu0 %v591_v20  ;;  %v714_v27 = vld [vmem:[%s5455_s1 + $0x1560] sm:$0xff] }
  0x8d   :  { %1437 = vmatprep.subr.mxu1 %v719_v21  ;;  %1367 = vmatpush1.msra.mxu0 %v590_v22  ;;  %v583_v28 = vld [vmem:[%s5455_s1 + $0x1148] sm:$0xff]  ;;  %v582_v30 = vld [vmem:[%s5455_s1 + $0x1140] sm:$0xff] }
  0x8e   :  { %1438 = vmatpush1.msra.mxu1 %v718_v23  ;;  %v711_v29 = vld [vmem:[%s5455_s1 + $0x1548] sm:$0xff]  ;;  %1368 = vmatprep.subr.mxu0 %v587_v24  ;;  %v710_v31 = vld [vmem:[%s5455_s1 + $0x1540] sm:$0xff] }
  0x8f   :  { %1439 = vmatprep.subr.mxu1 %v715_v25  ;;  %1369 = vmatpush1.msra.mxu0 %v586_v26  ;;  %v579_v32 = vld [vmem:[%s5455_s1 + $0x1128] sm:$0xff]  ;;  %v578_v34 = vld [vmem:[%s5455_s1 + $0x1120] sm:$0xff] }
  0x90   :  { %1440 = vmatpush1.msra.mxu1 %v714_v27  ;;  %v707_v33 = vld [vmem:[%s5455_s1 + $0x1528] sm:$0xff]  ;;  %1370 = vmatprep.subr.mxu0 %v583_v28  ;;  %v706_v35 = vld [vmem:[%s5455_s1 + $0x1520] sm:$0xff] }
  0x91   :  { %1441 = vmatprep.subr.mxu1 %v711_v29  ;;  %1371 = vmatpush1.msra.mxu0 %v582_v30  ;;  %v575_v36 = vld [vmem:[%s5455_s1 + $0x1108] sm:$0xff]  ;;  %v574_v38 = vld [vmem:[%s5455_s1 + $0x1100] sm:$0xff] }
  0x92   :  { %1442 = vmatpush1.msra.mxu1 %v710_v31  ;;  %v703_v37 = vld [vmem:[%s5455_s1 + $0x1508] sm:$0xff]  ;;  %1372 = vmatprep.subr.mxu0 %v579_v32  ;;  %v702_v39 = vld [vmem:[%s5455_s1 + $0x1500] sm:$0xff] }
  0x93   :  { %1443 = vmatprep.subr.mxu1 %v707_v33  ;;  %1373 = vmatpush1.msra.mxu0 %v578_v34  ;;  %v571_v40 = vld [vmem:[%s5455_s1 + $0x10e8] sm:$0xff]  ;;  %v570_v42 = vld [vmem:[%s5455_s1 + $0x10e0] sm:$0xff] }
  0x94   :  { %1444 = vmatpush1.msra.mxu1 %v706_v35  ;;  %v699_v41 = vld [vmem:[%s5455_s1 + $0x14e8] sm:$0xff]  ;;  %1374 = vmatprep.subr.mxu0 %v575_v36  ;;  %v698_v43 = vld [vmem:[%s5455_s1 + $0x14e0] sm:$0xff] }
  0x95   :  { %1445 = vmatprep.subr.mxu1 %v703_v37  ;;  %1375 = vmatpush1.msra.mxu0 %v574_v38  ;;  %v567_v44 = vld [vmem:[%s5455_s1 + $0x10c8] sm:$0xff]  ;;  %v566_v46 = vld [vmem:[%s5455_s1 + $0x10c0] sm:$0xff] }
  0x96   :  { %1446 = vmatpush1.msra.mxu1 %v702_v39  ;;  %v695_v45 = vld [vmem:[%s5455_s1 + $0x14c8] sm:$0xff]  ;;  %1376 = vmatprep.subr.mxu0 %v571_v40  ;;  %v694_v47 = vld [vmem:[%s5455_s1 + $0x14c0] sm:$0xff] }
  0x97   :  { %1447 = vmatprep.subr.mxu1 %v699_v41  ;;  %1377 = vmatpush1.msra.mxu0 %v570_v42  ;;  %v563_v48 = vld [vmem:[%s5455_s1 + $0x10a8] sm:$0xff]  ;;  %v562_v50 = vld [vmem:[%s5455_s1 + $0x10a0] sm:$0xff] }
  0x98   :  { %1448 = vmatpush1.msra.mxu1 %v698_v43  ;;  %v691_v49 = vld [vmem:[%s5455_s1 + $0x14a8] sm:$0xff]  ;;  %1378 = vmatprep.subr.mxu0 %v567_v44  ;;  %v690_v51 = vld [vmem:[%s5455_s1 + $0x14a0] sm:$0xff] }
  0x99   :  { %1449 = vmatprep.subr.mxu1 %v695_v45  ;;  %1379 = vmatpush1.msra.mxu0 %v566_v46  ;;  %v559_v52 = vld [vmem:[%s5455_s1 + $0x1088] sm:$0xff]  ;;  %v558_v54 = vld [vmem:[%s5455_s1 + $0x1080] sm:$0xff] }
  0x9a   :  { %1450 = vmatpush1.msra.mxu1 %v694_v47  ;;  %v687_v53 = vld [vmem:[%s5455_s1 + $0x1488] sm:$0xff]  ;;  %1380 = vmatprep.subr.mxu0 %v563_v48  ;;  %v686_v55 = vld [vmem:[%s5455_s1 + $0x1480] sm:$0xff] }
  0x9b   :  { %1451 = vmatprep.subr.mxu1 %v691_v49  ;;  %1381 = vmatpush1.msra.mxu0 %v562_v50  ;;  %v555_v56 = vld [vmem:[%s5455_s1 + $0x1068] sm:$0xff]  ;;  %v554_v58 = vld [vmem:[%s5455_s1 + $0x1060] sm:$0xff] }
  0x9c   :  { %1452 = vmatpush1.msra.mxu1 %v690_v51  ;;  %v683_v57 = vld [vmem:[%s5455_s1 + $0x1468] sm:$0xff]  ;;  %1382 = vmatprep.subr.mxu0 %v559_v52  ;;  %v682_v59 = vld [vmem:[%s5455_s1 + $0x1460] sm:$0xff] }
  0x9d   :  { %1453 = vmatprep.subr.mxu1 %v687_v53  ;;  %1383 = vmatpush1.msra.mxu0 %v558_v54  ;;  %v551_v60 = vld [vmem:[%s5455_s1 + $0x1048] sm:$0xff]  ;;  %v550_v62 = vld [vmem:[%s5455_s1 + $0x1040] sm:$0xff] }
  0x9e   :  { %1454 = vmatpush1.msra.mxu1 %v686_v55  ;;  %v679_v61 = vld [vmem:[%s5455_s1 + $0x1448] sm:$0xff]  ;;  %1384 = vmatprep.subr.mxu0 %v555_v56  ;;  %v678_v63 = vld [vmem:[%s5455_s1 + $0x1440] sm:$0xff] }
  0x9f   :  { %1455 = vmatprep.subr.mxu1 %v683_v57  ;;  %1385 = vmatpush1.msra.mxu0 %v554_v58  ;;  %v547_v0 = vld [vmem:[%s5455_s1 + $0x1028] sm:$0xff]  ;;  %v546_v2 = vld [vmem:[%s5455_s1 + $0x1020] sm:$0xff] }
  0xa0   :  { %1456 = vmatpush1.msra.mxu1 %v682_v59  ;;  %v675_v1 = vld [vmem:[%s5455_s1 + $0x1428] sm:$0xff]  ;;  %1386 = vmatprep.subr.mxu0 %v551_v60  ;;  %v674_v3 = vld [vmem:[%s5455_s1 + $0x1420] sm:$0xff] }
  0xa1   :  { %1457 = vmatprep.subr.mxu1 %v679_v61  ;;  %1387 = vmatpush1.msra.mxu0 %v550_v62  ;;  %v543_v4 = vld [vmem:[%s5455_s1 + $0x1008] sm:$0xff]  ;;  %v542_v6 = vld [vmem:[%s5455_s1 + $0x1000] sm:$0xff] }
  0xa2   :  { %1458 = vmatpush1.msra.mxu1 %v678_v63  ;;  %v671_v5 = vld [vmem:[%s5455_s1 + $0x1408] sm:$0xff]  ;;  %1388 = vmatprep.subr.mxu0 %v547_v0  ;;  %v670_v7 = vld [vmem:[%s5455_s1 + $0x1400] sm:$0xff] }
  0xa3   :  { %1459 = vmatprep.subr.mxu1 %v675_v1  ;;  %1389 = vmatpush1.msra.mxu0 %v546_v2  ;;  %v667_v8 = vld [vmem:[%s5455_s1 + $0x13e8] sm:$0xff]  ;;  %v666_v10 = vld [vmem:[%s5455_s1 + $0x13e0] sm:$0xff] }
  0xa4   :  { %1460 = vmatpush1.msra.mxu1 %v674_v3  ;;  %v795_v9 = vld [vmem:[%s5455_s1 + $0x17e8] sm:$0xff]  ;;  %1390 = vmatprep.subr.mxu0 %v543_v4  ;;  %v794_v11 = vld [vmem:[%s5455_s1 + $0x17e0] sm:$0xff] }
  0xa5   :  { %1461 = vmatprep.subr.mxu1 %v671_v5  ;;  %1391 = vmatpush1.msra.mxu0 %v542_v6  ;;  %v663_v12 = vld [vmem:[%s5455_s1 + $0x13c8] sm:$0xff]  ;;  %v662_v14 = vld [vmem:[%s5455_s1 + $0x13c0] sm:$0xff] }
  0xa6   :  { %1462 = vmatpush1.msra.mxu1 %v670_v7  ;;  %v791_v13 = vld [vmem:[%s5455_s1 + $0x17c8] sm:$0xff]  ;;  %1392 = vmatprep.subr.mxu0 %v667_v8  ;;  %v790_v15 = vld [vmem:[%s5455_s1 + $0x17c0] sm:$0xff] }
  0xa7   :  { %1463 = vmatprep.subr.mxu1 %v795_v9  ;;  %1393 = vmatpush2.msra.mxu0 %v666_v10  ;;  %v659_v16 = vld [vmem:[%s5455_s1 + $0x13a8] sm:$0xff]  ;;  %v658_v18 = vld [vmem:[%s5455_s1 + $0x13a0] sm:$0xff]  ;;  %v25_v10 = vld [vmem:[%s5456_s0 + $0x58] sm:$0xff] }
  0xa8   :  { %1464 = vmatpush2.msra.mxu1 %v794_v11  ;;  %v787_v17 = vld [vmem:[%s5455_s1 + $0x17a8] sm:$0xff]  ;;  %1394 = vmatprep.subr.mxu0 %v663_v12  ;;  %v786_v19 = vld [vmem:[%s5455_s1 + $0x17a0] sm:$0xff] }
  0xa9   :  { %1465 = vmatprep.subr.mxu1 %v791_v13  ;;  %1395 = vmatpush2.msra.mxu0 %v662_v14  ;;  %v655_v20 = vld [vmem:[%s5455_s1 + $0x1388] sm:$0xff]  ;;  %v654_v22 = vld [vmem:[%s5455_s1 + $0x1380] sm:$0xff]  ;;  %v24_v13 = vld [vmem:[%s5456_s0 + $0x50] sm:$0xff] }
  0xaa   :  { %1466 = vmatpush2.msra.mxu1 %v790_v15  ;;  %v783_v21 = vld [vmem:[%s5455_s1 + $0x1788] sm:$0xff]  ;;  %1396 = vmatprep.subr.mxu0 %v659_v16  ;;  %v782_v23 = vld [vmem:[%s5455_s1 + $0x1780] sm:$0xff] }
  0xab   :  { %1467 = vmatprep.subr.mxu1 %v787_v17  ;;  %1397 = vmatpush2.msra.mxu0 %v658_v18  ;;  %v651_v24 = vld [vmem:[%s5455_s1 + $0x1368] sm:$0xff]  ;;  %v650_v26 = vld [vmem:[%s5455_s1 + $0x1360] sm:$0xff] }
  0xac   :  { %1468 = vmatpush2.msra.mxu1 %v786_v19  ;;  %v779_v25 = vld [vmem:[%s5455_s1 + $0x1768] sm:$0xff]  ;;  %1398 = vmatprep.subr.mxu0 %v655_v20  ;;  %v778_v27 = vld [vmem:[%s5455_s1 + $0x1760] sm:$0xff] }
  0xad   :  { %1469 = vmatprep.subr.mxu1 %v783_v21  ;;  %1399 = vmatpush2.msra.mxu0 %v654_v22  ;;  %v647_v28 = vld [vmem:[%s5455_s1 + $0x1348] sm:$0xff]  ;;  %v646_v30 = vld [vmem:[%s5455_s1 + $0x1340] sm:$0xff] }
  0xae   :  { %1470 = vmatpush2.msra.mxu1 %v782_v23  ;;  %v775_v29 = vld [vmem:[%s5455_s1 + $0x1748] sm:$0xff]  ;;  %1400 = vmatprep.subr.mxu0 %v651_v24  ;;  %v774_v31 = vld [vmem:[%s5455_s1 + $0x1740] sm:$0xff] }
  0xaf   :  { %1471 = vmatprep.subr.mxu1 %v779_v25  ;;  %1401 = vmatpush2.msra.mxu0 %v650_v26  ;;  %v643_v32 = vld [vmem:[%s5455_s1 + $0x1328] sm:$0xff]  ;;  %v642_v34 = vld [vmem:[%s5455_s1 + $0x1320] sm:$0xff] }
  0xb0   :  { %1472 = vmatpush2.msra.mxu1 %v778_v27  ;;  %v771_v33 = vld [vmem:[%s5455_s1 + $0x1728] sm:$0xff]  ;;  %1402 = vmatprep.subr.mxu0 %v647_v28  ;;  %v770_v35 = vld [vmem:[%s5455_s1 + $0x1720] sm:$0xff] }
  0xb1   :  { %1473 = vmatprep.subr.mxu1 %v775_v29  ;;  %1403 = vmatpush2.msra.mxu0 %v646_v30  ;;  %v639_v36 = vld [vmem:[%s5455_s1 + $0x1308] sm:$0xff]  ;;  %v638_v38 = vld [vmem:[%s5455_s1 + $0x1300] sm:$0xff] }
  0xb2   :  { %1474 = vmatpush2.msra.mxu1 %v774_v31  ;;  %v767_v37 = vld [vmem:[%s5455_s1 + $0x1708] sm:$0xff]  ;;  %1404 = vmatprep.subr.mxu0 %v643_v32  ;;  %v766_v39 = vld [vmem:[%s5455_s1 + $0x1700] sm:$0xff] }
  0xb3   :  { %1475 = vmatprep.subr.mxu1 %v771_v33  ;;  %1405 = vmatpush2.msra.mxu0 %v642_v34  ;;  %v635_v40 = vld [vmem:[%s5455_s1 + $0x12e8] sm:$0xff]  ;;  %v634_v42 = vld [vmem:[%s5455_s1 + $0x12e0] sm:$0xff] }
  0xb4   :  { %1476 = vmatpush2.msra.mxu1 %v770_v35  ;;  %v763_v41 = vld [vmem:[%s5455_s1 + $0x16e8] sm:$0xff]  ;;  %1406 = vmatprep.subr.mxu0 %v639_v36  ;;  %v762_v43 = vld [vmem:[%s5455_s1 + $0x16e0] sm:$0xff] }
  0xb5   :  { %1477 = vmatprep.subr.mxu1 %v767_v37  ;;  %1407 = vmatpush2.msra.mxu0 %v638_v38  ;;  %v631_v44 = vld [vmem:[%s5455_s1 + $0x12c8] sm:$0xff]  ;;  %v630_v46 = vld [vmem:[%s5455_s1 + $0x12c0] sm:$0xff] }
  0xb6   :  { %1478 = vmatpush2.msra.mxu1 %v766_v39  ;;  %v759_v45 = vld [vmem:[%s5455_s1 + $0x16c8] sm:$0xff]  ;;  %1408 = vmatprep.subr.mxu0 %v635_v40  ;;  %v758_v47 = vld [vmem:[%s5455_s1 + $0x16c0] sm:$0xff] }
  0xb7   :  { %1479 = vmatprep.subr.mxu1 %v763_v41  ;;  %1409 = vmatpush2.msra.mxu0 %v634_v42  ;;  %v627_v48 = vld [vmem:[%s5455_s1 + $0x12a8] sm:$0xff]  ;;  %v626_v50 = vld [vmem:[%s5455_s1 + $0x12a0] sm:$0xff] }
  0xb8   :  { %1480 = vmatpush2.msra.mxu1 %v762_v43  ;;  %v755_v49 = vld [vmem:[%s5455_s1 + $0x16a8] sm:$0xff]  ;;  %1410 = vmatprep.subr.mxu0 %v631_v44  ;;  %v754_v51 = vld [vmem:[%s5455_s1 + $0x16a0] sm:$0xff] }
  0xb9   :  { %1481 = vmatprep.subr.mxu1 %v759_v45  ;;  %1411 = vmatpush2.msra.mxu0 %v630_v46  ;;  %v623_v52 = vld [vmem:[%s5455_s1 + $0x1288] sm:$0xff]  ;;  %v622_v54 = vld [vmem:[%s5455_s1 + $0x1280] sm:$0xff] }
  0xba   :  { %1482 = vmatpush2.msra.mxu1 %v758_v47  ;;  %v751_v53 = vld [vmem:[%s5455_s1 + $0x1688] sm:$0xff]  ;;  %1412 = vmatprep.subr.mxu0 %v627_v48  ;;  %v750_v55 = vld [vmem:[%s5455_s1 + $0x1680] sm:$0xff] }
  0xbb   :  { %1483 = vmatprep.subr.mxu1 %v755_v49  ;;  %1413 = vmatpush2.msra.mxu0 %v626_v50  ;;  %v619_v56 = vld [vmem:[%s5455_s1 + $0x1268] sm:$0xff]  ;;  %v618_v58 = vld [vmem:[%s5455_s1 + $0x1260] sm:$0xff] }
  0xbc   :  { %1484 = vmatpush2.msra.mxu1 %v754_v51  ;;  %v747_v57 = vld [vmem:[%s5455_s1 + $0x1668] sm:$0xff]  ;;  %1414 = vmatprep.subr.mxu0 %v623_v52  ;;  %v746_v59 = vld [vmem:[%s5455_s1 + $0x1660] sm:$0xff] }
  0xbd   :  { %1485 = vmatprep.subr.mxu1 %v751_v53  ;;  %1415 = vmatpush2.msra.mxu0 %v622_v54  ;;  %v615_v60 = vld [vmem:[%s5455_s1 + $0x1248] sm:$0xff]  ;;  %v614_v62 = vld [vmem:[%s5455_s1 + $0x1240] sm:$0xff] }
  0xbe   :  { %1486 = vmatpush2.msra.mxu1 %v750_v55  ;;  %v743_v61 = vld [vmem:[%s5455_s1 + $0x1648] sm:$0xff]  ;;  %1416 = vmatprep.subr.mxu0 %v619_v56  ;;  %v742_v63 = vld [vmem:[%s5455_s1 + $0x1640] sm:$0xff] }
  0xbf   :  { %1487 = vmatprep.subr.mxu1 %v747_v57  ;;  %1417 = vmatpush2.msra.mxu0 %v618_v58  ;;  %v611_v0 = vld [vmem:[%s5455_s1 + $0x1228] sm:$0xff]  ;;  %v610_v2 = vld [vmem:[%s5455_s1 + $0x1220] sm:$0xff] }
  0xc0   :  { %1488 = vmatpush2.msra.mxu1 %v746_v59  ;;  %v739_v1 = vld [vmem:[%s5455_s1 + $0x1628] sm:$0xff]  ;;  %1418 = vmatprep.subr.mxu0 %v615_v60  ;;  %v738_v3 = vld [vmem:[%s5455_s1 + $0x1620] sm:$0xff] }
  0xc1   :  { %1489 = vmatprep.subr.mxu1 %v743_v61  ;;  %1419 = vmatpush2.msra.mxu0 %v614_v62  ;;  %v607_v4 = vld [vmem:[%s5455_s1 + $0x1208] sm:$0xff]  ;;  %v606_v6 = vld [vmem:[%s5455_s1 + $0x1200] sm:$0xff] }
  0xc2   :  { %1490 = vmatpush2.msra.mxu1 %v742_v63  ;;  %v735_v5 = vld [vmem:[%s5455_s1 + $0x1608] sm:$0xff]  ;;  %1420 = vmatprep.subr.mxu0 %v611_v0  ;;  %v734_v8 = vld [vmem:[%s5455_s1 + $0x1600] sm:$0xff] }
  0xc3   :  { %1491 = vmatprep.subr.mxu1 %v739_v1  ;;  %v23_v7 = vld [vmem:[%s5456_s0 + $0x48] sm:$0xff]  ;;  %1421 = vmatpush2.msra.mxu0 %v610_v2  ;;  %v22_v9 = vld [vmem:[%s5456_s0 + $0x40] sm:$0xff] }
  0xc4   :  { %1492 = vmatpush2.msra.mxu1 %v738_v3  ;;  %1422 = vmatprep.subr.mxu0 %v607_v4  ;;  %v859_v11 = vld [vmem:[%s5455_s1 + $0x19e8] sm:$0xff]  ;;  %v858_v14 = vld [vmem:[%s5455_s1 + $0x19e0] sm:$0xff] }
  0xc5   :  { %1493 = vmatprep.subr.mxu1 %v735_v5  ;;  %1423 = vmatpush2.msra.mxu0 %v606_v6  ;;  %v987_v12 = vld [vmem:[%s5455_s1 + $0x1de8] sm:$0xff]  ;;  %v986_v15 = vld [vmem:[%s5455_s1 + $0x1de0] sm:$0xff] }
  0xc6   :  { %1424 = vmatprep.mubr.f32.mxu0 %v23_v7  ;;  %1494 = vmatpush2.msra.mxu1 %v734_v8  ;;  %v855_v16 = vld [vmem:[%s5455_s1 + $0x19c8] sm:$0xff]  ;;  %v854_v18 = vld [vmem:[%s5455_s1 + $0x19c0] sm:$0xff] }
  0xc7   :  { %1425 = vmatmul.mubr.f32.vlgmr.msra.gmra.mxu0 %v22_v9  ;;  %1495 = vmatprep.mubr.f32.mxu1 %v25_v10  ;;  %v983_v17 = vld [vmem:[%s5455_s1 + $0x1dc8] sm:$0xff]  ;;  %v982_v19 = vld [vmem:[%s5455_s1 + $0x1dc0] sm:$0xff] }
  0xc8   :  { %1502 = vmatprep.subr.mxu0 %v859_v11  ;;  %1573 = vmatprep.subr.mxu1 %v987_v12  ;;  %v851_v20 = vld [vmem:[%s5455_s1 + $0x19a8] sm:$0xff]  ;;  %v850_v22 = vld [vmem:[%s5455_s1 + $0x19a0] sm:$0xff] }
  0xc9   :  { %1496 = vmatmul.mubr.f32.vlgmr.msra.gmra.mxu1 %v24_v13  ;;  %1503 = vmatpush1.msra.mxu0 %v858_v14  ;;  %v979_v21 = vld [vmem:[%s5455_s1 + $0x1da8] sm:$0xff]  ;;  %v978_v23 = vld [vmem:[%s5455_s1 + $0x1da0] sm:$0xff] }
  0xca   :  { %1574 = vmatpush1.msra.mxu1 %v986_v15  ;;  %1504 = vmatprep.subr.mxu0 %v855_v16  ;;  %v847_v24 = vld [vmem:[%s5455_s1 + $0x1988] sm:$0xff]  ;;  %v846_v26 = vld [vmem:[%s5455_s1 + $0x1980] sm:$0xff] }
  0xcb   :  { %1575 = vmatprep.subr.mxu1 %v983_v17  ;;  %1505 = vmatpush1.msra.mxu0 %v854_v18  ;;  %v975_v25 = vld [vmem:[%s5455_s1 + $0x1d88] sm:$0xff]  ;;  %v974_v27 = vld [vmem:[%s5455_s1 + $0x1d80] sm:$0xff] }
  0xcc   :  { %1576 = vmatpush1.msra.mxu1 %v982_v19  ;;  %1506 = vmatprep.subr.mxu0 %v851_v20  ;;  %v843_v28 = vld [vmem:[%s5455_s1 + $0x1968] sm:$0xff]  ;;  %v842_v30 = vld [vmem:[%s5455_s1 + $0x1960] sm:$0xff] }
  0xcd   :  { %1577 = vmatprep.subr.mxu1 %v979_v21  ;;  %1507 = vmatpush1.msra.mxu0 %v850_v22  ;;  %v971_v29 = vld [vmem:[%s5455_s1 + $0x1d68] sm:$0xff]  ;;  %v970_v31 = vld [vmem:[%s5455_s1 + $0x1d60] sm:$0xff] }
  0xce   :  { %1578 = vmatpush1.msra.mxu1 %v978_v23  ;;  %1508 = vmatprep.subr.mxu0 %v847_v24  ;;  %v839_v32 = vld [vmem:[%s5455_s1 + $0x1948] sm:$0xff]  ;;  %v838_v34 = vld [vmem:[%s5455_s1 + $0x1940] sm:$0xff] }
  0xcf   :  { %1579 = vmatprep.subr.mxu1 %v975_v25  ;;  %1509 = vmatpush1.msra.mxu0 %v846_v26  ;;  %v967_v33 = vld [vmem:[%s5455_s1 + $0x1d48] sm:$0xff]  ;;  %v966_v35 = vld [vmem:[%s5455_s1 + $0x1d40] sm:$0xff] }
  0xd0   :  { %1580 = vmatpush1.msra.mxu1 %v974_v27  ;;  %1510 = vmatprep.subr.mxu0 %v843_v28  ;;  %v835_v36 = vld [vmem:[%s5455_s1 + $0x1928] sm:$0xff]  ;;  %v834_v38 = vld [vmem:[%s5455_s1 + $0x1920] sm:$0xff] }
  0xd1   :  { %1581 = vmatprep.subr.mxu1 %v971_v29  ;;  %1511 = vmatpush1.msra.mxu0 %v842_v30  ;;  %v963_v37 = vld [vmem:[%s5455_s1 + $0x1d28] sm:$0xff]  ;;  %v962_v39 = vld [vmem:[%s5455_s1 + $0x1d20] sm:$0xff] }
  0xd2   :  { %1582 = vmatpush1.msra.mxu1 %v970_v31  ;;  %1512 = vmatprep.subr.mxu0 %v839_v32  ;;  %v831_v40 = vld [vmem:[%s5455_s1 + $0x1908] sm:$0xff]  ;;  %v830_v42 = vld [vmem:[%s5455_s1 + $0x1900] sm:$0xff] }
  0xd3   :  { %1583 = vmatprep.subr.mxu1 %v967_v33  ;;  %1513 = vmatpush1.msra.mxu0 %v838_v34  ;;  %v959_v41 = vld [vmem:[%s5455_s1 + $0x1d08] sm:$0xff]  ;;  %v958_v43 = vld [vmem:[%s5455_s1 + $0x1d00] sm:$0xff] }
  0xd4   :  { %1584 = vmatpush1.msra.mxu1 %v966_v35  ;;  %1514 = vmatprep.subr.mxu0 %v835_v36  ;;  %v827_v44 = vld [vmem:[%s5455_s1 + $0x18e8] sm:$0xff]  ;;  %v826_v46 = vld [vmem:[%s5455_s1 + $0x18e0] sm:$0xff] }
  0xd5   :  { %1585 = vmatprep.subr.mxu1 %v963_v37  ;;  %1515 = vmatpush1.msra.mxu0 %v834_v38  ;;  %v955_v45 = vld [vmem:[%s5455_s1 + $0x1ce8] sm:$0xff]  ;;  %v954_v47 = vld [vmem:[%s5455_s1 + $0x1ce0] sm:$0xff] }
  0xd6   :  { %1586 = vmatpush1.msra.mxu1 %v962_v39  ;;  %1516 = vmatprep.subr.mxu0 %v831_v40  ;;  %v823_v48 = vld [vmem:[%s5455_s1 + $0x18c8] sm:$0xff]  ;;  %v822_v50 = vld [vmem:[%s5455_s1 + $0x18c0] sm:$0xff] }
  0xd7   :  { %1587 = vmatprep.subr.mxu1 %v959_v41  ;;  %1517 = vmatpush1.msra.mxu0 %v830_v42  ;;  %v951_v49 = vld [vmem:[%s5455_s1 + $0x1cc8] sm:$0xff]  ;;  %v950_v51 = vld [vmem:[%s5455_s1 + $0x1cc0] sm:$0xff] }
  0xd8   :  { %1588 = vmatpush1.msra.mxu1 %v958_v43  ;;  %1518 = vmatprep.subr.mxu0 %v827_v44  ;;  %v819_v52 = vld [vmem:[%s5455_s1 + $0x18a8] sm:$0xff]  ;;  %v818_v54 = vld [vmem:[%s5455_s1 + $0x18a0] sm:$0xff] }
  0xd9   :  { %1589 = vmatprep.subr.mxu1 %v955_v45  ;;  %1519 = vmatpush1.msra.mxu0 %v826_v46  ;;  %v947_v53 = vld [vmem:[%s5455_s1 + $0x1ca8] sm:$0xff]  ;;  %v946_v55 = vld [vmem:[%s5455_s1 + $0x1ca0] sm:$0xff] }
  0xda   :  { %1590 = vmatpush1.msra.mxu1 %v954_v47  ;;  %1520 = vmatprep.subr.mxu0 %v823_v48  ;;  %v815_v56 = vld [vmem:[%s5455_s1 + $0x1888] sm:$0xff]  ;;  %v814_v58 = vld [vmem:[%s5455_s1 + $0x1880] sm:$0xff] }
  0xdb   :  { %1591 = vmatprep.subr.mxu1 %v951_v49  ;;  %1521 = vmatpush1.msra.mxu0 %v822_v50  ;;  %v943_v57 = vld [vmem:[%s5455_s1 + $0x1c88] sm:$0xff]  ;;  %v942_v59 = vld [vmem:[%s5455_s1 + $0x1c80] sm:$0xff] }
  0xdc   :  { %1592 = vmatpush1.msra.mxu1 %v950_v51  ;;  %1522 = vmatprep.subr.mxu0 %v819_v52  ;;  %v811_v60 = vld [vmem:[%s5455_s1 + $0x1868] sm:$0xff]  ;;  %v810_v62 = vld [vmem:[%s5455_s1 + $0x1860] sm:$0xff] }
  0xdd   :  { %1593 = vmatprep.subr.mxu1 %v947_v53  ;;  %1523 = vmatpush1.msra.mxu0 %v818_v54  ;;  %v939_v61 = vld [vmem:[%s5455_s1 + $0x1c68] sm:$0xff]  ;;  %v938_v63 = vld [vmem:[%s5455_s1 + $0x1c60] sm:$0xff] }
  0xde   :  { %1594 = vmatpush1.msra.mxu1 %v946_v55  ;;  %1524 = vmatprep.subr.mxu0 %v815_v56  ;;  %v807_v0 = vld [vmem:[%s5455_s1 + $0x1848] sm:$0xff]  ;;  %v806_v2 = vld [vmem:[%s5455_s1 + $0x1840] sm:$0xff] }
  0xdf   :  { %1595 = vmatprep.subr.mxu1 %v943_v57  ;;  %1525 = vmatpush1.msra.mxu0 %v814_v58  ;;  %v935_v1 = vld [vmem:[%s5455_s1 + $0x1c48] sm:$0xff]  ;;  %v934_v3 = vld [vmem:[%s5455_s1 + $0x1c40] sm:$0xff] }
  0xe0   :  { %1596 = vmatpush1.msra.mxu1 %v942_v59  ;;  %1526 = vmatprep.subr.mxu0 %v811_v60  ;;  %v803_v4 = vld [vmem:[%s5455_s1 + $0x1828] sm:$0xff]  ;;  %v802_v6 = vld [vmem:[%s5455_s1 + $0x1820] sm:$0xff] }
  0xe1   :  { %1597 = vmatprep.subr.mxu1 %v939_v61  ;;  %1527 = vmatpush1.msra.mxu0 %v810_v62  ;;  %v931_v5 = vld [vmem:[%s5455_s1 + $0x1c28] sm:$0xff]  ;;  %v930_v7 = vld [vmem:[%s5455_s1 + $0x1c20] sm:$0xff] }
  0xe2   :  { %1598 = vmatpush1.msra.mxu1 %v938_v63  ;;  %1528 = vmatprep.subr.mxu0 %v807_v0  ;;  %v799_v8 = vld [vmem:[%s5455_s1 + $0x1808] sm:$0xff]  ;;  %v798_v10 = vld [vmem:[%s5455_s1 + $0x1800] sm:$0xff] }
  0xe3   :  { %1599 = vmatprep.subr.mxu1 %v935_v1  ;;  %1529 = vmatpush1.msra.mxu0 %v806_v2  ;;  %v927_v9 = vld [vmem:[%s5455_s1 + $0x1c08] sm:$0xff]  ;;  %v926_v11 = vld [vmem:[%s5455_s1 + $0x1c00] sm:$0xff] }
  0xe4   :  { %1600 = vmatpush1.msra.mxu1 %v934_v3  ;;  %1530 = vmatprep.subr.mxu0 %v803_v4  ;;  %v923_v12 = vld [vmem:[%s5455_s1 + $0x1be8] sm:$0xff]  ;;  %v922_v14 = vld [vmem:[%s5455_s1 + $0x1be0] sm:$0xff] }
  0xe5   :  { %1601 = vmatprep.subr.mxu1 %v931_v5  ;;  %1531 = vmatpush1.msra.mxu0 %v802_v6  ;;  %v1051_v13 = vld [vmem:[%s5455_s1 + $0x1fe8] sm:$0xff]  ;;  %v1050_v15 = vld [vmem:[%s5455_s1 + $0x1fe0] sm:$0xff] }
  0xe6   :  { %1602 = vmatpush1.msra.mxu1 %v930_v7  ;;  %1532 = vmatprep.subr.mxu0 %v799_v8  ;;  %v919_v16 = vld [vmem:[%s5455_s1 + $0x1bc8] sm:$0xff]  ;;  %v918_v18 = vld [vmem:[%s5455_s1 + $0x1bc0] sm:$0xff] }
  0xe7   :  { %1603 = vmatprep.subr.mxu1 %v927_v9  ;;  %1533 = vmatpush1.msra.mxu0 %v798_v10  ;;  %v1047_v17 = vld [vmem:[%s5455_s1 + $0x1fc8] sm:$0xff]  ;;  %v1046_v19 = vld [vmem:[%s5455_s1 + $0x1fc0] sm:$0xff] }
  0xe8   :  { %1604 = vmatpush1.msra.mxu1 %v926_v11  ;;  %1534 = vmatprep.subr.mxu0 %v923_v12  ;;  %v915_v20 = vld [vmem:[%s5455_s1 + $0x1ba8] sm:$0xff]  ;;  %v914_v22 = vld [vmem:[%s5455_s1 + $0x1ba0] sm:$0xff] }
  0xe9   :  { %1605 = vmatprep.subr.mxu1 %v1051_v13  ;;  %1535 = vmatpush2.msra.mxu0 %v922_v14  ;;  %v1043_v21 = vld [vmem:[%s5455_s1 + $0x1fa8] sm:$0xff]  ;;  %v1042_v23 = vld [vmem:[%s5455_s1 + $0x1fa0] sm:$0xff]  ;;  %v29_v14 = vld [vmem:[%s5456_s0 + $0x78] sm:$0xff] }
  0xea   :  { %1606 = vmatpush2.msra.mxu1 %v1050_v15  ;;  %1536 = vmatprep.subr.mxu0 %v919_v16  ;;  %v911_v24 = vld [vmem:[%s5455_s1 + $0x1b88] sm:$0xff]  ;;  %v910_v26 = vld [vmem:[%s5455_s1 + $0x1b80] sm:$0xff]  ;;  %v93_v15 = vld [vmem:[%s5455_s1 + $0x1f8] sm:$0xff] }
  0xeb   :  { %1607 = vmatprep.subr.mxu1 %v1047_v17  ;;  %1537 = vmatpush2.msra.mxu0 %v918_v18  ;;  %v1039_v25 = vld [vmem:[%s5455_s1 + $0x1f88] sm:$0xff]  ;;  %v1038_v27 = vld [vmem:[%s5455_s1 + $0x1f80] sm:$0xff]  ;;  %v221_v16 = vld [vmem:[%s5455_s1 + $0x5f8] sm:$0xff] }
  0xec   :  { %1608 = vmatpush2.msra.mxu1 %v1046_v19  ;;  %1538 = vmatprep.subr.mxu0 %v915_v20  ;;  %v907_v28 = vld [vmem:[%s5455_s1 + $0x1b68] sm:$0xff]  ;;  %v906_v30 = vld [vmem:[%s5455_s1 + $0x1b60] sm:$0xff]  ;;  %v28_v17 = vld [vmem:[%s5456_s0 + $0x70] sm:$0xff] }
  0xed   :  { %1609 = vmatprep.subr.mxu1 %v1043_v21  ;;  %1539 = vmatpush2.msra.mxu0 %v914_v22  ;;  %v1035_v29 = vld [vmem:[%s5455_s1 + $0x1f68] sm:$0xff]  ;;  %v1034_v31 = vld [vmem:[%s5455_s1 + $0x1f60] sm:$0xff]  ;;  %v92_v18 = vld [vmem:[%s5455_s1 + $0x1f0] sm:$0xff] }
  0xee   :  { %1610 = vmatpush2.msra.mxu1 %v1042_v23  ;;  %1540 = vmatprep.subr.mxu0 %v911_v24  ;;  %v903_v32 = vld [vmem:[%s5455_s1 + $0x1b48] sm:$0xff]  ;;  %v902_v34 = vld [vmem:[%s5455_s1 + $0x1b40] sm:$0xff]  ;;  %v220_v19 = vld [vmem:[%s5455_s1 + $0x5f0] sm:$0xff] }
  0xef   :  { %1611 = vmatprep.subr.mxu1 %v1039_v25  ;;  %1541 = vmatpush2.msra.mxu0 %v910_v26  ;;  %v1031_v33 = vld [vmem:[%s5455_s1 + $0x1f48] sm:$0xff]  ;;  %v1030_v35 = vld [vmem:[%s5455_s1 + $0x1f40] sm:$0xff]  ;;  %v89_v20 = vld [vmem:[%s5455_s1 + $0x1d8] sm:$0xff] }
  0xf0   :  { %1612 = vmatpush2.msra.mxu1 %v1038_v27  ;;  %1542 = vmatprep.subr.mxu0 %v907_v28  ;;  %v899_v36 = vld [vmem:[%s5455_s1 + $0x1b28] sm:$0xff]  ;;  %v898_v38 = vld [vmem:[%s5455_s1 + $0x1b20] sm:$0xff]  ;;  %v217_v21 = vld [vmem:[%s5455_s1 + $0x5d8] sm:$0xff] }
  0xf1   :  { %1613 = vmatprep.subr.mxu1 %v1035_v29  ;;  %1543 = vmatpush2.msra.mxu0 %v906_v30  ;;  %v1027_v37 = vld [vmem:[%s5455_s1 + $0x1f28] sm:$0xff]  ;;  %v1026_v39 = vld [vmem:[%s5455_s1 + $0x1f20] sm:$0xff]  ;;  %v88_v22 = vld [vmem:[%s5455_s1 + $0x1d0] sm:$0xff] }
  0xf2   :  { %1614 = vmatpush2.msra.mxu1 %v1034_v31  ;;  %1544 = vmatprep.subr.mxu0 %v903_v32  ;;  %v895_v40 = vld [vmem:[%s5455_s1 + $0x1b08] sm:$0xff]  ;;  %v894_v42 = vld [vmem:[%s5455_s1 + $0x1b00] sm:$0xff]  ;;  %v216_v23 = vld [vmem:[%s5455_s1 + $0x5d0] sm:$0xff] }
  0xf3   :  { %1615 = vmatprep.subr.mxu1 %v1031_v33  ;;  %1545 = vmatpush2.msra.mxu0 %v902_v34  ;;  %v1023_v41 = vld [vmem:[%s5455_s1 + $0x1f08] sm:$0xff]  ;;  %v1022_v43 = vld [vmem:[%s5455_s1 + $0x1f00] sm:$0xff]  ;;  %v85_v24 = vld [vmem:[%s5455_s1 + $0x1b8] sm:$0xff] }
  0xf4   :  { %1616 = vmatpush2.msra.mxu1 %v1030_v35  ;;  %1546 = vmatprep.subr.mxu0 %v899_v36  ;;  %v891_v44 = vld [vmem:[%s5455_s1 + $0x1ae8] sm:$0xff]  ;;  %v890_v46 = vld [vmem:[%s5455_s1 + $0x1ae0] sm:$0xff]  ;;  %v213_v25 = vld [vmem:[%s5455_s1 + $0x5b8] sm:$0xff] }
  0xf5   :  { %1617 = vmatprep.subr.mxu1 %v1027_v37  ;;  %1547 = vmatpush2.msra.mxu0 %v898_v38  ;;  %v1019_v45 = vld [vmem:[%s5455_s1 + $0x1ee8] sm:$0xff]  ;;  %v1018_v47 = vld [vmem:[%s5455_s1 + $0x1ee0] sm:$0xff]  ;;  %v84_v26 = vld [vmem:[%s5455_s1 + $0x1b0] sm:$0xff] }
  0xf6   :  { %1618 = vmatpush2.msra.mxu1 %v1026_v39  ;;  %1548 = vmatprep.subr.mxu0 %v895_v40  ;;  %v887_v48 = vld [vmem:[%s5455_s1 + $0x1ac8] sm:$0xff]  ;;  %v886_v50 = vld [vmem:[%s5455_s1 + $0x1ac0] sm:$0xff]  ;;  %v212_v27 = vld [vmem:[%s5455_s1 + $0x5b0] sm:$0xff] }
  0xf7   :  { %1619 = vmatprep.subr.mxu1 %v1023_v41  ;;  %1549 = vmatpush2.msra.mxu0 %v894_v42  ;;  %v1015_v49 = vld [vmem:[%s5455_s1 + $0x1ec8] sm:$0xff]  ;;  %v1014_v51 = vld [vmem:[%s5455_s1 + $0x1ec0] sm:$0xff]  ;;  %v81_v28 = vld [vmem:[%s5455_s1 + $0x198] sm:$0xff] }
  0xf8   :  { %1620 = vmatpush2.msra.mxu1 %v1022_v43  ;;  %1550 = vmatprep.subr.mxu0 %v891_v44  ;;  %v883_v52 = vld [vmem:[%s5455_s1 + $0x1aa8] sm:$0xff]  ;;  %v882_v54 = vld [vmem:[%s5455_s1 + $0x1aa0] sm:$0xff]  ;;  %v209_v29 = vld [vmem:[%s5455_s1 + $0x598] sm:$0xff] }
  0xf9   :  { %1621 = vmatprep.subr.mxu1 %v1019_v45  ;;  %1551 = vmatpush2.msra.mxu0 %v890_v46  ;;  %v1011_v53 = vld [vmem:[%s5455_s1 + $0x1ea8] sm:$0xff]  ;;  %v1010_v55 = vld [vmem:[%s5455_s1 + $0x1ea0] sm:$0xff]  ;;  %v80_v30 = vld [vmem:[%s5455_s1 + $0x190] sm:$0xff] }
  0xfa   :  { %1622 = vmatpush2.msra.mxu1 %v1018_v47  ;;  %1552 = vmatprep.subr.mxu0 %v887_v48  ;;  %v879_v56 = vld [vmem:[%s5455_s1 + $0x1a88] sm:$0xff]  ;;  %v878_v58 = vld [vmem:[%s5455_s1 + $0x1a80] sm:$0xff]  ;;  %v208_v31 = vld [vmem:[%s5455_s1 + $0x590] sm:$0xff] }
  0xfb   :  { %1623 = vmatprep.subr.mxu1 %v1015_v49  ;;  %1553 = vmatpush2.msra.mxu0 %v886_v50  ;;  %v1007_v57 = vld [vmem:[%s5455_s1 + $0x1e88] sm:$0xff]  ;;  %v1006_v59 = vld [vmem:[%s5455_s1 + $0x1e80] sm:$0xff]  ;;  %v77_v32 = vld [vmem:[%s5455_s1 + $0x178] sm:$0xff] }
  0xfc   :  { %1624 = vmatpush2.msra.mxu1 %v1014_v51  ;;  %1554 = vmatprep.subr.mxu0 %v883_v52  ;;  %v875_v60 = vld [vmem:[%s5455_s1 + $0x1a68] sm:$0xff]  ;;  %v874_v62 = vld [vmem:[%s5455_s1 + $0x1a60] sm:$0xff]  ;;  %v205_v33 = vld [vmem:[%s5455_s1 + $0x578] sm:$0xff] }
  0xfd   :  { %1625 = vmatprep.subr.mxu1 %v1011_v53  ;;  %1555 = vmatpush2.msra.mxu0 %v882_v54  ;;  %v1003_v61 = vld [vmem:[%s5455_s1 + $0x1e68] sm:$0xff]  ;;  %v1002_v63 = vld [vmem:[%s5455_s1 + $0x1e60] sm:$0xff]  ;;  %v76_v34 = vld [vmem:[%s5455_s1 + $0x170] sm:$0xff] }
  0xfe   :  { %1626 = vmatpush2.msra.mxu1 %v1010_v55  ;;  %1556 = vmatprep.subr.mxu0 %v879_v56  ;;  %v871_v0 = vld [vmem:[%s5455_s1 + $0x1a48] sm:$0xff]  ;;  %v870_v2 = vld [vmem:[%s5455_s1 + $0x1a40] sm:$0xff]  ;;  %v204_v35 = vld [vmem:[%s5455_s1 + $0x570] sm:$0xff] }
  0xff   :  { %1627 = vmatprep.subr.mxu1 %v1007_v57  ;;  %1557 = vmatpush2.msra.mxu0 %v878_v58  ;;  %v999_v1 = vld [vmem:[%s5455_s1 + $0x1e48] sm:$0xff]  ;;  %v998_v3 = vld [vmem:[%s5455_s1 + $0x1e40] sm:$0xff]  ;;  %v73_v36 = vld [vmem:[%s5455_s1 + $0x158] sm:$0xff] }
 0x100   :  { %1628 = vmatpush2.msra.mxu1 %v1006_v59  ;;  %1558 = vmatprep.subr.mxu0 %v875_v60  ;;  %v867_v4 = vld [vmem:[%s5455_s1 + $0x1a28] sm:$0xff]  ;;  %v866_v6 = vld [vmem:[%s5455_s1 + $0x1a20] sm:$0xff]  ;;  %v201_v37 = vld [vmem:[%s5455_s1 + $0x558] sm:$0xff] }
 0x101   :  { %1629 = vmatprep.subr.mxu1 %v1003_v61  ;;  %1559 = vmatpush2.msra.mxu0 %v874_v62  ;;  %v995_v5 = vld [vmem:[%s5455_s1 + $0x1e28] sm:$0xff]  ;;  %v994_v7 = vld [vmem:[%s5455_s1 + $0x1e20] sm:$0xff]  ;;  %v72_v38 = vld [vmem:[%s5455_s1 + $0x150] sm:$0xff] }
 0x102   :  { %1630 = vmatpush2.msra.mxu1 %v1002_v63  ;;  %1560 = vmatprep.subr.mxu0 %v871_v0  ;;  %v863_v8 = vld [vmem:[%s5455_s1 + $0x1a08] sm:$0xff]  ;;  %v862_v10 = vld [vmem:[%s5455_s1 + $0x1a00] sm:$0xff]  ;;  %v200_v39 = vld [vmem:[%s5455_s1 + $0x550] sm:$0xff] }
 0x103   :  { %1631 = vmatprep.subr.mxu1 %v999_v1  ;;  %1561 = vmatpush2.msra.mxu0 %v870_v2  ;;  %v991_v9 = vld [vmem:[%s5455_s1 + $0x1e08] sm:$0xff]  ;;  %v990_v12 = vld [vmem:[%s5455_s1 + $0x1e00] sm:$0xff]  ;;  %v69_v40 = vld [vmem:[%s5455_s1 + $0x138] sm:$0xff] }
 0x104   :  { %1632 = vmatpush2.msra.mxu1 %v998_v3  ;;  %1562 = vmatprep.subr.mxu0 %v867_v4  ;;  %v27_v11 = vld [vmem:[%s5456_s0 + $0x68] sm:$0xff]  ;;  %v26_v13 = vld [vmem:[%s5456_s0 + $0x60] sm:$0xff]  ;;  %v197_v41 = vld [vmem:[%s5455_s1 + $0x538] sm:$0xff] }
 0x105   :  { %1633 = vmatprep.subr.mxu1 %v995_v5  ;;  %1563 = vmatpush2.msra.mxu0 %v866_v6  ;;  %v68_v42 = vld [vmem:[%s5455_s1 + $0x130] sm:$0xff]  ;;  %v65_v44 = vld [vmem:[%s5455_s1 + $0x118] sm:$0xff] }
 0x106   :  { %1634 = vmatpush2.msra.mxu1 %v994_v7  ;;  %1564 = vmatprep.subr.mxu0 %v863_v8  ;;  %v196_v43 = vld [vmem:[%s5455_s1 + $0x530] sm:$0xff]  ;;  %v193_v45 = vld [vmem:[%s5455_s1 + $0x518] sm:$0xff] }
 0x107   :  { %1635 = vmatprep.subr.mxu1 %v991_v9  ;;  %1565 = vmatpush2.msra.mxu0 %v862_v10  ;;  %v64_v46 = vld [vmem:[%s5455_s1 + $0x110] sm:$0xff]  ;;  %v61_v48 = vld [vmem:[%s5455_s1 + $0xf8] sm:$0xff] }
 0x108   :  { %1566 = vmatprep.mubr.f32.mxu0 %v27_v11  ;;  %1636 = vmatpush2.msra.mxu1 %v990_v12  ;;  %v192_v47 = vld [vmem:[%s5455_s1 + $0x510] sm:$0xff]  ;;  %v189_v49 = vld [vmem:[%s5455_s1 + $0x4f8] sm:$0xff] }
 0x109   :  { %1567 = vmatmul.mubr.f32.vlgmr.msra.gmra.mxu0 %v26_v13  ;;  %1637 = vmatprep.mubr.f32.mxu1 %v29_v14  ;;  %v60_v50 = vld [vmem:[%s5455_s1 + $0xf0] sm:$0xff]  ;;  %v57_v52 = vld [vmem:[%s5455_s1 + $0xd8] sm:$0xff] }
 0x10a   :  { %1644 = vmatprep.subr.mxu0 %v93_v15  ;;  %1715 = vmatprep.subr.mxu1 %v221_v16  ;;  %v188_v51 = vld [vmem:[%s5455_s1 + $0x4f0] sm:$0xff]  ;;  %v185_v53 = vld [vmem:[%s5455_s1 + $0x4d8] sm:$0xff] }
 0x10b   :  { %1638 = vmatmul.mubr.f32.vlgmr.msra.gmra.mxu1 %v28_v17  ;;  %1645 = vmatpush1.msra.mxu0 %v92_v18  ;;  %v56_v54 = vld [vmem:[%s5455_s1 + $0xd0] sm:$0xff]  ;;  %v53_v56 = vld [vmem:[%s5455_s1 + $0xb8] sm:$0xff] }
 0x10c   :  { %1716 = vmatpush1.msra.mxu1 %v220_v19  ;;  %1646 = vmatprep.subr.mxu0 %v89_v20  ;;  %v184_v55 = vld [vmem:[%s5455_s1 + $0x4d0] sm:$0xff]  ;;  %v181_v57 = vld [vmem:[%s5455_s1 + $0x4b8] sm:$0xff] }
 0x10d   :  { %1717 = vmatprep.subr.mxu1 %v217_v21  ;;  %1647 = vmatpush1.msra.mxu0 %v88_v22  ;;  %v52_v58 = vld [vmem:[%s5455_s1 + $0xb0] sm:$0xff]  ;;  %v49_v60 = vld [vmem:[%s5455_s1 + $0x98] sm:$0xff] }
 0x10e   :  { %1718 = vmatpush1.msra.mxu1 %v216_v23  ;;  %1648 = vmatprep.subr.mxu0 %v85_v24  ;;  %v180_v59 = vld [vmem:[%s5455_s1 + $0x4b0] sm:$0xff]  ;;  %v177_v61 = vld [vmem:[%s5455_s1 + $0x498] sm:$0xff] }
 0x10f   :  { %1719 = vmatprep.subr.mxu1 %v213_v25  ;;  %1649 = vmatpush1.msra.mxu0 %v84_v26  ;;  %v48_v62 = vld [vmem:[%s5455_s1 + $0x90] sm:$0xff]  ;;  %v45_v0 = vld [vmem:[%s5455_s1 + $0x78] sm:$0xff] }
 0x110   :  { %1720 = vmatpush1.msra.mxu1 %v212_v27  ;;  %1650 = vmatprep.subr.mxu0 %v81_v28  ;;  %v176_v63 = vld [vmem:[%s5455_s1 + $0x490] sm:$0xff]  ;;  %v173_v1 = vld [vmem:[%s5455_s1 + $0x478] sm:$0xff] }
 0x111   :  { %1721 = vmatprep.subr.mxu1 %v209_v29  ;;  %1651 = vmatpush1.msra.mxu0 %v80_v30  ;;  %v44_v2 = vld [vmem:[%s5455_s1 + $0x70] sm:$0xff]  ;;  %v41_v4 = vld [vmem:[%s5455_s1 + $0x58] sm:$0xff] }
 0x112   :  { %1722 = vmatpush1.msra.mxu1 %v208_v31  ;;  %1652 = vmatprep.subr.mxu0 %v77_v32  ;;  %v172_v3 = vld [vmem:[%s5455_s1 + $0x470] sm:$0xff]  ;;  %v169_v5 = vld [vmem:[%s5455_s1 + $0x458] sm:$0xff] }
 0x113   :  { %1723 = vmatprep.subr.mxu1 %v205_v33  ;;  %1653 = vmatpush1.msra.mxu0 %v76_v34  ;;  %v40_v6 = vld [vmem:[%s5455_s1 + $0x50] sm:$0xff]  ;;  %v37_v8 = vld [vmem:[%s5455_s1 + $0x38] sm:$0xff] }
 0x114   :  { %1724 = vmatpush1.msra.mxu1 %v204_v35  ;;  %1654 = vmatprep.subr.mxu0 %v73_v36  ;;  %v168_v7 = vld [vmem:[%s5455_s1 + $0x450] sm:$0xff]  ;;  %v165_v9 = vld [vmem:[%s5455_s1 + $0x438] sm:$0xff] }
 0x115   :  { %1725 = vmatprep.subr.mxu1 %v201_v37  ;;  %1655 = vmatpush1.msra.mxu0 %v72_v38  ;;  %v36_v10 = vld [vmem:[%s5455_s1 + $0x30] sm:$0xff]  ;;  %v33_v12 = vld [vmem:[%s5455_s1 + $0x18] sm:$0xff] }
 0x116   :  { %1726 = vmatpush1.msra.mxu1 %v200_v39  ;;  %1656 = vmatprep.subr.mxu0 %v69_v40  ;;  %v164_v11 = vld [vmem:[%s5455_s1 + $0x430] sm:$0xff]  ;;  %v161_v13 = vld [vmem:[%s5455_s1 + $0x418] sm:$0xff] }
 0x117   :  { %1727 = vmatprep.subr.mxu1 %v197_v41  ;;  %1657 = vmatpush1.msra.mxu0 %v68_v42  ;;  %v32_v14 = vld [vmem:[%s5455_s1 + $0x10] sm:$0xff]  ;;  %v157_v16 = vld [vmem:[%s5455_s1 + $0x3f8] sm:$0xff] }
 0x118   :  { %1728 = vmatpush1.msra.mxu1 %v196_v43  ;;  %1658 = vmatprep.subr.mxu0 %v65_v44  ;;  %v160_v15 = vld [vmem:[%s5455_s1 + $0x410] sm:$0xff]  ;;  %v285_v17 = vld [vmem:[%s5455_s1 + $0x7f8] sm:$0xff] }
 0x119   :  { %1729 = vmatprep.subr.mxu1 %v193_v45  ;;  %1659 = vmatpush1.msra.mxu0 %v64_v46  ;;  %v156_v18 = vld [vmem:[%s5455_s1 + $0x3f0] sm:$0xff]  ;;  %v153_v20 = vld [vmem:[%s5455_s1 + $0x3d8] sm:$0xff] }
 0x11a   :  { %1730 = vmatpush1.msra.mxu1 %v192_v47  ;;  %1660 = vmatprep.subr.mxu0 %v61_v48  ;;  %v284_v19 = vld [vmem:[%s5455_s1 + $0x7f0] sm:$0xff]  ;;  %v281_v21 = vld [vmem:[%s5455_s1 + $0x7d8] sm:$0xff] }
 0x11b   :  { %1731 = vmatprep.subr.mxu1 %v189_v49  ;;  %1661 = vmatpush1.msra.mxu0 %v60_v50  ;;  %v152_v22 = vld [vmem:[%s5455_s1 + $0x3d0] sm:$0xff]  ;;  %v149_v24 = vld [vmem:[%s5455_s1 + $0x3b8] sm:$0xff] }
 0x11c   :  { %1732 = vmatpush1.msra.mxu1 %v188_v51  ;;  %1662 = vmatprep.subr.mxu0 %v57_v52  ;;  %v280_v23 = vld [vmem:[%s5455_s1 + $0x7d0] sm:$0xff]  ;;  %v277_v25 = vld [vmem:[%s5455_s1 + $0x7b8] sm:$0xff] }
 0x11d   :  { %1733 = vmatprep.subr.mxu1 %v185_v53  ;;  %1663 = vmatpush1.msra.mxu0 %v56_v54  ;;  %v148_v26 = vld [vmem:[%s5455_s1 + $0x3b0] sm:$0xff]  ;;  %v145_v28 = vld [vmem:[%s5455_s1 + $0x398] sm:$0xff] }
 0x11e   :  { %1734 = vmatpush1.msra.mxu1 %v184_v55  ;;  %1664 = vmatprep.subr.mxu0 %v53_v56  ;;  %v276_v27 = vld [vmem:[%s5455_s1 + $0x7b0] sm:$0xff]  ;;  %v273_v29 = vld [vmem:[%s5455_s1 + $0x798] sm:$0xff] }
 0x11f   :  { %1735 = vmatprep.subr.mxu1 %v181_v57  ;;  %1665 = vmatpush1.msra.mxu0 %v52_v58  ;;  %v144_v30 = vld [vmem:[%s5455_s1 + $0x390] sm:$0xff]  ;;  %v141_v32 = vld [vmem:[%s5455_s1 + $0x378] sm:$0xff] }
 0x120   :  { %1736 = vmatpush1.msra.mxu1 %v180_v59  ;;  %1666 = vmatprep.subr.mxu0 %v49_v60  ;;  %v272_v31 = vld [vmem:[%s5455_s1 + $0x790] sm:$0xff]  ;;  %v269_v33 = vld [vmem:[%s5455_s1 + $0x778] sm:$0xff] }
 0x121   :  { %1737 = vmatprep.subr.mxu1 %v177_v61  ;;  %1667 = vmatpush1.msra.mxu0 %v48_v62  ;;  %v140_v34 = vld [vmem:[%s5455_s1 + $0x370] sm:$0xff]  ;;  %v137_v36 = vld [vmem:[%s5455_s1 + $0x358] sm:$0xff] }
 0x122   :  { %1738 = vmatpush1.msra.mxu1 %v176_v63  ;;  %1668 = vmatprep.subr.mxu0 %v45_v0  ;;  %v268_v35 = vld [vmem:[%s5455_s1 + $0x770] sm:$0xff]  ;;  %v265_v37 = vld [vmem:[%s5455_s1 + $0x758] sm:$0xff] }
 0x123   :  { %1739 = vmatprep.subr.mxu1 %v173_v1  ;;  %1669 = vmatpush1.msra.mxu0 %v44_v2  ;;  %v136_v38 = vld [vmem:[%s5455_s1 + $0x350] sm:$0xff]  ;;  %v133_v40 = vld [vmem:[%s5455_s1 + $0x338] sm:$0xff] }
 0x124   :  { %1740 = vmatpush1.msra.mxu1 %v172_v3  ;;  %1670 = vmatprep.subr.mxu0 %v41_v4  ;;  %v264_v39 = vld [vmem:[%s5455_s1 + $0x750] sm:$0xff]  ;;  %v261_v41 = vld [vmem:[%s5455_s1 + $0x738] sm:$0xff] }
 0x125   :  { %1741 = vmatprep.subr.mxu1 %v169_v5  ;;  %1671 = vmatpush1.msra.mxu0 %v40_v6  ;;  %v132_v42 = vld [vmem:[%s5455_s1 + $0x330] sm:$0xff]  ;;  %v129_v44 = vld [vmem:[%s5455_s1 + $0x318] sm:$0xff] }
 0x126   :  { %1742 = vmatpush1.msra.mxu1 %v168_v7  ;;  %1672 = vmatprep.subr.mxu0 %v37_v8  ;;  %v260_v43 = vld [vmem:[%s5455_s1 + $0x730] sm:$0xff]  ;;  %v257_v45 = vld [vmem:[%s5455_s1 + $0x718] sm:$0xff] }
 0x127   :  { %1743 = vmatprep.subr.mxu1 %v165_v9  ;;  %1673 = vmatpush1.msra.mxu0 %v36_v10  ;;  %v128_v46 = vld [vmem:[%s5455_s1 + $0x310] sm:$0xff]  ;;  %v125_v48 = vld [vmem:[%s5455_s1 + $0x2f8] sm:$0xff] }
 0x128   :  { %1744 = vmatpush1.msra.mxu1 %v164_v11  ;;  %1674 = vmatprep.subr.mxu0 %v33_v12  ;;  %v256_v47 = vld [vmem:[%s5455_s1 + $0x710] sm:$0xff]  ;;  %v253_v49 = vld [vmem:[%s5455_s1 + $0x6f8] sm:$0xff] }
 0x129   :  { %1745 = vmatprep.subr.mxu1 %v161_v13  ;;  %1675 = vmatpush1.msra.mxu0 %v32_v14  ;;  %v124_v50 = vld [vmem:[%s5455_s1 + $0x2f0] sm:$0xff]  ;;  %v121_v52 = vld [vmem:[%s5455_s1 + $0x2d8] sm:$0xff] }
 0x12a   :  { %1746 = vmatpush1.msra.mxu1 %v160_v15  ;;  %1676 = vmatprep.subr.mxu0 %v157_v16  ;;  %v252_v51 = vld [vmem:[%s5455_s1 + $0x6f0] sm:$0xff]  ;;  %v249_v53 = vld [vmem:[%s5455_s1 + $0x6d8] sm:$0xff] }
 0x12b   :  { %1747 = vmatprep.subr.mxu1 %v285_v17  ;;  %1677 = vmatpush2.msra.mxu0 %v156_v18  ;;  %v120_v54 = vld [vmem:[%s5455_s1 + $0x2d0] sm:$0xff]  ;;  %v117_v56 = vld [vmem:[%s5455_s1 + $0x2b8] sm:$0xff]  ;;  %v2224_v17 = vld [vmem:[%s5456_s0 + $0x8] sm:$0xff] }
 0x12c   :  { %1748 = vmatpush2.msra.mxu1 %v284_v19  ;;  %1678 = vmatprep.subr.mxu0 %v153_v20  ;;  %v248_v55 = vld [vmem:[%s5455_s1 + $0x6d0] sm:$0xff]  ;;  %v245_v57 = vld [vmem:[%s5455_s1 + $0x6b8] sm:$0xff]  ;;  %v2225_v19 = vld [vmem:[%s5456_s0] sm:$0xff] }
 0x12d   :  { %1749 = vmatprep.subr.mxu1 %v281_v21  ;;  %1679 = vmatpush2.msra.mxu0 %v152_v22  ;;  %v116_v58 = vld [vmem:[%s5455_s1 + $0x2b0] sm:$0xff]  ;;  %v113_v60 = vld [vmem:[%s5455_s1 + $0x298] sm:$0xff] }
 0x12e   :  { %1750 = vmatpush2.msra.mxu1 %v280_v23  ;;  %1680 = vmatprep.subr.mxu0 %v149_v24  ;;  %v244_v59 = vld [vmem:[%s5455_s1 + $0x6b0] sm:$0xff]  ;;  %v241_v61 = vld [vmem:[%s5455_s1 + $0x698] sm:$0xff] }
 0x12f   :  { %1751 = vmatprep.subr.mxu1 %v277_v25  ;;  %1681 = vmatpush2.msra.mxu0 %v148_v26  ;;  %v112_v62 = vld [vmem:[%s5455_s1 + $0x290] sm:$0xff]  ;;  %v109_v0 = vld [vmem:[%s5455_s1 + $0x278] sm:$0xff] }
 0x130   :  { %1752 = vmatpush2.msra.mxu1 %v276_v27  ;;  %1682 = vmatprep.subr.mxu0 %v145_v28  ;;  %v240_v63 = vld [vmem:[%s5455_s1 + $0x690] sm:$0xff]  ;;  %v237_v1 = vld [vmem:[%s5455_s1 + $0x678] sm:$0xff] }
 0x131   :  { %1753 = vmatprep.subr.mxu1 %v273_v29  ;;  %1683 = vmatpush2.msra.mxu0 %v144_v30  ;;  %v108_v2 = vld [vmem:[%s5455_s1 + $0x270] sm:$0xff]  ;;  %v105_v4 = vld [vmem:[%s5455_s1 + $0x258] sm:$0xff] }
 0x132   :  { %1754 = vmatpush2.msra.mxu1 %v272_v31  ;;  %1684 = vmatprep.subr.mxu0 %v141_v32  ;;  %v236_v3 = vld [vmem:[%s5455_s1 + $0x670] sm:$0xff]  ;;  %v233_v5 = vld [vmem:[%s5455_s1 + $0x658] sm:$0xff] }
 0x133   :  { %1755 = vmatprep.subr.mxu1 %v269_v33  ;;  %1685 = vmatpush2.msra.mxu0 %v140_v34  ;;  %v104_v6 = vld [vmem:[%s5455_s1 + $0x250] sm:$0xff]  ;;  %v101_v8 = vld [vmem:[%s5455_s1 + $0x238] sm:$0xff] }
 0x134   :  { %1756 = vmatpush2.msra.mxu1 %v268_v35  ;;  %1686 = vmatprep.subr.mxu0 %v137_v36  ;;  %v232_v7 = vld [vmem:[%s5455_s1 + $0x650] sm:$0xff]  ;;  %v229_v9 = vld [vmem:[%s5455_s1 + $0x638] sm:$0xff] }
 0x135   :  { %1757 = vmatprep.subr.mxu1 %v265_v37  ;;  %1687 = vmatpush2.msra.mxu0 %v136_v38  ;;  %v100_v10 = vld [vmem:[%s5455_s1 + $0x230] sm:$0xff]  ;;  %v97_v12 = vld [vmem:[%s5455_s1 + $0x218] sm:$0xff] }
 0x136   :  { %1758 = vmatpush2.msra.mxu1 %v264_v39  ;;  %1688 = vmatprep.subr.mxu0 %v133_v40  ;;  %v228_v11 = vld [vmem:[%s5455_s1 + $0x630] sm:$0xff]  ;;  %v225_v13 = vld [vmem:[%s5455_s1 + $0x618] sm:$0xff] }
 0x137   :  { %1759 = vmatprep.subr.mxu1 %v261_v41  ;;  %1689 = vmatpush2.msra.mxu0 %v132_v42  ;;  %v96_v14 = vld [vmem:[%s5455_s1 + $0x210] sm:$0xff]  ;;  %v349_v16 = vld [vmem:[%s5455_s1 + $0x9f8] sm:$0xff] }
 0x138   :  { %1760 = vmatpush2.msra.mxu1 %v260_v43  ;;  %1690 = vmatprep.subr.mxu0 %v129_v44  ;;  %v224_v15 = vld [vmem:[%s5455_s1 + $0x610] sm:$0xff]  ;;  %v477_v18 = vld [vmem:[%s5455_s1 + $0xdf8] sm:$0xff] }
 0x139   :  { %1761 = vmatprep.subr.mxu1 %v257_v45  ;;  %1691 = vmatpush2.msra.mxu0 %v128_v46  ;;  %v348_v20 = vld [vmem:[%s5455_s1 + $0x9f0] sm:$0xff]  ;;  %v2226_v22 = vld [vmem:[%s5456_s0 + $0x18] sm:$0xff] }
 0x13a   :  { %1762 = vmatpush2.msra.mxu1 %v256_v47  ;;  %1692 = vmatprep.subr.mxu0 %v125_v48  ;;  %v476_v21 = vld [vmem:[%s5455_s1 + $0xdf0] sm:$0xff]  ;;  %v345_v23 = vld [vmem:[%s5455_s1 + $0x9d8] sm:$0xff] }
 0x13b   :  { %1763 = vmatprep.subr.mxu1 %v253_v49  ;;  %1693 = vmatpush2.msra.mxu0 %v124_v50  ;;  %v473_v24 = vld [vmem:[%s5455_s1 + $0xdd8] sm:$0xff]  ;;  %v2227_v25 = vld [vmem:[%s5456_s0 + $0x10] sm:$0xff] }
 0x13c   :  { %1764 = vmatpush2.msra.mxu1 %v252_v51  ;;  %1694 = vmatprep.subr.mxu0 %v121_v52  ;;  %v344_v26 = vld [vmem:[%s5455_s1 + $0x9d0] sm:$0xff]  ;;  %v341_v28 = vld [vmem:[%s5455_s1 + $0x9b8] sm:$0xff] }
 0x13d   :  { %1765 = vmatprep.subr.mxu1 %v249_v53  ;;  %1695 = vmatpush2.msra.mxu0 %v120_v54  ;;  %v472_v27 = vld [vmem:[%s5455_s1 + $0xdd0] sm:$0xff]  ;;  %v469_v29 = vld [vmem:[%s5455_s1 + $0xdb8] sm:$0xff] }
 0x13e   :  { %1766 = vmatpush2.msra.mxu1 %v248_v55  ;;  %1696 = vmatprep.subr.mxu0 %v117_v56  ;;  %v340_v30 = vld [vmem:[%s5455_s1 + $0x9b0] sm:$0xff]  ;;  %v337_v32 = vld [vmem:[%s5455_s1 + $0x998] sm:$0xff] }
 0x13f   :  { %1767 = vmatprep.subr.mxu1 %v245_v57  ;;  %1697 = vmatpush2.msra.mxu0 %v116_v58  ;;  %v468_v31 = vld [vmem:[%s5455_s1 + $0xdb0] sm:$0xff]  ;;  %v465_v33 = vld [vmem:[%s5455_s1 + $0xd98] sm:$0xff] }
 0x140   :  { %1768 = vmatpush2.msra.mxu1 %v244_v59  ;;  %1698 = vmatprep.subr.mxu0 %v113_v60  ;;  %v336_v34 = vld [vmem:[%s5455_s1 + $0x990] sm:$0xff]  ;;  %v333_v36 = vld [vmem:[%s5455_s1 + $0x978] sm:$0xff] }
 0x141   :  { %1769 = vmatprep.subr.mxu1 %v241_v61  ;;  %1699 = vmatpush2.msra.mxu0 %v112_v62  ;;  %v464_v35 = vld [vmem:[%s5455_s1 + $0xd90] sm:$0xff]  ;;  %v461_v37 = vld [vmem:[%s5455_s1 + $0xd78] sm:$0xff] }
 0x142   :  { %1770 = vmatpush2.msra.mxu1 %v240_v63  ;;  %1700 = vmatprep.subr.mxu0 %v109_v0  ;;  %v332_v38 = vld [vmem:[%s5455_s1 + $0x970] sm:$0xff]  ;;  %v329_v40 = vld [vmem:[%s5455_s1 + $0x958] sm:$0xff] }
 0x143   :  { %1771 = vmatprep.subr.mxu1 %v237_v1  ;;  %1701 = vmatpush2.msra.mxu0 %v108_v2  ;;  %v460_v39 = vld [vmem:[%s5455_s1 + $0xd70] sm:$0xff]  ;;  %v457_v41 = vld [vmem:[%s5455_s1 + $0xd58] sm:$0xff] }
 0x144   :  { %1772 = vmatpush2.msra.mxu1 %v236_v3  ;;  %1702 = vmatprep.subr.mxu0 %v105_v4  ;;  %v328_v42 = vld [vmem:[%s5455_s1 + $0x950] sm:$0xff]  ;;  %v325_v44 = vld [vmem:[%s5455_s1 + $0x938] sm:$0xff] }
 0x145   :  { %1773 = vmatprep.subr.mxu1 %v233_v5  ;;  %1703 = vmatpush2.msra.mxu0 %v104_v6  ;;  %v456_v43 = vld [vmem:[%s5455_s1 + $0xd50] sm:$0xff]  ;;  %v453_v45 = vld [vmem:[%s5455_s1 + $0xd38] sm:$0xff] }
 0x146   :  { %1774 = vmatpush2.msra.mxu1 %v232_v7  ;;  %1704 = vmatprep.subr.mxu0 %v101_v8  ;;  %v324_v46 = vld [vmem:[%s5455_s1 + $0x930] sm:$0xff]  ;;  %v321_v48 = vld [vmem:[%s5455_s1 + $0x918] sm:$0xff] }
 0x147   :  { %1775 = vmatprep.subr.mxu1 %v229_v9  ;;  %1705 = vmatpush2.msra.mxu0 %v100_v10  ;;  %v452_v47 = vld [vmem:[%s5455_s1 + $0xd30] sm:$0xff]  ;;  %v449_v49 = vld [vmem:[%s5455_s1 + $0xd18] sm:$0xff] }
 0x148   :  { %1776 = vmatpush2.msra.mxu1 %v228_v11  ;;  %1706 = vmatprep.subr.mxu0 %v97_v12  ;;  %v320_v50 = vld [vmem:[%s5455_s1 + $0x910] sm:$0xff]  ;;  %v317_v52 = vld [vmem:[%s5455_s1 + $0x8f8] sm:$0xff] }
 0x149   :  { %1777 = vmatprep.subr.mxu1 %v225_v13  ;;  %1707 = vmatpush2.msra.mxu0 %v96_v14  ;;  %v448_v51 = vld [vmem:[%s5455_s1 + $0xd10] sm:$0xff]  ;;  %v445_v53 = vld [vmem:[%s5455_s1 + $0xcf8] sm:$0xff] }
 0x14a   :  { %1708 = vmatprep.mubr.f32.mxu0 %v2224_v17  ;;  %1778 = vmatpush2.msra.mxu1 %v224_v15  ;;  %v316_v54 = vld [vmem:[%s5455_s1 + $0x8f0] sm:$0xff]  ;;  %v313_v56 = vld [vmem:[%s5455_s1 + $0x8d8] sm:$0xff] }
 0x14b   :  { %1709 = vmatmul.mubr.f32.vlgmr.msra.gmra.mxu0 %v2225_v19  ;;  %1779 = vmatprep.mubr.f32.mxu1 %v2226_v22  ;;  %v444_v55 = vld [vmem:[%s5455_s1 + $0xcf0] sm:$0xff]  ;;  %v441_v57 = vld [vmem:[%s5455_s1 + $0xcd8] sm:$0xff] }
 0x14c   :  { %1786 = vmatprep.subr.mxu0 %v349_v16  ;;  %1857 = vmatprep.subr.mxu1 %v477_v18  ;;  %v312_v58 = vld [vmem:[%s5455_s1 + $0x8d0] sm:$0xff]  ;;  %v309_v60 = vld [vmem:[%s5455_s1 + $0x8b8] sm:$0xff] }
 0x14d   :  { %1780 = vmatmul.mubr.f32.vlgmr.msra.gmra.mxu1 %v2227_v25  ;;  %1787 = vmatpush1.msra.mxu0 %v348_v20  ;;  %v440_v59 = vld [vmem:[%s5455_s1 + $0xcd0] sm:$0xff]  ;;  %v437_v61 = vld [vmem:[%s5455_s1 + $0xcb8] sm:$0xff] }
 0x14e   :  { %1858 = vmatpush1.msra.mxu1 %v476_v21  ;;  %1788 = vmatprep.subr.mxu0 %v345_v23  ;;  %v308_v62 = vld [vmem:[%s5455_s1 + $0x8b0] sm:$0xff]  ;;  %v305_v0 = vld [vmem:[%s5455_s1 + $0x898] sm:$0xff] }
 0x14f   :  { %1859 = vmatprep.subr.mxu1 %v473_v24  ;;  %1789 = vmatpush1.msra.mxu0 %v344_v26  ;;  %v436_v63 = vld [vmem:[%s5455_s1 + $0xcb0] sm:$0xff]  ;;  %v433_v1 = vld [vmem:[%s5455_s1 + $0xc98] sm:$0xff] }
 0x150   :  { %1860 = vmatpush1.msra.mxu1 %v472_v27  ;;  %1790 = vmatprep.subr.mxu0 %v341_v28  ;;  %v304_v2 = vld [vmem:[%s5455_s1 + $0x890] sm:$0xff]  ;;  %v301_v4 = vld [vmem:[%s5455_s1 + $0x878] sm:$0xff] }
 0x151   :  { %1861 = vmatprep.subr.mxu1 %v469_v29  ;;  %1791 = vmatpush1.msra.mxu0 %v340_v30  ;;  %v432_v3 = vld [vmem:[%s5455_s1 + $0xc90] sm:$0xff]  ;;  %v429_v5 = vld [vmem:[%s5455_s1 + $0xc78] sm:$0xff] }
 0x152   :  { %1862 = vmatpush1.msra.mxu1 %v468_v31  ;;  %1792 = vmatprep.subr.mxu0 %v337_v32  ;;  %v300_v6 = vld [vmem:[%s5455_s1 + $0x870] sm:$0xff]  ;;  %v297_v8 = vld [vmem:[%s5455_s1 + $0x858] sm:$0xff] }
 0x153   :  { %1863 = vmatprep.subr.mxu1 %v465_v33  ;;  %1793 = vmatpush1.msra.mxu0 %v336_v34  ;;  %v428_v7 = vld [vmem:[%s5455_s1 + $0xc70] sm:$0xff]  ;;  %v425_v9 = vld [vmem:[%s5455_s1 + $0xc58] sm:$0xff] }
 0x154   :  { %1864 = vmatpush1.msra.mxu1 %v464_v35  ;;  %1794 = vmatprep.subr.mxu0 %v333_v36  ;;  %v296_v10 = vld [vmem:[%s5455_s1 + $0x850] sm:$0xff]  ;;  %v293_v12 = vld [vmem:[%s5455_s1 + $0x838] sm:$0xff] }
 0x155   :  { %1865 = vmatprep.subr.mxu1 %v461_v37  ;;  %1795 = vmatpush1.msra.mxu0 %v332_v38  ;;  %v424_v11 = vld [vmem:[%s5455_s1 + $0xc50] sm:$0xff]  ;;  %v421_v13 = vld [vmem:[%s5455_s1 + $0xc38] sm:$0xff] }
 0x156   :  { %1866 = vmatpush1.msra.mxu1 %v460_v39  ;;  %1796 = vmatprep.subr.mxu0 %v329_v40  ;;  %v292_v14 = vld [vmem:[%s5455_s1 + $0x830] sm:$0xff]  ;;  %v289_v16 = vld [vmem:[%s5455_s1 + $0x818] sm:$0xff] }
 0x157   :  { %1867 = vmatprep.subr.mxu1 %v457_v41  ;;  %1797 = vmatpush1.msra.mxu0 %v328_v42  ;;  %v420_v15 = vld [vmem:[%s5455_s1 + $0xc30] sm:$0xff]  ;;  %v417_v17 = vld [vmem:[%s5455_s1 + $0xc18] sm:$0xff] }
 0x158   :  { %1868 = vmatpush1.msra.mxu1 %v456_v43  ;;  %1798 = vmatprep.subr.mxu0 %v325_v44  ;;  %v288_v18 = vld [vmem:[%s5455_s1 + $0x810] sm:$0xff]  ;;  %v413_v20 = vld [vmem:[%s5455_s1 + $0xbf8] sm:$0xff] }
 0x159   :  { %1869 = vmatprep.subr.mxu1 %v453_v45  ;;  %1799 = vmatpush1.msra.mxu0 %v324_v46  ;;  %v416_v19 = vld [vmem:[%s5455_s1 + $0xc10] sm:$0xff]  ;;  %v541_v21 = vld [vmem:[%s5455_s1 + $0xff8] sm:$0xff] }
 0x15a   :  { %1870 = vmatpush1.msra.mxu1 %v452_v47  ;;  %1800 = vmatprep.subr.mxu0 %v321_v48  ;;  %v412_v22 = vld [vmem:[%s5455_s1 + $0xbf0] sm:$0xff]  ;;  %v409_v24 = vld [vmem:[%s5455_s1 + $0xbd8] sm:$0xff] }
 0x15b   :  { %1871 = vmatprep.subr.mxu1 %v449_v49  ;;  %1801 = vmatpush1.msra.mxu0 %v320_v50  ;;  %v540_v23 = vld [vmem:[%s5455_s1 + $0xff0] sm:$0xff]  ;;  %v537_v25 = vld [vmem:[%s5455_s1 + $0xfd8] sm:$0xff] }
 0x15c   :  { %1872 = vmatpush1.msra.mxu1 %v448_v51  ;;  %1802 = vmatprep.subr.mxu0 %v317_v52  ;;  %v408_v26 = vld [vmem:[%s5455_s1 + $0xbd0] sm:$0xff]  ;;  %v405_v28 = vld [vmem:[%s5455_s1 + $0xbb8] sm:$0xff] }
 0x15d   :  { %1873 = vmatprep.subr.mxu1 %v445_v53  ;;  %1803 = vmatpush1.msra.mxu0 %v316_v54  ;;  %v536_v27 = vld [vmem:[%s5455_s1 + $0xfd0] sm:$0xff]  ;;  %v533_v29 = vld [vmem:[%s5455_s1 + $0xfb8] sm:$0xff] }
 0x15e   :  { %1874 = vmatpush1.msra.mxu1 %v444_v55  ;;  %1804 = vmatprep.subr.mxu0 %v313_v56  ;;  %v404_v30 = vld [vmem:[%s5455_s1 + $0xbb0] sm:$0xff]  ;;  %v401_v32 = vld [vmem:[%s5455_s1 + $0xb98] sm:$0xff] }
 0x15f   :  { %1875 = vmatprep.subr.mxu1 %v441_v57  ;;  %1805 = vmatpush1.msra.mxu0 %v312_v58  ;;  %v532_v31 = vld [vmem:[%s5455_s1 + $0xfb0] sm:$0xff]  ;;  %v529_v33 = vld [vmem:[%s5455_s1 + $0xf98] sm:$0xff] }
 0x160   :  { %1876 = vmatpush1.msra.mxu1 %v440_v59  ;;  %1806 = vmatprep.subr.mxu0 %v309_v60  ;;  %v400_v34 = vld [vmem:[%s5455_s1 + $0xb90] sm:$0xff]  ;;  %v397_v36 = vld [vmem:[%s5455_s1 + $0xb78] sm:$0xff] }
 0x161   :  { %1877 = vmatprep.subr.mxu1 %v437_v61  ;;  %1807 = vmatpush1.msra.mxu0 %v308_v62  ;;  %v528_v35 = vld [vmem:[%s5455_s1 + $0xf90] sm:$0xff]  ;;  %v525_v37 = vld [vmem:[%s5455_s1 + $0xf78] sm:$0xff] }
 0x162   :  { %1878 = vmatpush1.msra.mxu1 %v436_v63  ;;  %1808 = vmatprep.subr.mxu0 %v305_v0  ;;  %v396_v38 = vld [vmem:[%s5455_s1 + $0xb70] sm:$0xff]  ;;  %v393_v40 = vld [vmem:[%s5455_s1 + $0xb58] sm:$0xff] }
 0x163   :  { %1879 = vmatprep.subr.mxu1 %v433_v1  ;;  %1809 = vmatpush1.msra.mxu0 %v304_v2  ;;  %v524_v39 = vld [vmem:[%s5455_s1 + $0xf70] sm:$0xff]  ;;  %v521_v41 = vld [vmem:[%s5455_s1 + $0xf58] sm:$0xff] }
 0x164   :  { %1880 = vmatpush1.msra.mxu1 %v432_v3  ;;  %1810 = vmatprep.subr.mxu0 %v301_v4  ;;  %v392_v42 = vld [vmem:[%s5455_s1 + $0xb50] sm:$0xff]  ;;  %v389_v44 = vld [vmem:[%s5455_s1 + $0xb38] sm:$0xff] }
 0x165   :  { %1881 = vmatprep.subr.mxu1 %v429_v5  ;;  %1811 = vmatpush1.msra.mxu0 %v300_v6  ;;  %v520_v43 = vld [vmem:[%s5455_s1 + $0xf50] sm:$0xff]  ;;  %v517_v45 = vld [vmem:[%s5455_s1 + $0xf38] sm:$0xff] }
 0x166   :  { %1882 = vmatpush1.msra.mxu1 %v428_v7  ;;  %1812 = vmatprep.subr.mxu0 %v297_v8  ;;  %v388_v46 = vld [vmem:[%s5455_s1 + $0xb30] sm:$0xff]  ;;  %v385_v48 = vld [vmem:[%s5455_s1 + $0xb18] sm:$0xff] }
 0x167   :  { %1883 = vmatprep.subr.mxu1 %v425_v9  ;;  %1813 = vmatpush1.msra.mxu0 %v296_v10  ;;  %v516_v47 = vld [vmem:[%s5455_s1 + $0xf30] sm:$0xff]  ;;  %v513_v49 = vld [vmem:[%s5455_s1 + $0xf18] sm:$0xff] }
 0x168   :  { %1884 = vmatpush1.msra.mxu1 %v424_v11  ;;  %1814 = vmatprep.subr.mxu0 %v293_v12  ;;  %v384_v50 = vld [vmem:[%s5455_s1 + $0xb10] sm:$0xff]  ;;  %v381_v52 = vld [vmem:[%s5455_s1 + $0xaf8] sm:$0xff] }
 0x169   :  { %1885 = vmatprep.subr.mxu1 %v421_v13  ;;  %1815 = vmatpush1.msra.mxu0 %v292_v14  ;;  %v512_v51 = vld [vmem:[%s5455_s1 + $0xf10] sm:$0xff]  ;;  %v509_v53 = vld [vmem:[%s5455_s1 + $0xef8] sm:$0xff] }
 0x16a   :  { %1886 = vmatpush1.msra.mxu1 %v420_v15  ;;  %1816 = vmatprep.subr.mxu0 %v289_v16  ;;  %v380_v54 = vld [vmem:[%s5455_s1 + $0xaf0] sm:$0xff]  ;;  %v377_v56 = vld [vmem:[%s5455_s1 + $0xad8] sm:$0xff] }
 0x16b   :  { %1887 = vmatprep.subr.mxu1 %v417_v17  ;;  %1817 = vmatpush1.msra.mxu0 %v288_v18  ;;  %v508_v55 = vld [vmem:[%s5455_s1 + $0xef0] sm:$0xff]  ;;  %v505_v57 = vld [vmem:[%s5455_s1 + $0xed8] sm:$0xff] }
 0x16c   :  { %1888 = vmatpush1.msra.mxu1 %v416_v19  ;;  %1818 = vmatprep.subr.mxu0 %v413_v20  ;;  %v376_v58 = vld [vmem:[%s5455_s1 + $0xad0] sm:$0xff]  ;;  %v373_v60 = vld [vmem:[%s5455_s1 + $0xab8] sm:$0xff] }
 0x16d   :  { %1889 = vmatprep.subr.mxu1 %v541_v21  ;;  %1819 = vmatpush2.msra.mxu0 %v412_v22  ;;  %v504_v59 = vld [vmem:[%s5455_s1 + $0xed0] sm:$0xff]  ;;  %v501_v61 = vld [vmem:[%s5455_s1 + $0xeb8] sm:$0xff]  ;;  %v2228_v21 = vld [vmem:[%s5456_s0 + $0x28] sm:$0xff] }
 0x16e   :  { %1890 = vmatpush2.msra.mxu1 %v540_v23  ;;  %1820 = vmatprep.subr.mxu0 %v409_v24  ;;  %v372_v62 = vld [vmem:[%s5455_s1 + $0xab0] sm:$0xff]  ;;  %v369_v0 = vld [vmem:[%s5455_s1 + $0xa98] sm:$0xff]  ;;  %v2229_v23 = vld [vmem:[%s5456_s0 + $0x20] sm:$0xff] }
 0x16f   :  { %1891 = vmatprep.subr.mxu1 %v537_v25  ;;  %1821 = vmatpush2.msra.mxu0 %v408_v26  ;;  %v500_v63 = vld [vmem:[%s5455_s1 + $0xeb0] sm:$0xff]  ;;  %v497_v1 = vld [vmem:[%s5455_s1 + $0xe98] sm:$0xff] }
 0x170   :  { %1892 = vmatpush2.msra.mxu1 %v536_v27  ;;  %1822 = vmatprep.subr.mxu0 %v405_v28  ;;  %v368_v2 = vld [vmem:[%s5455_s1 + $0xa90] sm:$0xff]  ;;  %v365_v4 = vld [vmem:[%s5455_s1 + $0xa78] sm:$0xff] }
 0x171   :  { %1893 = vmatprep.subr.mxu1 %v533_v29  ;;  %1823 = vmatpush2.msra.mxu0 %v404_v30  ;;  %v496_v3 = vld [vmem:[%s5455_s1 + $0xe90] sm:$0xff]  ;;  %v493_v5 = vld [vmem:[%s5455_s1 + $0xe78] sm:$0xff] }
 0x172   :  { %1894 = vmatpush2.msra.mxu1 %v532_v31  ;;  %1824 = vmatprep.subr.mxu0 %v401_v32  ;;  %v364_v6 = vld [vmem:[%s5455_s1 + $0xa70] sm:$0xff]  ;;  %v361_v8 = vld [vmem:[%s5455_s1 + $0xa58] sm:$0xff] }
 0x173   :  { %1895 = vmatprep.subr.mxu1 %v529_v33  ;;  %1825 = vmatpush2.msra.mxu0 %v400_v34  ;;  %v492_v7 = vld [vmem:[%s5455_s1 + $0xe70] sm:$0xff]  ;;  %v489_v9 = vld [vmem:[%s5455_s1 + $0xe58] sm:$0xff] }
 0x174   :  { %1896 = vmatpush2.msra.mxu1 %v528_v35  ;;  %1826 = vmatprep.subr.mxu0 %v397_v36  ;;  %v360_v10 = vld [vmem:[%s5455_s1 + $0xa50] sm:$0xff]  ;;  %v357_v12 = vld [vmem:[%s5455_s1 + $0xa38] sm:$0xff] }
 0x175   :  { %1897 = vmatprep.subr.mxu1 %v525_v37  ;;  %1827 = vmatpush2.msra.mxu0 %v396_v38  ;;  %v488_v11 = vld [vmem:[%s5455_s1 + $0xe50] sm:$0xff]  ;;  %v485_v13 = vld [vmem:[%s5455_s1 + $0xe38] sm:$0xff] }
 0x176   :  { %1898 = vmatpush2.msra.mxu1 %v524_v39  ;;  %1828 = vmatprep.subr.mxu0 %v393_v40  ;;  %v356_v14 = vld [vmem:[%s5455_s1 + $0xa30] sm:$0xff]  ;;  %v353_v16 = vld [vmem:[%s5455_s1 + $0xa18] sm:$0xff] }
 0x177   :  { %1899 = vmatprep.subr.mxu1 %v521_v41  ;;  %1829 = vmatpush2.msra.mxu0 %v392_v42  ;;  %v484_v15 = vld [vmem:[%s5455_s1 + $0xe30] sm:$0xff]  ;;  %v481_v17 = vld [vmem:[%s5455_s1 + $0xe18] sm:$0xff] }
 0x178   :  { %1900 = vmatpush2.msra.mxu1 %v520_v43  ;;  %1830 = vmatprep.subr.mxu0 %v389_v44  ;;  %v352_v18 = vld [vmem:[%s5455_s1 + $0xa10] sm:$0xff]  ;;  %v605_v20 = vld [vmem:[%s5455_s1 + $0x11f8] sm:$0xff] }
 0x179   :  { %1901 = vmatprep.subr.mxu1 %v517_v45  ;;  %1831 = vmatpush2.msra.mxu0 %v388_v46  ;;  %v480_v19 = vld [vmem:[%s5455_s1 + $0xe10] sm:$0xff]  ;;  %v733_v22 = vld [vmem:[%s5455_s1 + $0x15f8] sm:$0xff] }
 0x17a   :  { %1902 = vmatpush2.msra.mxu1 %v516_v47  ;;  %1832 = vmatprep.subr.mxu0 %v385_v48  ;;  %v604_v24 = vld [vmem:[%s5455_s1 + $0x11f0] sm:$0xff]  ;;  %v2230_v26 = vld [vmem:[%s5456_s0 + $0x38] sm:$0xff] }
 0x17b   :  { %1903 = vmatprep.subr.mxu1 %v513_v49  ;;  %1833 = vmatpush2.msra.mxu0 %v384_v50  ;;  %v732_v25 = vld [vmem:[%s5455_s1 + $0x15f0] sm:$0xff]  ;;  %v601_v27 = vld [vmem:[%s5455_s1 + $0x11d8] sm:$0xff] }
 0x17c   :  { %1904 = vmatpush2.msra.mxu1 %v512_v51  ;;  %1834 = vmatprep.subr.mxu0 %v381_v52  ;;  %v729_v28 = vld [vmem:[%s5455_s1 + $0x15d8] sm:$0xff]  ;;  %v2231_v29 = vld [vmem:[%s5456_s0 + $0x30] sm:$0xff] }
 0x17d   :  { %1905 = vmatprep.subr.mxu1 %v509_v53  ;;  %1835 = vmatpush2.msra.mxu0 %v380_v54  ;;  %v600_v30 = vld [vmem:[%s5455_s1 + $0x11d0] sm:$0xff]  ;;  %v597_v32 = vld [vmem:[%s5455_s1 + $0x11b8] sm:$0xff] }
 0x17e   :  { %1906 = vmatpush2.msra.mxu1 %v508_v55  ;;  %1836 = vmatprep.subr.mxu0 %v377_v56  ;;  %v728_v31 = vld [vmem:[%s5455_s1 + $0x15d0] sm:$0xff]  ;;  %v725_v33 = vld [vmem:[%s5455_s1 + $0x15b8] sm:$0xff] }
 0x17f   :  { %1907 = vmatprep.subr.mxu1 %v505_v57  ;;  %1837 = vmatpush2.msra.mxu0 %v376_v58  ;;  %v596_v34 = vld [vmem:[%s5455_s1 + $0x11b0] sm:$0xff]  ;;  %v593_v36 = vld [vmem:[%s5455_s1 + $0x1198] sm:$0xff] }
 0x180   :  { %1908 = vmatpush2.msra.mxu1 %v504_v59  ;;  %1838 = vmatprep.subr.mxu0 %v373_v60  ;;  %v724_v35 = vld [vmem:[%s5455_s1 + $0x15b0] sm:$0xff]  ;;  %v721_v37 = vld [vmem:[%s5455_s1 + $0x1598] sm:$0xff] }
 0x181   :  { %1909 = vmatprep.subr.mxu1 %v501_v61  ;;  %1839 = vmatpush2.msra.mxu0 %v372_v62  ;;  %v592_v38 = vld [vmem:[%s5455_s1 + $0x1190] sm:$0xff]  ;;  %v589_v40 = vld [vmem:[%s5455_s1 + $0x1178] sm:$0xff] }
 0x182   :  { %1910 = vmatpush2.msra.mxu1 %v500_v63  ;;  %1840 = vmatprep.subr.mxu0 %v369_v0  ;;  %v720_v39 = vld [vmem:[%s5455_s1 + $0x1590] sm:$0xff]  ;;  %v717_v41 = vld [vmem:[%s5455_s1 + $0x1578] sm:$0xff] }
 0x183   :  { %1911 = vmatprep.subr.mxu1 %v497_v1  ;;  %1841 = vmatpush2.msra.mxu0 %v368_v2  ;;  %v588_v42 = vld [vmem:[%s5455_s1 + $0x1170] sm:$0xff]  ;;  %v585_v44 = vld [vmem:[%s5455_s1 + $0x1158] sm:$0xff] }
 0x184   :  { %1912 = vmatpush2.msra.mxu1 %v496_v3  ;;  %1842 = vmatprep.subr.mxu0 %v365_v4  ;;  %v716_v43 = vld [vmem:[%s5455_s1 + $0x1570] sm:$0xff]  ;;  %v713_v45 = vld [vmem:[%s5455_s1 + $0x1558] sm:$0xff] }
 0x185   :  { %1913 = vmatprep.subr.mxu1 %v493_v5  ;;  %1843 = vmatpush2.msra.mxu0 %v364_v6  ;;  %v584_v46 = vld [vmem:[%s5455_s1 + $0x1150] sm:$0xff]  ;;  %v581_v48 = vld [vmem:[%s5455_s1 + $0x1138] sm:$0xff] }
 0x186   :  { %1914 = vmatpush2.msra.mxu1 %v492_v7  ;;  %1844 = vmatprep.subr.mxu0 %v361_v8  ;;  %v712_v47 = vld [vmem:[%s5455_s1 + $0x1550] sm:$0xff]  ;;  %v709_v49 = vld [vmem:[%s5455_s1 + $0x1538] sm:$0xff] }
 0x187   :  { %1915 = vmatprep.subr.mxu1 %v489_v9  ;;  %1845 = vmatpush2.msra.mxu0 %v360_v10  ;;  %v580_v50 = vld [vmem:[%s5455_s1 + $0x1130] sm:$0xff]  ;;  %v577_v52 = vld [vmem:[%s5455_s1 + $0x1118] sm:$0xff] }
 0x188   :  { %1916 = vmatpush2.msra.mxu1 %v488_v11  ;;  %1846 = vmatprep.subr.mxu0 %v357_v12  ;;  %v708_v51 = vld [vmem:[%s5455_s1 + $0x1530] sm:$0xff]  ;;  %v705_v53 = vld [vmem:[%s5455_s1 + $0x1518] sm:$0xff] }
 0x189   :  { %1917 = vmatprep.subr.mxu1 %v485_v13  ;;  %1847 = vmatpush2.msra.mxu0 %v356_v14  ;;  %v576_v54 = vld [vmem:[%s5455_s1 + $0x1110] sm:$0xff]  ;;  %v573_v56 = vld [vmem:[%s5455_s1 + $0x10f8] sm:$0xff] }
 0x18a   :  { %1918 = vmatpush2.msra.mxu1 %v484_v15  ;;  %1848 = vmatprep.subr.mxu0 %v353_v16  ;;  %v704_v55 = vld [vmem:[%s5455_s1 + $0x1510] sm:$0xff]  ;;  %v701_v57 = vld [vmem:[%s5455_s1 + $0x14f8] sm:$0xff]  ;;  %v1056_v16 = vlaneseq }
 0x18b   :  { %1919 = vmatprep.subr.mxu1 %v481_v17  ;;  %1849 = vmatpush2.msra.mxu0 %v352_v18  ;;  %v572_v58 = vld [vmem:[%s5455_s1 + $0x10f0] sm:$0xff]  ;;  %v569_v60 = vld [vmem:[%s5455_s1 + $0x10d8] sm:$0xff] }
 0x18c   :  { %1850 = vmatprep.mubr.f32.mxu0 %v2228_v21  ;;  %1920 = vmatpush2.msra.mxu1 %v480_v19  ;;  %v700_v59 = vld [vmem:[%s5455_s1 + $0x14f0] sm:$0xff]  ;;  %v697_v61 = vld [vmem:[%s5455_s1 + $0x14d8] sm:$0xff] }
 0x18d   :  { %1851 = vmatmul.mubr.f32.vlgmr.msra.gmra.mxu0 %v2229_v23  ;;  %1921 = vmatprep.mubr.f32.mxu1 %v2230_v26  ;;  %v568_v62 = vld [vmem:[%s5455_s1 + $0x10d0] sm:$0xff]  ;;  %v565_v0 = vld [vmem:[%s5455_s1 + $0x10b8] sm:$0xff] }
 0x18e   :  { %1928 = vmatprep.subr.mxu0 %v605_v20  ;;  %1999 = vmatprep.subr.mxu1 %v733_v22  ;;  %v696_v63 = vld [vmem:[%s5455_s1 + $0x14d0] sm:$0xff]  ;;  %v693_v1 = vld [vmem:[%s5455_s1 + $0x14b8] sm:$0xff] }
 0x18f   :  { %1922 = vmatmul.mubr.f32.vlgmr.msra.gmra.mxu1 %v2231_v29  ;;  %1929 = vmatpush1.msra.mxu0 %v604_v24  ;;  %v564_v2 = vld [vmem:[%s5455_s1 + $0x10b0] sm:$0xff]  ;;  %v561_v4 = vld [vmem:[%s5455_s1 + $0x1098] sm:$0xff] }
 0x190   :  { %2000 = vmatpush1.msra.mxu1 %v732_v25  ;;  %1930 = vmatprep.subr.mxu0 %v601_v27  ;;  %v692_v3 = vld [vmem:[%s5455_s1 + $0x14b0] sm:$0xff]  ;;  %v689_v5 = vld [vmem:[%s5455_s1 + $0x1498] sm:$0xff]  ;;  %v4828_v25 = vshrl.u32 %v1056_v16, 7 }
 0x191   :  { %2001 = vmatprep.subr.mxu1 %v729_v28  ;;  %1931 = vmatpush1.msra.mxu0 %v600_v30  ;;  %v560_v6 = vld [vmem:[%s5455_s1 + $0x1090] sm:$0xff]  ;;  %v557_v8 = vld [vmem:[%s5455_s1 + $0x1078] sm:$0xff] }
 0x192   :  { %2002 = vmatpush1.msra.mxu1 %v728_v31  ;;  %1932 = vmatprep.subr.mxu0 %v597_v32  ;;  %v688_v7 = vld [vmem:[%s5455_s1 + $0x1490] sm:$0xff]  ;;  %v685_v9 = vld [vmem:[%s5455_s1 + $0x1478] sm:$0xff] }
 0x193   :  { %2003 = vmatprep.subr.mxu1 %v725_v33  ;;  %1933 = vmatpush1.msra.mxu0 %v596_v34  ;;  %v556_v10 = vld [vmem:[%s5455_s1 + $0x1070] sm:$0xff]  ;;  %v553_v12 = vld [vmem:[%s5455_s1 + $0x1058] sm:$0xff]  ;;  %v1058_v34 = vsub.s32 0, %v4828_v25 }
 0x194   :  { %2004 = vmatpush1.msra.mxu1 %v724_v35  ;;  %1934 = vmatprep.subr.mxu0 %v593_v36  ;;  %v684_v11 = vld [vmem:[%s5455_s1 + $0x1470] sm:$0xff]  ;;  %v681_v13 = vld [vmem:[%s5455_s1 + $0x1458] sm:$0xff] }
 0x195   :  { %2005 = vmatprep.subr.mxu1 %v721_v37  ;;  %1935 = vmatpush1.msra.mxu0 %v592_v38  ;;  %v552_v14 = vld [vmem:[%s5455_s1 + $0x1050] sm:$0xff]  ;;  %v549_v17 = vld [vmem:[%s5455_s1 + $0x1038] sm:$0xff]  ;;  %v4864_v37 = vld [vmem:[%s5457_s2] sm:$0xf] }
 0x196   :  { %2006 = vmatpush1.msra.mxu1 %v720_v39  ;;  %1936 = vmatprep.subr.mxu0 %v589_v40  ;;  %v680_v15 = vld [vmem:[%s5455_s1 + $0x1450] sm:$0xff]  ;;  %v677_v18 = vld [vmem:[%s5455_s1 + $0x1438] sm:$0xff]  ;;  %v1062_v40 = vsub.s32 1, %v4828_v25 }
 0x197   :  { %2007 = vmatprep.subr.mxu1 %v717_v41  ;;  %1937 = vmatpush1.msra.mxu0 %v588_v42  ;;  %v548_v19 = vld [vmem:[%s5455_s1 + $0x1030] sm:$0xff]  ;;  %v545_v21 = vld [vmem:[%s5455_s1 + $0x1018] sm:$0xff] }
 0x198   :  { %2008 = vmatpush1.msra.mxu1 %v716_v43  ;;  %1938 = vmatprep.subr.mxu0 %v585_v44  ;;  %v676_v20 = vld [vmem:[%s5455_s1 + $0x1430] sm:$0xff]  ;;  %v673_v22 = vld [vmem:[%s5455_s1 + $0x1418] sm:$0xff]  ;;  %v1142_v43 = vpop.f32.mrf.mxu0 }
 0x199   :  { %2009 = vmatprep.subr.mxu1 %v713_v45  ;;  %1939 = vmatpush1.msra.mxu0 %v584_v46  ;;  %v544_v23 = vld [vmem:[%s5455_s1 + $0x1010] sm:$0xff]  ;;  %v669_v26 = vld [vmem:[%s5455_s1 + $0x13f8] sm:$0xff]  ;;  %v1059_v46 = vrot.slane %v4864_v37, %v1058_v34 }
 0x19a   :  { %2010 = vmatpush1.msra.mxu1 %v712_v47  ;;  %1940 = vmatprep.subr.mxu0 %v581_v48  ;;  %v672_v24 = vld [vmem:[%s5455_s1 + $0x1410] sm:$0xff]  ;;  %v797_v27 = vld [vmem:[%s5455_s1 + $0x17f8] sm:$0xff] }
 0x19b   :  { %2011 = vmatprep.subr.mxu1 %v709_v49  ;;  %1941 = vmatpush1.msra.mxu0 %v580_v50  ;;  %v668_v28 = vld [vmem:[%s5455_s1 + $0x13f0] sm:$0xff]  ;;  %v665_v30 = vld [vmem:[%s5455_s1 + $0x13d8] sm:$0xff] }
 0x19c   :  { %2012 = vmatpush1.msra.mxu1 %v708_v51  ;;  %1942 = vmatprep.subr.mxu0 %v577_v52  ;;  %v796_v29 = vld [vmem:[%s5455_s1 + $0x17f0] sm:$0xff]  ;;  %v793_v31 = vld [vmem:[%s5455_s1 + $0x17d8] sm:$0xff]  ;;  %v1063_v51 = vrot.slane %v4864_v37, %v1062_v40 }
 0x19d   :  { %2013 = vmatprep.subr.mxu1 %v705_v53  ;;  %1943 = vmatpush1.msra.mxu0 %v576_v54  ;;  %v664_v32 = vld [vmem:[%s5455_s1 + $0x13d0] sm:$0xff]  ;;  %v661_v35 = vld [vmem:[%s5455_s1 + $0x13b8] sm:$0xff]  ;;  %v1213_v54 = vpop.f32.mrf.mxu1 }
 0x19e   :  { %2014 = vmatpush1.msra.mxu1 %v704_v55  ;;  %1944 = vmatprep.subr.mxu0 %v573_v56  ;;  %v792_v33 = vld [vmem:[%s5455_s1 + $0x17d0] sm:$0xff]  ;;  %v789_v36 = vld [vmem:[%s5455_s1 + $0x17b8] sm:$0xff]  ;;  %v1144_v55 = vpop.f32.mrf.mxu0 }
 0x19f   :  { %2015 = vmatprep.subr.mxu1 %v701_v57  ;;  %1945 = vmatpush1.msra.mxu0 %v572_v58  ;;  %v660_v38 = vld [vmem:[%s5455_s1 + $0x13b0] sm:$0xff]  ;;  %v657_v41 = vld [vmem:[%s5455_s1 + $0x1398] sm:$0xff]  ;;  %v1143_v58 = vadd.f32 %v1142_v43, %v1059_v46 }
 0x1a0   :  { %2016 = vmatpush1.msra.mxu1 %v700_v59  ;;  %1946 = vmatprep.subr.mxu0 %v569_v60  ;;  %v788_v39 = vld [vmem:[%s5455_s1 + $0x17b0] sm:$0xff]  ;;  %v785_v42 = vld [vmem:[%s5455_s1 + $0x1798] sm:$0xff] }
 0x1a1   :  { %2017 = vmatprep.subr.mxu1 %v697_v61  ;;  %1947 = vmatpush1.msra.mxu0 %v568_v62  ;;  %v656_v44 = vld [vmem:[%s5455_s1 + $0x1390] sm:$0xff]  ;;  %v653_v47 = vld [vmem:[%s5455_s1 + $0x1378] sm:$0xff]  ;;  %v1284_v61 = vpop.f32.mrf.mxu0 }
 0x1a2   :  { %2018 = vmatpush1.msra.mxu1 %v696_v63  ;;  %1948 = vmatprep.subr.mxu0 %v565_v0  ;;  %v784_v45 = vld [vmem:[%s5455_s1 + $0x1790] sm:$0xff]  ;;  %v781_v48 = vld [vmem:[%s5455_s1 + $0x1778] sm:$0xff]  ;;  %v1145_v0 = vadd.f32 %v1144_v55, %v1063_v51 }
 0x1a3   :  { %2019 = vmatprep.subr.mxu1 %v693_v1  ;;  %1949 = vmatpush1.msra.mxu0 %v564_v2  ;;  %v652_v49 = vld [vmem:[%s5455_s1 + $0x1370] sm:$0xff]  ;;  %v649_v52 = vld [vmem:[%s5455_s1 + $0x1358] sm:$0xff] }
 0x1a4   :  { %2020 = vmatpush1.msra.mxu1 %v692_v3  ;;  %1950 = vmatprep.subr.mxu0 %v561_v4  ;;  %v780_v50 = vld [vmem:[%s5455_s1 + $0x1770] sm:$0xff]  ;;  %v777_v53 = vld [vmem:[%s5455_s1 + $0x1758] sm:$0xff]  ;;  %v1215_v3 = vpop.f32.mrf.mxu1 }
 0x1a5   :  { %2021 = vmatprep.subr.mxu1 %v689_v5  ;;  %1951 = vmatpush1.msra.mxu0 %v560_v6  ;;  %v648_v56 = vld [vmem:[%s5455_s1 + $0x1350] sm:$0xff]  ;;  %v645_v59 = vld [vmem:[%s5455_s1 + $0x1338] sm:$0xff]  ;;  %v1214_v6 = vadd.f32 %v1213_v54, %v1143_v58 }
 0x1a6   :  { %2022 = vmatpush1.msra.mxu1 %v688_v7  ;;  %1952 = vmatprep.subr.mxu0 %v557_v8  ;;  %v776_v57 = vld [vmem:[%s5455_s1 + $0x1750] sm:$0xff]  ;;  %v773_v60 = vld [vmem:[%s5455_s1 + $0x1738] sm:$0xff] }
 0x1a7   :  { %2023 = vmatprep.subr.mxu1 %v685_v9  ;;  %1953 = vmatpush1.msra.mxu0 %v556_v10  ;;  %v644_v62 = vld [vmem:[%s5455_s1 + $0x1330] sm:$0xff]  ;;  %v641_v1 = vld [vmem:[%s5455_s1 + $0x1318] sm:$0xff]  ;;  %v1355_v9 = vpop.f32.mrf.mxu1  ;;  %v1286_v10 = vpop.f32.mrf.mxu0 }
 0x1a8   :  { %2024 = vmatpush1.msra.mxu1 %v684_v11  ;;  %1954 = vmatprep.subr.mxu0 %v553_v12  ;;  %v772_v63 = vld [vmem:[%s5455_s1 + $0x1730] sm:$0xff]  ;;  %v769_v2 = vld [vmem:[%s5455_s1 + $0x1718] sm:$0xff] }
 0x1a9   :  { %2025 = vmatprep.subr.mxu1 %v681_v13  ;;  %1955 = vmatpush1.msra.mxu0 %v552_v14  ;;  %v640_v4 = vld [vmem:[%s5455_s1 + $0x1310] sm:$0xff]  ;;  %v637_v7 = vld [vmem:[%s5455_s1 + $0x12f8] sm:$0xff]  ;;  %v1216_v13 = vadd.f32 %v1215_v3, %v1145_v0  ;;  %v1285_v14 = vadd.f32 %v1284_v61, %v1214_v6 }
 0x1aa   :  { %2026 = vmatpush1.msra.mxu1 %v680_v15  ;;  %1956 = vmatprep.subr.mxu0 %v549_v17  ;;  %v768_v5 = vld [vmem:[%s5455_s1 + $0x1710] sm:$0xff]  ;;  %v765_v8 = vld [vmem:[%s5455_s1 + $0x16f8] sm:$0xff]  ;;  %v1426_v17 = vpop.f32.mrf.mxu0 }
 0x1ab   :  { %2027 = vmatprep.subr.mxu1 %v677_v18  ;;  %1957 = vmatpush1.msra.mxu0 %v548_v19  ;;  %v636_v11 = vld [vmem:[%s5455_s1 + $0x12f0] sm:$0xff]  ;;  %v633_v15 = vld [vmem:[%s5455_s1 + $0x12d8] sm:$0xff] }
 0x1ac   :  { %2028 = vmatpush1.msra.mxu1 %v676_v20  ;;  %1958 = vmatprep.subr.mxu0 %v545_v21  ;;  %v764_v12 = vld [vmem:[%s5455_s1 + $0x16f0] sm:$0xff]  ;;  %v761_v16 = vld [vmem:[%s5455_s1 + $0x16d8] sm:$0xff]  ;;  %v1287_v20 = vadd.f32 %v1286_v10, %v1216_v13 }
 0x1ad   :  { %2029 = vmatprep.subr.mxu1 %v673_v22  ;;  %1959 = vmatpush1.msra.mxu0 %v544_v23  ;;  %v632_v18 = vld [vmem:[%s5455_s1 + $0x12d0] sm:$0xff]  ;;  %v629_v21 = vld [vmem:[%s5455_s1 + $0x12b8] sm:$0xff]  ;;  %v1357_v23 = vpop.f32.mrf.mxu1 }
 0x1ae   :  { %2030 = vmatpush1.msra.mxu1 %v672_v24  ;;  %1960 = vmatprep.subr.mxu0 %v669_v26  ;;  %v760_v19 = vld [vmem:[%s5455_s1 + $0x16d0] sm:$0xff]  ;;  %v757_v22 = vld [vmem:[%s5455_s1 + $0x16b8] sm:$0xff]  ;;  %v1358_v34 = vadd.f32 %v1357_v23, %v1287_v20 }
 0x1af   :  { %2031 = vmatprep.subr.mxu1 %v797_v27  ;;  %1961 = vmatpush2.msra.mxu0 %v668_v28  ;;  %v628_v24 = vld [vmem:[%s5455_s1 + $0x12b0] sm:$0xff]  ;;  %v1356_v27 = vadd.f32 %v1355_v9, %v1285_v14  ;;  %v625_v28 = vld [vmem:[%s5455_s1 + $0x1298] sm:$0xff] }
 0x1b0   :  { %2032 = vmatpush2.msra.mxu1 %v796_v29  ;;  %1962 = vmatprep.subr.mxu0 %v665_v30  ;;  %v756_v26 = vld [vmem:[%s5455_s1 + $0x16b0] sm:$0xff]  ;;  %v753_v29 = vld [vmem:[%s5455_s1 + $0x1698] sm:$0xff]  ;;  %v1497_v30 = vpop.f32.mrf.mxu1 }
 0x1b1   :  { %2033 = vmatprep.subr.mxu1 %v793_v31  ;;  %1963 = vmatpush2.msra.mxu0 %v664_v32  ;;  %v1428_v31 = vpop.f32.mrf.mxu0  ;;  %v624_v32 = vld [vmem:[%s5455_s1 + $0x1290] sm:$0xff]  ;;  %v745_v43 = vld [vmem:[%s5455_s1 + $0x1658] sm:$0xff] }
 0x1b2   :  { %2034 = vmatpush2.msra.mxu1 %v792_v33  ;;  %1964 = vmatprep.subr.mxu0 %v661_v35  ;;  %v752_v33 = vld [vmem:[%s5455_s1 + $0x1690] sm:$0xff]  ;;  %v1427_v35 = vadd.f32 %v1426_v17, %v1356_v27  ;;  %v609_v54 = vld [vmem:[%s5455_s1 + $0x1218] sm:$0xff] }
 0x1b3   :  { %2035 = vmatprep.subr.mxu1 %v789_v36  ;;  %1965 = vmatpush2.msra.mxu0 %v660_v38  ;;  %v621_v36 = vld [vmem:[%s5455_s1 + $0x1278] sm:$0xff]  ;;  %v748_v40 = vld [vmem:[%s5455_s1 + $0x1670] sm:$0xff] }
 0x1b4   :  { %2036 = vmatpush2.msra.mxu1 %v788_v39  ;;  %1966 = vmatprep.subr.mxu0 %v657_v41  ;;  %v749_v38 = vld [vmem:[%s5455_s1 + $0x1678] sm:$0xff]  ;;  %v620_v39 = vld [vmem:[%s5455_s1 + $0x1270] sm:$0xff]  ;;  %v1429_v41 = vadd.f32 %v1428_v31, %v1358_v34 }
 0x1b5   :  { %2037 = vmatprep.subr.mxu1 %v785_v42  ;;  %1967 = vmatpush2.msra.mxu0 %v656_v44  ;;  %v617_v42 = vld [vmem:[%s5455_s1 + $0x1258] sm:$0xff]  ;;  %v1499_v44 = vpop.f32.mrf.mxu1  ;;  %v744_v46 = vld [vmem:[%s5455_s1 + $0x1650] sm:$0xff] }
 0x1b6   :  { %2038 = vmatpush2.msra.mxu1 %v784_v45  ;;  %1968 = vmatprep.subr.mxu0 %v653_v47  ;;  %v616_v45 = vld [vmem:[%s5455_s1 + $0x1250] sm:$0xff]  ;;  %v1498_v47 = vadd.f32 %v1497_v30, %v1427_v35  ;;  %v737_v55 = vld [vmem:[%s5455_s1 + $0x1618] sm:$0xff] }
 0x1b7   :  { %2039 = vmatprep.subr.mxu1 %v781_v48  ;;  %1969 = vmatpush2.msra.mxu0 %v652_v49  ;;  %v613_v48 = vld [vmem:[%s5455_s1 + $0x1238] sm:$0xff]  ;;  %v740_v51 = vld [vmem:[%s5455_s1 + $0x1630] sm:$0xff] }
 0x1b8   :  { %2040 = vmatpush2.msra.mxu1 %v780_v50  ;;  %1970 = vmatprep.subr.mxu0 %v649_v52  ;;  %v741_v49 = vld [vmem:[%s5455_s1 + $0x1638] sm:$0xff]  ;;  %v612_v50 = vld [vmem:[%s5455_s1 + $0x1230] sm:$0xff] }
 0x1b9   :  { %2041 = vmatprep.subr.mxu1 %v777_v53  ;;  %1971 = vmatpush2.msra.mxu0 %v648_v56  ;;  %v1500_v53 = vadd.f32 %v1499_v44, %v1429_v41  ;;  %v860_v6 = vld [vmem:[%s5455_s1 + $0x19f0] sm:$0xff]  ;;  %v857_v9 = vld [vmem:[%s5455_s1 + $0x19d8] sm:$0xff] }
 0x1ba   :  { %2042 = vmatpush2.msra.mxu1 %v776_v57  ;;  %1972 = vmatprep.subr.mxu0 %v645_v59  ;;  %v608_v57 = vld [vmem:[%s5455_s1 + $0x1210] sm:$0xff]  ;;  %v985_v10 = vld [vmem:[%s5455_s1 + $0x1dd8] sm:$0xff] }
 0x1bb   :  { %2043 = vmatprep.subr.mxu1 %v773_v60  ;;  %1973 = vmatpush2.msra.mxu0 %v644_v62  ;;  %v736_v60 = vld [vmem:[%s5455_s1 + $0x1610] sm:$0xff]  ;;  %v977_v20 = vld [vmem:[%s5455_s1 + $0x1d98] sm:$0xff] }
 0x1bc   :  { %2044 = vmatpush2.msra.mxu1 %v772_v63  ;;  %1974 = vmatprep.subr.mxu0 %v641_v1  ;;  %v861_v63 = vld [vmem:[%s5455_s1 + $0x19f8] sm:$0xff]  ;;  %v2232_v1 = vld [vmem:[%s5456_s0 + $0x48] sm:$0xff]  ;;  %v856_v13 = vld [vmem:[%s5455_s1 + $0x19d0] sm:$0xff] }
 0x1bd   :  { %2045 = vmatprep.subr.mxu1 %v769_v2  ;;  %1975 = vmatpush2.msra.mxu0 %v640_v4  ;;  %v989_v2 = vld [vmem:[%s5455_s1 + $0x1df8] sm:$0xff]  ;;  %v984_v14 = vld [vmem:[%s5455_s1 + $0x1dd0] sm:$0xff] }
 0x1be   :  { %2046 = vmatpush2.msra.mxu1 %v768_v5  ;;  %1976 = vmatprep.subr.mxu0 %v637_v7  ;;  %v2233_v5 = vld [vmem:[%s5456_s0 + $0x40] sm:$0xff]  ;;  %v988_v7 = vld [vmem:[%s5455_s1 + $0x1df0] sm:$0xff]  ;;  %v845_v23 = vld [vmem:[%s5455_s1 + $0x1978] sm:$0xff] }
 0x1bf   :  { %2047 = vmatprep.subr.mxu1 %v765_v8  ;;  %1977 = vmatpush2.msra.mxu0 %v636_v11  ;;  %v2234_v8 = vld [vmem:[%s5456_s0 + $0x58] sm:$0xff]  ;;  %v852_v17 = vld [vmem:[%s5455_s1 + $0x19b0] sm:$0xff] }
 0x1c0   :  { %2048 = vmatpush2.msra.mxu1 %v764_v12  ;;  %1978 = vmatprep.subr.mxu0 %v633_v15  ;;  %v2235_v12 = vld [vmem:[%s5456_s0 + $0x50] sm:$0xff]  ;;  %v853_v15 = vld [vmem:[%s5455_s1 + $0x19b8] sm:$0xff] }
 0x1c1   :  { %2049 = vmatprep.subr.mxu1 %v761_v16  ;;  %1979 = vmatpush2.msra.mxu0 %v632_v18  ;;  %v981_v16 = vld [vmem:[%s5455_s1 + $0x1db8] sm:$0xff]  ;;  %v980_v18 = vld [vmem:[%s5455_s1 + $0x1db0] sm:$0xff] }
 0x1c2   :  { %2050 = vmatpush2.msra.mxu1 %v760_v19  ;;  %1980 = vmatprep.subr.mxu0 %v629_v21  ;;  %v849_v19 = vld [vmem:[%s5455_s1 + $0x1998] sm:$0xff]  ;;  %v848_v21 = vld [vmem:[%s5455_s1 + $0x1990] sm:$0xff] }
 0x1c3   :  { %2051 = vmatprep.subr.mxu1 %v757_v22  ;;  %1981 = vmatpush2.msra.mxu0 %v628_v24  ;;  %v976_v22 = vld [vmem:[%s5455_s1 + $0x1d90] sm:$0xff]  ;;  %v973_v24 = vld [vmem:[%s5455_s1 + $0x1d78] sm:$0xff] }
 0x1c4   :  { %2052 = vmatpush2.msra.mxu1 %v756_v26  ;;  %1982 = vmatprep.subr.mxu0 %v625_v28  ;;  %v844_v26 = vld [vmem:[%s5455_s1 + $0x1970] sm:$0xff]  ;;  %v841_v28 = vld [vmem:[%s5455_s1 + $0x1958] sm:$0xff] }
 0x1c5   :  { %2053 = vmatprep.subr.mxu1 %v753_v29  ;;  %1983 = vmatpush2.msra.mxu0 %v624_v32  ;;  %v972_v27 = vld [vmem:[%s5455_s1 + $0x1d70] sm:$0xff]  ;;  %v969_v29 = vld [vmem:[%s5455_s1 + $0x1d58] sm:$0xff] }
 0x1c6   :  { %2054 = vmatpush2.msra.mxu1 %v752_v33  ;;  %1984 = vmatprep.subr.mxu0 %v621_v36  ;;  %v840_v30 = vld [vmem:[%s5455_s1 + $0x1950] sm:$0xff]  ;;  %v837_v32 = vld [vmem:[%s5455_s1 + $0x1938] sm:$0xff] }
 0x1c7   :  { %2055 = vmatprep.subr.mxu1 %v749_v38  ;;  %1985 = vmatpush2.msra.mxu0 %v620_v39  ;;  %v968_v31 = vld [vmem:[%s5455_s1 + $0x1d50] sm:$0xff]  ;;  %v965_v33 = vld [vmem:[%s5455_s1 + $0x1d38] sm:$0xff] }
 0x1c8   :  { %2056 = vmatpush2.msra.mxu1 %v748_v40  ;;  %1986 = vmatprep.subr.mxu0 %v617_v42  ;;  %v836_v34 = vld [vmem:[%s5455_s1 + $0x1930] sm:$0xff]  ;;  %v833_v36 = vld [vmem:[%s5455_s1 + $0x1918] sm:$0xff] }
 0x1c9   :  { %2057 = vmatprep.subr.mxu1 %v745_v43  ;;  %v1568_v52 = vpop.f32.mrf.mxu0  ;;  %1987 = vmatpush2.msra.mxu0 %v616_v45  ;;  %v964_v35 = vld [vmem:[%s5455_s1 + $0x1d30] sm:$0xff]  ;;  %v961_v38 = vld [vmem:[%s5455_s1 + $0x1d18] sm:$0xff] }
 0x1ca   :  { %2058 = vmatpush2.msra.mxu1 %v744_v46  ;;  %v1569_v56 = vadd.f32 %v1568_v52, %v1498_v47  ;;  %1988 = vmatprep.subr.mxu0 %v613_v48  ;;  %v832_v39 = vld [vmem:[%s5455_s1 + $0x1910] sm:$0xff]  ;;  %v829_v41 = vld [vmem:[%s5455_s1 + $0x18f8] sm:$0xff] }
 0x1cb   :  { %2059 = vmatprep.subr.mxu1 %v741_v49  ;;  %v1639_v58 = vpop.f32.mrf.mxu1  ;;  %v1570_v59 = vpop.f32.mrf.mxu0  ;;  %1989 = vmatpush2.msra.mxu0 %v612_v50  ;;  %v960_v40 = vld [vmem:[%s5455_s1 + $0x1d10] sm:$0xff]  ;;  %v957_v42 = vld [vmem:[%s5455_s1 + $0x1cf8] sm:$0xff] }
 0x1cc   :  { %2060 = vmatpush2.msra.mxu1 %v740_v51  ;;  %v1640_v61 = vadd.f32 %v1639_v58, %v1569_v56  ;;  %v1571_v62 = vadd.f32 %v1570_v59, %v1500_v53  ;;  %1990 = vmatprep.subr.mxu0 %v609_v54  ;;  %v828_v43 = vld [vmem:[%s5455_s1 + $0x18f0] sm:$0xff]  ;;  %v825_v45 = vld [vmem:[%s5455_s1 + $0x18d8] sm:$0xff] }
 0x1cd   :  { %2061 = vmatprep.subr.mxu1 %v737_v55  ;;  %v1641_v0 = vpop.f32.mrf.mxu1  ;;  %1991 = vmatpush2.msra.mxu0 %v608_v57  ;;  %v956_v44 = vld [vmem:[%s5455_s1 + $0x1cf0] sm:$0xff]  ;;  %v953_v46 = vld [vmem:[%s5455_s1 + $0x1cd8] sm:$0xff] }
 0x1ce   :  { %1992 = vmatprep.mubr.f32.mxu0 %v2232_v1  ;;  %v2212_v3 = vmax.f32 %v1640_v61, 0.0  ;;  %v1642_v4 = vadd.f32 %v1641_v0, %v1571_v62  ;;  %2062 = vmatpush2.msra.mxu1 %v736_v60  ;;  %v824_v47 = vld [vmem:[%s5455_s1 + $0x18d0] sm:$0xff]  ;;  %v821_v49 = vld [vmem:[%s5455_s1 + $0x18b8] sm:$0xff] }
 0x1cf   :  { %1993 = vmatmul.mubr.f32.vlgmr.msra.gmra.mxu0 %v2233_v5  ;;  %2063 = vmatprep.mubr.f32.mxu1 %v2234_v8  ;;  %v952_v48 = vld [vmem:[%s5455_s1 + $0x1cd0] sm:$0xff]  ;;  %v949_v50 = vld [vmem:[%s5455_s1 + $0x1cb8] sm:$0xff] }
 0x1d0   :  { %2070 = vmatprep.subr.mxu0 %v861_v63  ;;  %2216 = vst [vmem:[%s5458_s3] sm:$0xff] %v2212_v3  ;;  %v2213_v11 = vmax.f32 %v1642_v4, 0.0  ;;  %2141 = vmatprep.subr.mxu1 %v989_v2  ;;  %v820_v51 = vld [vmem:[%s5455_s1 + $0x18b0] sm:$0xff]  ;;  %v817_v53 = vld [vmem:[%s5455_s1 + $0x1898] sm:$0xff] }
 0x1d1   :  { %2064 = vmatmul.mubr.f32.vlgmr.msra.gmra.mxu1 %v2235_v12  ;;  %2071 = vmatpush1.msra.mxu0 %v860_v6  ;;  %v948_v52 = vld [vmem:[%s5455_s1 + $0x1cb0] sm:$0xff]  ;;  %v945_v54 = vld [vmem:[%s5455_s1 + $0x1c98] sm:$0xff] }
 0x1d2   :  { %2142 = vmatpush1.msra.mxu1 %v988_v7  ;;  %2217 = vst [vmem:[%s5458_s3 + $0x8] sm:$0xff] %v2213_v11  ;;  %2072 = vmatprep.subr.mxu0 %v857_v9  ;;  %v816_v55 = vld [vmem:[%s5455_s1 + $0x1890] sm:$0xff]  ;;  %v813_v57 = vld [vmem:[%s5455_s1 + $0x1878] sm:$0xff] }
 0x1d3   :  { %2143 = vmatprep.subr.mxu1 %v985_v10  ;;  %2073 = vmatpush1.msra.mxu0 %v856_v13  ;;  %v944_v56 = vld [vmem:[%s5455_s1 + $0x1c90] sm:$0xff]  ;;  %v941_v58 = vld [vmem:[%s5455_s1 + $0x1c78] sm:$0xff] }
 0x1d4   :  { %2144 = vmatpush1.msra.mxu1 %v984_v14  ;;  %2074 = vmatprep.subr.mxu0 %v853_v15  ;;  %v812_v59 = vld [vmem:[%s5455_s1 + $0x1870] sm:$0xff]  ;;  %v809_v61 = vld [vmem:[%s5455_s1 + $0x1858] sm:$0xff] }
 0x1d5   :  { %2145 = vmatprep.subr.mxu1 %v981_v16  ;;  %2075 = vmatpush1.msra.mxu0 %v852_v17  ;;  %v940_v60 = vld [vmem:[%s5455_s1 + $0x1c70] sm:$0xff]  ;;  %v937_v62 = vld [vmem:[%s5455_s1 + $0x1c58] sm:$0xff] }
 0x1d6   :  { %2146 = vmatpush1.msra.mxu1 %v980_v18  ;;  %2076 = vmatprep.subr.mxu0 %v849_v19  ;;  %v808_v63 = vld [vmem:[%s5455_s1 + $0x1850] sm:$0xff]  ;;  %v805_v1 = vld [vmem:[%s5455_s1 + $0x1838] sm:$0xff] }
 0x1d7   :  { %2147 = vmatprep.subr.mxu1 %v977_v20  ;;  %2077 = vmatpush1.msra.mxu0 %v848_v21  ;;  %v936_v0 = vld [vmem:[%s5455_s1 + $0x1c50] sm:$0xff]  ;;  %v933_v2 = vld [vmem:[%s5455_s1 + $0x1c38] sm:$0xff] }
 0x1d8   :  { %2148 = vmatpush1.msra.mxu1 %v976_v22  ;;  %2078 = vmatprep.subr.mxu0 %v845_v23  ;;  %v804_v3 = vld [vmem:[%s5455_s1 + $0x1830] sm:$0xff]  ;;  %v801_v5 = vld [vmem:[%s5455_s1 + $0x1818] sm:$0xff] }
 0x1d9   :  { %2149 = vmatprep.subr.mxu1 %v973_v24  ;;  %2079 = vmatpush1.msra.mxu0 %v844_v26  ;;  %v932_v4 = vld [vmem:[%s5455_s1 + $0x1c30] sm:$0xff]  ;;  %v929_v6 = vld [vmem:[%s5455_s1 + $0x1c18] sm:$0xff] }
 0x1da   :  { %2150 = vmatpush1.msra.mxu1 %v972_v27  ;;  %2080 = vmatprep.subr.mxu0 %v841_v28  ;;  %v800_v7 = vld [vmem:[%s5455_s1 + $0x1810] sm:$0xff]  ;;  %v925_v9 = vld [vmem:[%s5455_s1 + $0x1bf8] sm:$0xff] }
 0x1db   :  { %2151 = vmatprep.subr.mxu1 %v969_v29  ;;  %2081 = vmatpush1.msra.mxu0 %v840_v30  ;;  %v928_v8 = vld [vmem:[%s5455_s1 + $0x1c10] sm:$0xff]  ;;  %v1053_v10 = vld [vmem:[%s5455_s1 + $0x1ff8] sm:$0xff] }
 0x1dc   :  { %2152 = vmatpush1.msra.mxu1 %v968_v31  ;;  %2082 = vmatprep.subr.mxu0 %v837_v32  ;;  %v924_v11 = vld [vmem:[%s5455_s1 + $0x1bf0] sm:$0xff]  ;;  %v921_v13 = vld [vmem:[%s5455_s1 + $0x1bd8] sm:$0xff] }
 0x1dd   :  { %2153 = vmatprep.subr.mxu1 %v965_v33  ;;  %2083 = vmatpush1.msra.mxu0 %v836_v34  ;;  %v1052_v12 = vld [vmem:[%s5455_s1 + $0x1ff0] sm:$0xff]  ;;  %v1049_v14 = vld [vmem:[%s5455_s1 + $0x1fd8] sm:$0xff] }
 0x1de   :  { %2154 = vmatpush1.msra.mxu1 %v964_v35  ;;  %2084 = vmatprep.subr.mxu0 %v833_v36  ;;  %v920_v15 = vld [vmem:[%s5455_s1 + $0x1bd0] sm:$0xff]  ;;  %v917_v17 = vld [vmem:[%s5455_s1 + $0x1bb8] sm:$0xff] }
 0x1df   :  { %2155 = vmatprep.subr.mxu1 %v961_v38  ;;  %2085 = vmatpush1.msra.mxu0 %v832_v39  ;;  %v1048_v16 = vld [vmem:[%s5455_s1 + $0x1fd0] sm:$0xff]  ;;  %v1045_v18 = vld [vmem:[%s5455_s1 + $0x1fb8] sm:$0xff] }
 0x1e0   :  { %2156 = vmatpush1.msra.mxu1 %v960_v40  ;;  %2086 = vmatprep.subr.mxu0 %v829_v41  ;;  %v916_v19 = vld [vmem:[%s5455_s1 + $0x1bb0] sm:$0xff]  ;;  %v913_v21 = vld [vmem:[%s5455_s1 + $0x1b98] sm:$0xff] }
 0x1e1   :  { %2157 = vmatprep.subr.mxu1 %v957_v42  ;;  %2087 = vmatpush1.msra.mxu0 %v828_v43  ;;  %v1044_v20 = vld [vmem:[%s5455_s1 + $0x1fb0] sm:$0xff]  ;;  %v1041_v22 = vld [vmem:[%s5455_s1 + $0x1f98] sm:$0xff] }
 0x1e2   :  { %2158 = vmatpush1.msra.mxu1 %v956_v44  ;;  %2088 = vmatprep.subr.mxu0 %v825_v45  ;;  %v912_v23 = vld [vmem:[%s5455_s1 + $0x1b90] sm:$0xff]  ;;  %v909_v26 = vld [vmem:[%s5455_s1 + $0x1b78] sm:$0xff] }
 0x1e3   :  { %2159 = vmatprep.subr.mxu1 %v953_v46  ;;  %2089 = vmatpush1.msra.mxu0 %v824_v47  ;;  %v1040_v24 = vld [vmem:[%s5455_s1 + $0x1f90] sm:$0xff]  ;;  %v1037_v27 = vld [vmem:[%s5455_s1 + $0x1f78] sm:$0xff] }
 0x1e4   :  { %2160 = vmatpush1.msra.mxu1 %v952_v48  ;;  %2090 = vmatprep.subr.mxu0 %v821_v49  ;;  %v908_v28 = vld [vmem:[%s5455_s1 + $0x1b70] sm:$0xff]  ;;  %v905_v30 = vld [vmem:[%s5455_s1 + $0x1b58] sm:$0xff] }
 0x1e5   :  { %2161 = vmatprep.subr.mxu1 %v949_v50  ;;  %2091 = vmatpush1.msra.mxu0 %v820_v51  ;;  %v1036_v29 = vld [vmem:[%s5455_s1 + $0x1f70] sm:$0xff]  ;;  %v1033_v31 = vld [vmem:[%s5455_s1 + $0x1f58] sm:$0xff] }
 0x1e6   :  { %2162 = vmatpush1.msra.mxu1 %v948_v52  ;;  %2092 = vmatprep.subr.mxu0 %v817_v53  ;;  %v904_v32 = vld [vmem:[%s5455_s1 + $0x1b50] sm:$0xff]  ;;  %v901_v34 = vld [vmem:[%s5455_s1 + $0x1b38] sm:$0xff] }
 0x1e7   :  { %2163 = vmatprep.subr.mxu1 %v945_v54  ;;  %2093 = vmatpush1.msra.mxu0 %v816_v55  ;;  %v1032_v33 = vld [vmem:[%s5455_s1 + $0x1f50] sm:$0xff]  ;;  %v1029_v35 = vld [vmem:[%s5455_s1 + $0x1f38] sm:$0xff] }
 0x1e8   :  { %2164 = vmatpush1.msra.mxu1 %v944_v56  ;;  %2094 = vmatprep.subr.mxu0 %v813_v57  ;;  %v900_v36 = vld [vmem:[%s5455_s1 + $0x1b30] sm:$0xff]  ;;  %v897_v39 = vld [vmem:[%s5455_s1 + $0x1b18] sm:$0xff] }
 0x1e9   :  { %2165 = vmatprep.subr.mxu1 %v941_v58  ;;  %2095 = vmatpush1.msra.mxu0 %v812_v59  ;;  %v1028_v38 = vld [vmem:[%s5455_s1 + $0x1f30] sm:$0xff]  ;;  %v1025_v40 = vld [vmem:[%s5455_s1 + $0x1f18] sm:$0xff] }
 0x1ea   :  { %2166 = vmatpush1.msra.mxu1 %v940_v60  ;;  %2096 = vmatprep.subr.mxu0 %v809_v61  ;;  %v896_v41 = vld [vmem:[%s5455_s1 + $0x1b10] sm:$0xff]  ;;  %v893_v43 = vld [vmem:[%s5455_s1 + $0x1af8] sm:$0xff] }
 0x1eb   :  { %2167 = vmatprep.subr.mxu1 %v937_v62  ;;  %2097 = vmatpush1.msra.mxu0 %v808_v63  ;;  %v1024_v42 = vld [vmem:[%s5455_s1 + $0x1f10] sm:$0xff]  ;;  %v1021_v44 = vld [vmem:[%s5455_s1 + $0x1ef8] sm:$0xff] }
 0x1ec   :  { %2168 = vmatpush1.msra.mxu1 %v936_v0  ;;  %2098 = vmatprep.subr.mxu0 %v805_v1  ;;  %v892_v45 = vld [vmem:[%s5455_s1 + $0x1af0] sm:$0xff]  ;;  %v889_v47 = vld [vmem:[%s5455_s1 + $0x1ad8] sm:$0xff] }
 0x1ed   :  { %2169 = vmatprep.subr.mxu1 %v933_v2  ;;  %2099 = vmatpush1.msra.mxu0 %v804_v3  ;;  %v1020_v46 = vld [vmem:[%s5455_s1 + $0x1ef0] sm:$0xff]  ;;  %v1017_v48 = vld [vmem:[%s5455_s1 + $0x1ed8] sm:$0xff] }
 0x1ee   :  { %2170 = vmatpush1.msra.mxu1 %v932_v4  ;;  %2100 = vmatprep.subr.mxu0 %v801_v5  ;;  %v888_v49 = vld [vmem:[%s5455_s1 + $0x1ad0] sm:$0xff]  ;;  %v885_v51 = vld [vmem:[%s5455_s1 + $0x1ab8] sm:$0xff] }
 0x1ef   :  { %2171 = vmatprep.subr.mxu1 %v929_v6  ;;  %2101 = vmatpush1.msra.mxu0 %v800_v7  ;;  %v1016_v50 = vld [vmem:[%s5455_s1 + $0x1ed0] sm:$0xff]  ;;  %v1013_v52 = vld [vmem:[%s5455_s1 + $0x1eb8] sm:$0xff] }
 0x1f0   :  { %2172 = vmatpush1.msra.mxu1 %v928_v8  ;;  %2102 = vmatprep.subr.mxu0 %v925_v9  ;;  %v884_v53 = vld [vmem:[%s5455_s1 + $0x1ab0] sm:$0xff]  ;;  %v881_v55 = vld [vmem:[%s5455_s1 + $0x1a98] sm:$0xff] }
 0x1f1   :  { %2173 = vmatprep.subr.mxu1 %v1053_v10  ;;  %2103 = vmatpush2.msra.mxu0 %v924_v11  ;;  %v1012_v54 = vld [vmem:[%s5455_s1 + $0x1eb0] sm:$0xff]  ;;  %v1009_v56 = vld [vmem:[%s5455_s1 + $0x1e98] sm:$0xff]  ;;  %v2236_v11 = vld [vmem:[%s5456_s0 + $0x68] sm:$0xff] }
 0x1f2   :  { %2174 = vmatpush2.msra.mxu1 %v1052_v12  ;;  %2104 = vmatprep.subr.mxu0 %v921_v13  ;;  %v880_v57 = vld [vmem:[%s5455_s1 + $0x1a90] sm:$0xff]  ;;  %v877_v59 = vld [vmem:[%s5455_s1 + $0x1a78] sm:$0xff]  ;;  %v2238_v13 = vld [vmem:[%s5456_s0 + $0x60] sm:$0xff] }
 0x1f3   :  { %2175 = vmatprep.subr.mxu1 %v1049_v14  ;;  %2105 = vmatpush2.msra.mxu0 %v920_v15  ;;  %v1008_v58 = vld [vmem:[%s5455_s1 + $0x1e90] sm:$0xff]  ;;  %v1005_v60 = vld [vmem:[%s5455_s1 + $0x1e78] sm:$0xff]  ;;  %v1066_v15 = vsub.s32 2, %v4828_v25 }
 0x1f4   :  { %2176 = vmatpush2.msra.mxu1 %v1048_v16  ;;  %2106 = vmatprep.subr.mxu0 %v917_v17  ;;  %v876_v61 = vld [vmem:[%s5455_s1 + $0x1a70] sm:$0xff]  ;;  %v873_v63 = vld [vmem:[%s5455_s1 + $0x1a58] sm:$0xff]  ;;  %v1070_v16 = vsub.s32 3, %v4828_v25 }
 0x1f5   :  { %2177 = vmatprep.subr.mxu1 %v1045_v18  ;;  %2107 = vmatpush2.msra.mxu0 %v916_v19  ;;  %v1004_v62 = vld [vmem:[%s5455_s1 + $0x1e70] sm:$0xff]  ;;  %v1001_v0 = vld [vmem:[%s5455_s1 + $0x1e58] sm:$0xff]  ;;  %v1067_v18 = vrot.slane %v4864_v37, %v1066_v15 }
 0x1f6   :  { %2178 = vmatpush2.msra.mxu1 %v1044_v20  ;;  %2108 = vmatprep.subr.mxu0 %v913_v21  ;;  %v872_v1 = vld [vmem:[%s5455_s1 + $0x1a50] sm:$0xff]  ;;  %v869_v3 = vld [vmem:[%s5455_s1 + $0x1a38] sm:$0xff]  ;;  %v1071_v19 = vrot.slane %v4864_v37, %v1070_v16 }
 0x1f7   :  { %2179 = vmatprep.subr.mxu1 %v1041_v22  ;;  %2109 = vmatpush2.msra.mxu0 %v912_v23  ;;  %v1000_v2 = vld [vmem:[%s5455_s1 + $0x1e50] sm:$0xff]  ;;  %v997_v4 = vld [vmem:[%s5455_s1 + $0x1e38] sm:$0xff] }
 0x1f8   :  { %2180 = vmatpush2.msra.mxu1 %v1040_v24  ;;  %2110 = vmatprep.subr.mxu0 %v909_v26  ;;  %v868_v5 = vld [vmem:[%s5455_s1 + $0x1a30] sm:$0xff]  ;;  %v865_v7 = vld [vmem:[%s5455_s1 + $0x1a18] sm:$0xff] }
 0x1f9   :  { %2181 = vmatprep.subr.mxu1 %v1037_v27  ;;  %2111 = vmatpush2.msra.mxu0 %v908_v28  ;;  %v996_v6 = vld [vmem:[%s5455_s1 + $0x1e30] sm:$0xff]  ;;  %v993_v8 = vld [vmem:[%s5455_s1 + $0x1e18] sm:$0xff] }
 0x1fa   :  { %2182 = vmatpush2.msra.mxu1 %v1036_v29  ;;  %2112 = vmatprep.subr.mxu0 %v905_v30  ;;  %v864_v9 = vld [vmem:[%s5455_s1 + $0x1a10] sm:$0xff]  ;;  %v2237_v12 = vld [vmem:[%s5456_s0 + $0x78] sm:$0xff] }
 0x1fb   :  { %2183 = vmatprep.subr.mxu1 %v1033_v31  ;;  %2113 = vmatpush2.msra.mxu0 %v904_v32  ;;  %v992_v10 = vld [vmem:[%s5455_s1 + $0x1e10] sm:$0xff] }
 0x1fc   :  { %2184 = vmatpush2.msra.mxu1 %v1032_v33  ;;  %2114 = vmatprep.subr.mxu0 %v901_v34  ;;  %v2239_v14 = vld [vmem:[%s5456_s0 + $0x70] sm:$0xff] }
 0x1fd   :  { %2185 = vmatprep.subr.mxu1 %v1029_v35  ;;  %2115 = vmatpush2.msra.mxu0 %v900_v36 }
 0x1fe   :  { %2186 = vmatpush2.msra.mxu1 %v1028_v38  ;;  %2116 = vmatprep.subr.mxu0 %v897_v39 }
 0x1ff   :  { %2187 = vmatprep.subr.mxu1 %v1025_v40  ;;  %2117 = vmatpush2.msra.mxu0 %v896_v41 }
 0x200   :  { %2188 = vmatpush2.msra.mxu1 %v1024_v42  ;;  %2118 = vmatprep.subr.mxu0 %v893_v43 }
 0x201   :  { %2189 = vmatprep.subr.mxu1 %v1021_v44  ;;  %2119 = vmatpush2.msra.mxu0 %v892_v45 }
 0x202   :  { %2190 = vmatpush2.msra.mxu1 %v1020_v46  ;;  %2120 = vmatprep.subr.mxu0 %v889_v47 }
 0x203   :  { %2191 = vmatprep.subr.mxu1 %v1017_v48  ;;  %2121 = vmatpush2.msra.mxu0 %v888_v49 }
 0x204   :  { %2192 = vmatpush2.msra.mxu1 %v1016_v50  ;;  %2122 = vmatprep.subr.mxu0 %v885_v51 }
 0x205   :  { %2193 = vmatprep.subr.mxu1 %v1013_v52  ;;  %2123 = vmatpush2.msra.mxu0 %v884_v53 }
 0x206   :  { %2194 = vmatpush2.msra.mxu1 %v1012_v54  ;;  %2124 = vmatprep.subr.mxu0 %v881_v55 }
 0x207   :  { %2195 = vmatprep.subr.mxu1 %v1009_v56  ;;  %2125 = vmatpush2.msra.mxu0 %v880_v57 }
 0x208   :  { %2196 = vmatpush2.msra.mxu1 %v1008_v58  ;;  %2126 = vmatprep.subr.mxu0 %v877_v59 }
 0x209   :  { %2197 = vmatprep.subr.mxu1 %v1005_v60  ;;  %2127 = vmatpush2.msra.mxu0 %v876_v61 }
 0x20a   :  { %2198 = vmatpush2.msra.mxu1 %v1004_v62  ;;  %2128 = vmatprep.subr.mxu0 %v873_v63 }
 0x20b   :  { %2199 = vmatprep.subr.mxu1 %v1001_v0  ;;  %2129 = vmatpush2.msra.mxu0 %v872_v1  ;;  %v1710_v17 = vpop.f32.mrf.mxu0 }
 0x20c   :  { %2200 = vmatpush2.msra.mxu1 %v1000_v2  ;;  %2130 = vmatprep.subr.mxu0 %v869_v3  ;;  %v1711_v22 = vadd.f32 %v1710_v17, %v1067_v18 }
 0x20d   :  { %2201 = vmatprep.subr.mxu1 %v997_v4  ;;  %2131 = vmatpush2.msra.mxu0 %v868_v5  ;;  %v1781_v20 = vpop.f32.mrf.mxu1  ;;  %v1712_v21 = vpop.f32.mrf.mxu0 }
 0x20e   :  { %2202 = vmatpush2.msra.mxu1 %v996_v6  ;;  %2132 = vmatprep.subr.mxu0 %v865_v7  ;;  %v1713_v24 = vadd.f32 %v1712_v21, %v1071_v19  ;;  %v1782_v27 = vadd.f32 %v1781_v20, %v1711_v22 }
 0x20f   :  { %2203 = vmatprep.subr.mxu1 %v993_v8  ;;  %2133 = vmatpush2.msra.mxu0 %v864_v9  ;;  %v1783_v26 = vpop.f32.mrf.mxu1 }
 0x210   :  { %2134 = vmatprep.mubr.f32.mxu0 %v2236_v11  ;;  %2204 = vmatpush2.msra.mxu1 %v992_v10  ;;  %v1784_v30 = vadd.f32 %v1783_v26, %v1713_v24 }
 0x211   :  { %2205 = vmatprep.mubr.f32.mxu1 %v2237_v12  ;;  %2135 = vmatmul.mubr.f32.vlgmr.msra.gmra.mxu0 %v2238_v13 }
 0x212   :  { %2206 = vmatmul.mubr.f32.vlgmr.msra.gmra.mxu1 %v2239_v14 }
 0x24d   :  { %v1852_v23 = vpop.f32.mrf.mxu0 }
 0x24e   :  { %v1853_v31 = vadd.f32 %v1852_v23, %v1782_v27 }
 0x24f   :  { %v1923_v28 = vpop.f32.mrf.mxu1  ;;  %v1854_v29 = vpop.f32.mrf.mxu0 }
 0x250   :  { %v1855_v33 = vadd.f32 %v1854_v29, %v1784_v30  ;;  %v1924_v25 = vadd.f32 %v1923_v28, %v1853_v31 }
 0x251   :  { %v1925_v34 = vpop.f32.mrf.mxu1 }
 0x252   :  { %v1926_v38 = vadd.f32 %v1925_v34, %v1855_v33 }
 0x28f   :  { %v1994_v32 = vpop.f32.mrf.mxu0 }
 0x290   :  { %v1995_v39 = vadd.f32 %v1994_v32, %v1924_v25 }
 0x291   :  { %v2065_v35 = vpop.f32.mrf.mxu1  ;;  %v1996_v36 = vpop.f32.mrf.mxu0 }
 0x292   :  { %v1997_v37 = vadd.f32 %v1996_v36, %v1926_v38  ;;  %v2066_v41 = vadd.f32 %v2065_v35, %v1995_v39 }
 0x293   :  { %v2067_v40 = vpop.f32.mrf.mxu1 }
 0x294   :  { %v2068_v44 = vadd.f32 %v2067_v40, %v1997_v37 }
 0x2d1   :  { %v2136_v42 = vpop.f32.mrf.mxu0 }
 0x2d2   :  { %v2207_v43 = vpop.f32.mrf.mxu1  ;;  %v2137_v45 = vadd.f32 %v2136_v42, %v2066_v41 }
 0x2d3   :  { %v2138_v46 = vpop.f32.mrf.mxu0 }
 0x2d4   :  { %v2208_v47 = vadd.f32 %v2207_v43, %v2137_v45  ;;  %v2139_v48 = vadd.f32 %v2138_v46, %v2068_v44  ;;  %v2209_v49 = vpop.f32.mrf.mxu1 }
 0x2d6   :  { %v2214_v50 = vmax.f32 %v2208_v47, 0.0  ;;  %v2210_v51 = vadd.f32 %v2209_v49, %v2139_v48 }
 0x2d8   :  { %2218 = vst [vmem:[%s5458_s3 + $0x10] sm:$0xff] %v2214_v50  ;;  %v2215_v52 = vmax.f32 %v2210_v51, 0.0 }
 0x2da   :  { %2219 = vst [vmem:[%s5458_s3 + $0x18] sm:$0xff] %v2215_v52 }

</bundles_post_ra>
